<compile_context>
chip_gen: v7x
topology: tpu7x:2x2x1
jax: 0.10.0
libtpu: 0.0.40
codegen_flags: <defaults>
</compile_context>

<pallas_src>
import math
import functools

import numpy as np
import jax
import jax.numpy as jnp
from jax.experimental import pallas as pl
from jax.experimental.pallas import tpu as pltpu


# ----------------------------- tiling helpers -----------------------------

def _pick_tile(n, target, align):
    """Largest divisor of n that is <= target and (multiple of align or == n)."""
    for d in range(min(n, target), 0, -1):
        if n % d == 0 and (d % align == 0 or d == n):
            return d
    return n


def _tile_rows(n, target):    # second-to-last (sublane) dim
    return _pick_tile(n, target, 8)


def _tile_lanes(n, target):   # last (lane) dim
    return _pick_tile(n, target, 128)


def _cparams(*sems):
    return pltpu.CompilerParams(dimension_semantics=tuple(sems),
                                vmem_limit_bytes=32 * 1024 * 1024)


# ----------------------------- Pallas kernels -----------------------------

def _ln_scale_shift_kernel(x_ref, a_ref, b_ref, o_ref, *, eps):
    # x: (1, tL, C); a/b: (1, 1, C).  out = LN(x) * a + b
    x = x_ref[0].astype(jnp.float32)
    mu = jnp.mean(x, axis=-1, keepdims=True)
    xc = x - mu
    var = jnp.mean(xc * xc, axis=-1, keepdims=True)
    xn = xc * jax.lax.rsqrt(var + eps)
    o_ref[0] = (xn * a_ref[0] + b_ref[0]).astype(o_ref.dtype)


def _proj_kernel(x_ref, w_ref, b_ref, *rest, do_rms, do_rope, eps):
    # Fused linear (+ optional RMSNorm, + optional RoPE) for q/k/v projections.
    # x: (1, tm, tk) bf16; w: (tk, N) bf16; b/rms: (1, N) f32;
    # cos/sin: (1, tm, N_per_head_half) f32; out: (1, tm, N) bf16.
    i = 0
    rms_ref = cos_ref = sin_ref = None
    if do_rms:
        rms_ref = rest[i]; i += 1
    if do_rope:
        cos_ref, sin_ref = rest[i], rest[i + 1]; i += 2
    o_ref, acc_ref = rest[i], rest[i + 1]

    kk = pl.program_id(2)

    @pl.when(kk == 0)
    def _init():
        acc_ref[...] = jnp.zeros_like(acc_ref)

    acc_ref[...] += jnp.dot(x_ref[0], w_ref[...],
                            preferred_element_type=jnp.float32)

    @pl.when(kk == pl.num_programs(2) - 1)
    def _finish():
        y = acc_ref[...] + b_ref[...]
        if do_rms:
            ms = jnp.mean(y * y, axis=-1, keepdims=True)
            y = y * jax.lax.rsqrt(ms + eps) * rms_ref[...]
        if do_rope:
            # Weight columns were pre-permuted per head to [even | odd], so the
            # complex rotation is two contiguous half-slices per head.
            c = cos_ref[0]
            s = sin_ref[0]
            half = c.shape[-1]
            dh = 2 * half
            nheads = y.shape[-1] // dh
            parts = []
            for h in range(nheads):
                yr = y[:, h * dh:h * dh + half]
                yi = y[:, h * dh + half:(h + 1) * dh]
                parts.append(yr * c - yi * s)
                parts.append(yr * s + yi * c)
            y = jnp.concatenate(parts, axis=-1)
        o_ref[0] = y.astype(o_ref.dtype)


def _linear_kernel(x_ref, w_ref, b_ref, *rest, act, add_res, use_gate):
    # Tiled linear with optional tanh-GELU and fused residual(+gate) epilogue.
    i = 0
    res_ref = g_ref = None
    if add_res:
        res_ref = rest[i]; i += 1
        if use_gate:
            g_ref = rest[i]; i += 1
    o_ref, acc_ref = rest[i], rest[i + 1]

    kk = pl.program_id(3)

    @pl.when(kk == 0)
    def _init():
        acc_ref[...] = jnp.zeros_like(acc_ref)

    acc_ref[...] += jnp.dot(x_ref[0], w_ref[...],
                            preferred_element_type=jnp.float32)

    @pl.when(kk == pl.num_programs(3) - 1)
    def _finish():
        y = acc_ref[...] + b_ref[...]
        if act == "gelu_tanh":
            c0 = 0.7978845608028654  # sqrt(2/pi)
            y = 0.5 * y * (1.0 + jnp.tanh(c0 * (y + 0.044715 * y * y * y)))
        if add_res:
            if use_gate:
                y = res_ref[0] + y * g_ref[0]
            else:
                y = res_ref[0] + y
        o_ref[0] = y.astype(o_ref.dtype)


def _flash_kernel(lens_ref, q_ref, k_ref, v_ref, o_ref, m_sc, l_sc, acc_sc):
    # Flash attention with k_lens masking.  The 1/sqrt(D) scale is pre-folded
    # into the q RMSNorm weight, so no scaling happens here.
    b = pl.program_id(0)
    ki = pl.program_id(3)

    @pl.when(ki == 0)
    def _init():
        m_sc[...] = jnp.full_like(m_sc, -1e30)
        l_sc[...] = jnp.zeros_like(l_sc)
        acc_sc[...] = jnp.zeros_like(acc_sc)

    klen = lens_ref[b]
    q = q_ref[0]                                   # (tq, D) bf16
    k = k_ref[0]                                   # (tk, D) bf16
    s = jax.lax.dot_general(q, k, (((1,), (1,)), ((), ())),
                            preferred_element_type=jnp.float32)   # (tq, tk)
    blk = s.shape[-1]
    col = ki * blk + jax.lax.broadcasted_iota(jnp.int32, s.shape, 1)
    valid = col < klen
    s = jnp.where(valid, s, -1e30)

    m_prev = m_sc[...]
    m_new = jnp.maximum(m_prev, jnp.max(s, axis=-1, keepdims=True))
    alpha = jnp.exp(m_prev - m_new)
    p = jnp.exp(s - m_new)
    p = jnp.where(valid, p, 0.0)

    l_sc[...] = alpha * l_sc[...] + jnp.sum(p, axis=-1, keepdims=True)
    acc_sc[...] = alpha * acc_sc[...] + jnp.dot(
        p.astype(v_ref.dtype), v_ref[0], preferred_element_type=jnp.float32)
    m_sc[...] = m_new

    @pl.when(ki == pl.num_programs(3) - 1)
    def _finish():
        denom = l_sc[...]
        denom = jnp.where(denom == 0.0, 1.0, denom)   # fully-masked rows -> 0
        o_ref[0] = (acc_sc[...] * pl.reciprocal(denom, approx=True)
                    ).astype(o_ref.dtype)


# ----------------------------- wrappers -----------------------------

def ln_scale_shift(x, a, b, eps, out_dtype=jnp.bfloat16, tl_target=512):
    B, L, C = x.shape
    tl = _tile_rows(L, tl_target)
    return pl.pallas_call(
        functools.partial(_ln_scale_shift_kernel, eps=eps),
        out_shape=jax.ShapeDtypeStruct((B, L, C), out_dtype),
        grid=(B, L // tl),
        in_specs=[pl.BlockSpec((1, tl, C), lambda bb, i: (bb, i, 0)),
                  pl.BlockSpec((1, 1, C), lambda bb, i: (bb, 0, 0)),
                  pl.BlockSpec((1, 1, C), lambda bb, i: (bb, 0, 0))],
        out_specs=pl.BlockSpec((1, tl, C), lambda bb, i: (bb, i, 0)),
        compiler_params=_cparams("parallel", "parallel"),
    )(x, a.astype(jnp.float32), b.astype(jnp.float32))


def qkv_proj(x, w, b, *, rms_w=None, cos=None, sin=None, eps=1e-6,
             tm_target=256, tk_target=512):
    """Linear + optional RMSNorm + optional RoPE, output bf16 [B, L, N_out]."""
    B, L, K = x.shape
    n_out = w.shape[1]
    tm = _tile_rows(L, tm_target)
    tk = _tile_lanes(K, tk_target)
    do_rms = rms_w is not None
    do_rope = cos is not None

    ins = [x.astype(jnp.bfloat16), w.astype(jnp.bfloat16),
           b.reshape(1, n_out).astype(jnp.float32)]
    in_specs = [pl.BlockSpec((1, tm, tk), lambda bb, i, kk: (bb, i, kk)),
                pl.BlockSpec((tk, n_out), lambda bb, i, kk: (kk, 0)),
                pl.BlockSpec((1, n_out), lambda bb, i, kk: (0, 0))]
    if do_rms:
        ins.append(rms_w.reshape(1, n_out).astype(jnp.float32))
        in_specs.append(pl.BlockSpec((1, n_out), lambda bb, i, kk: (0, 0)))
    if do_rope:
        half = cos.shape[-1]
        ins += [cos.astype(jnp.float32), sin.astype(jnp.float32)]
        in_specs += [pl.BlockSpec((1, tm, half), lambda bb, i, kk: (bb, i, 0)),
                     pl.BlockSpec((1, tm, half), lambda bb, i, kk: (bb, i, 0))]

    return pl.pallas_call(
        functools.partial(_proj_kernel, do_rms=do_rms, do_rope=do_rope, eps=eps),
        out_shape=jax.ShapeDtypeStruct((B, L, n_out), jnp.bfloat16),
        grid=(B, L // tm, K // tk),
        in_specs=in_specs,
        out_specs=pl.BlockSpec((1, tm, n_out), lambda bb, i, kk: (bb, i, 0)),
        scratch_shapes=[pltpu.VMEM((tm, n_out), jnp.float32)],
        compiler_params=_cparams("parallel", "parallel", "arbitrary"),
    )(*ins)


def linear(x, w, b, *, act=None, residual=None, gate=None,
           out_dtype=jnp.bfloat16, tm_target=256, tn_target=256, tk_target=512):
    """Tiled (M, N, K) linear; optional tanh-GELU; optional fused residual+gate."""
    B, L, K = x.shape
    n_out = w.shape[1]
    tm = _tile_rows(L, tm_target)
    tn = _tile_lanes(n_out, tn_target)
    tk = _tile_lanes(K, tk_target)
    add_res = residual is not None
    use_gate = gate is not None

    ins = [x.astype(jnp.bfloat16), w.astype(jnp.bfloat16),
           b.reshape(1, n_out).astype(jnp.float32)]
    in_specs = [pl.BlockSpec((1, tm, tk), lambda bb, i, j, kk: (bb, i, kk)),
                pl.BlockSpec((tk, tn), lambda bb, i, j, kk: (kk, j)),
                pl.BlockSpec((1, tn), lambda bb, i, j, kk: (0, j))]
    io_alias = {}
    if add_res:
        ins.append(residual.astype(out_dtype))
        in_specs.append(pl.BlockSpec((1, tm, tn), lambda bb, i, j, kk: (bb, i, j)))
        io_alias = {3: 0}   # update the residual stream in place
        if use_gate:
            ins.append(gate.astype(jnp.float32))
            in_specs.append(pl.BlockSpec((1, 1, tn), lambda bb, i, j, kk: (bb, 0, j)))

    return pl.pallas_call(
        functools.partial(_linear_kernel, act=act, add_res=add_res,
                          use_gate=use_gate),
        out_shape=jax.ShapeDtypeStruct((B, L, n_out), out_dtype),
        grid=(B, L // tm, n_out // tn, K // tk),
        in_specs=in_specs,
        out_specs=pl.BlockSpec((1, tm, tn), lambda bb, i, j, kk: (bb, i, j)),
        scratch_shapes=[pltpu.VMEM((tm, tn), jnp.float32)],
        input_output_aliases=io_alias,
        compiler_params=_cparams("parallel", "parallel", "parallel", "arbitrary"),
    )(*ins)


def flash_attention(q, k, v, k_lens, *, num_heads, tq_target=256, tk_target=512):
    """q: [B, Lq, C], k/v: [B, Lk, C] (bf16, head-major channels); out bf16."""
    B, Lq, C = q.shape
    Lk = k.shape[1]
    assert C % num_heads == 0
    D = C // num_heads
    # Heads are sliced from the channel (lane) dim via BlockSpec; needs a
    # lane-aligned head_dim (WAN uses head_dim = 128).
    assert D % 128 == 0 or D == C, "head_dim must be a multiple of 128"
    tq = _tile_rows(Lq, tq_target)
    tk = _tile_rows(Lk, tk_target)
    return pl.pallas_call(
        _flash_kernel,
        out_shape=jax.ShapeDtypeStruct((B, Lq, C), jnp.bfloat16),
        grid_spec=pltpu.PrefetchScalarGridSpec(
            num_scalar_prefetch=1,
            grid=(B, num_heads, Lq // tq, Lk // tk),
            in_specs=[pl.BlockSpec((1, tq, D), lambda b, h, qi, ki, lens: (b, qi, h)),
                      pl.BlockSpec((1, tk, D), lambda b, h, qi, ki, lens: (b, ki, h)),
                      pl.BlockSpec((1, tk, D), lambda b, h, qi, ki, lens: (b, ki, h))],
            out_specs=pl.BlockSpec((1, tq, D), lambda b, h, qi, ki, lens: (b, qi, h)),
            scratch_shapes=[pltpu.VMEM((tq, 1), jnp.float32),
                            pltpu.VMEM((tq, 1), jnp.float32),
                            pltpu.VMEM((tq, D), jnp.float32)]),
        compiler_params=_cparams("parallel", "parallel", "parallel", "arbitrary"),
    )(k_lens.astype(jnp.int32), q, k, v)


# ----------------------------- forward pass -----------------------------

def wan_block_forward(params, x, e, seq_lens, context, context_lens,
                      rope_cos, rope_sin, *, num_heads, eps=1e-6,
                      cross_attn_norm=True):
    B, L, C = x.shape

    # modulation: (1,6,C)[None] + e(B,1,6,C) -> six (B,1,C) chunks (f32)
    em = params["modulation"][None, :, :, :] + e
    e0, e1, e2, e3, e4, e5 = [em[:, :, i, :] for i in range(6)]

    # ---------------- self attention ----------------
    sa = params["sa"]
    xmod = ln_scale_shift(x, 1.0 + e1, e0, eps)                  # bf16 [B,L,C]
    q = qkv_proj(xmod, sa["q_w"], sa["q_b"], rms_w=sa["nq_w"],
                 cos=rope_cos, sin=rope_sin, eps=eps)
    k = qkv_proj(xmod, sa["k_w"], sa["k_b"], rms_w=sa["nk_w"],
                 cos=rope_cos, sin=rope_sin, eps=eps)
    v = qkv_proj(xmod, sa["v_w"], sa["v_b"])
    attn = flash_attention(q, k, v, seq_lens, num_heads=num_heads)
    x = linear(attn, sa["o_w"], sa["o_b"], residual=x, gate=e2,
               out_dtype=jnp.float32)                            # x + o(attn)*e2

    # ---------------- cross attention ----------------
    ca = params["ca"]
    if cross_attn_norm:
        g3 = jnp.broadcast_to(params["norm3_w"][None, None, :], (B, 1, C))
        b3 = jnp.broadcast_to(params["norm3_b"][None, None, :], (B, 1, C))
        xn = ln_scale_shift(x, g3, b3, eps)
    else:
        xn = x
    q = qkv_proj(xn, ca["q_w"], ca["q_b"], rms_w=ca["nq_w"], eps=eps)
    kc = qkv_proj(context, ca["k_w"], ca["k_b"], rms_w=ca["nk_w"], eps=eps)
    vc = qkv_proj(context, ca["v_w"], ca["v_b"])
    attn = flash_attention(q, kc, vc, context_lens, num_heads=num_heads)
    x = linear(attn, ca["o_w"], ca["o_b"], residual=x,
               out_dtype=jnp.float32)                            # plain residual

    # ---------------- FFN ----------------
    xmod = ln_scale_shift(x, 1.0 + e4, e3, eps)
    h = linear(xmod, params["ffn"]["w1"], params["ffn"]["b1"], act="gelu_tanh")
    x = linear(h, params["ffn"]["w2"], params["ffn"]["b2"], residual=x, gate=e5,
               out_dtype=jnp.float32)                            # x + ffn(...)*e5
    return x


# ----------------------------- setup helpers -----------------------------

def init_params(key, dim, ffn_dim):
    keys = jax.random.split(key, 32)
    it = iter(keys)

    def w(shape, scale=0.02):
        return scale * jax.random.normal(next(it), shape, dtype=jnp.float32)

    def attn_params():
        return dict(
            q_w=w((dim, dim)), q_b=w((dim,)),
            k_w=w((dim, dim)), k_b=w((dim,)),
            v_w=w((dim, dim)), v_b=w((dim,)),
            o_w=w((dim, dim)), o_b=w((dim,)),
            nq_w=jnp.ones((dim,), jnp.float32) + w((dim,)),
            nk_w=jnp.ones((dim,), jnp.float32) + w((dim,)),
        )

    return dict(
        modulation=w((1, 6, dim), scale=1.0 / math.sqrt(dim)),
        sa=attn_params(),
        ca=attn_params(),
        norm3_w=jnp.ones((dim,), jnp.float32),
        norm3_b=jnp.zeros((dim,), jnp.float32),
        ffn=dict(w1=w((dim, ffn_dim)), b1=w((ffn_dim,)),
                 w2=w((ffn_dim, dim)), b2=w((dim,))),
    )


def prepare_params(raw, num_heads):
    """Fold static transforms into the weights (zero runtime cost):
       * permute self-attn q/k output columns per head to [even | odd] so the
         RoPE rotation is two contiguous half-slices (attention scores are
         invariant: q and k get the same per-head permutation);
       * fold the 1/sqrt(head_dim) softmax scale into the q RMSNorm weight."""
    C = raw["sa"]["q_w"].shape[0]
    D = C // num_heads
    half = D // 2
    scale = 1.0 / math.sqrt(D)
    idx = []
    for h in range(num_heads):
        base = h * D
        idx.extend(base + 2 * j for j in range(half))
        idx.extend(base + 2 * j + 1 for j in range(half))
    perm = np.asarray(idx, dtype=np.int32)

    sa = dict(raw["sa"])
    sa["q_w"] = raw["sa"]["q_w"][:, perm]
    sa["q_b"] = raw["sa"]["q_b"][perm]
    sa["nq_w"] = raw["sa"]["nq_w"][perm] * scale
    sa["k_w"] = raw["sa"]["k_w"][:, perm]
    sa["k_b"] = raw["sa"]["k_b"][perm]
    sa["nk_w"] = raw["sa"]["nk_w"][perm]

    ca = dict(raw["ca"])
    ca["nq_w"] = raw["ca"]["nq_w"] * scale

    out = dict(raw)
    out["sa"] = sa
    out["ca"] = ca
    return out


def build_freq_angles(max_len, head_dim, theta=10000.0):
    # Mirrors WanModel: cat of rope_params over (d-4*(d//6), 2*(d//6), 2*(d//6));
    # angles[m, i] is the complex phase of freqs[m, i].
    def rope_angles(d):
        inv = 1.0 / (theta ** (jnp.arange(0, d, 2, dtype=jnp.float32) / d))
        return jnp.outer(jnp.arange(max_len, dtype=jnp.float32), inv)
    d = head_dim
    return jnp.concatenate([rope_angles(d - 4 * (d // 6)),
                            rope_angles(2 * (d // 6)),
                            rope_angles(2 * (d // 6))], axis=1)  # [max_len, d//2]


def build_rope_cos_sin(angles, grid_sizes_list, max_len):
    # Per-batch expansion of freqs over the (F,H,W) grid; identity rotation
    # (angle 0) for positions >= f*h*w, matching the reference concat of the
    # un-roped tail.  Returns cos/sin of shape [B, max_len, head_dim//2].
    c = angles.shape[1]
    c0 = c - 2 * (c // 3)
    c1 = c // 3
    coss, sins = [], []
    for (f, h, w) in grid_sizes_list:
        sl = f * h * w
        a_f = jnp.broadcast_to(angles[:f, :c0].reshape(f, 1, 1, c0), (f, h, w, c0))
        a_h = jnp.broadcast_to(angles[:h, c0:c0 + c1].reshape(1, h, 1, c1), (f, h, w, c1))
        a_w = jnp.broadcast_to(angles[:w, c0 + c1:].reshape(1, 1, w, c1), (f, h, w, c1))
        a = jnp.concatenate([a_f, a_h, a_w], axis=-1).reshape(sl, c)
        a = jnp.concatenate([a, jnp.zeros((max_len - sl, c), jnp.float32)], axis=0)
        coss.append(jnp.cos(a))
        sins.append(jnp.sin(a))
    return jnp.stack(coss), jnp.stack(sins)


# ----------------------------- main -----------------------------

if __name__ == "__main__":
    # Small but TPU-friendly config: head_dim = 128 so per-head attention
    # blocks are lane-aligned (matches production WAN where head_dim = 128).
    dim, ffn_dim, num_heads = 256, 512, 2
    head_dim = dim // num_heads
    eps = 1e-6

    B = 2
    grid_sizes_list = [(2, 3, 4), (1, 3, 4)]                    # (F, H, W) per batch
    L = max(f * h * w for f, h, w in grid_sizes_list)           # 24
    seq_lens = jnp.array([f * h * w for f, h, w in grid_sizes_list], dtype=jnp.int32)
    L2 = 16
    context_lens = jnp.array([16, 10], dtype=jnp.int32)

    key = jax.random.PRNGKey(0)
    kx, ke, kc = jax.random.split(key, 3)
    x = jax.random.normal(kx, (B, L, dim), dtype=jnp.float32)
    e = jax.random.normal(ke, (B, 1, 6, dim), dtype=jnp.float32)
    context = jax.random.normal(kc, (B, L2, dim), dtype=jnp.float32)

    params = prepare_params(init_params(jax.random.PRNGKey(42), dim, ffn_dim),
                            num_heads)

    angles = build_freq_angles(1024, head_dim)                  # [1024, head_dim//2]
    rope_cos, rope_sin = build_rope_cos_sin(angles, grid_sizes_list, L)

    fwd = jax.jit(functools.partial(wan_block_forward, num_heads=num_heads,
                                    eps=eps, cross_attn_norm=True))
    out = fwd(params, x, e, seq_lens, context, context_lens, rope_cos, rope_sin)
    jax.block_until_ready(out)
    assert out.shape == (B, L, dim) and out.dtype == jnp.float32
    assert bool(jnp.all(jnp.isfinite(out)))
    print("KERNEL_OK")
</pallas_src>

<mosaic_0001>
module attributes {stable_mosaic.version = 11 : i64} {
  func.func @_proj_kernel(%arg0: i32, %arg1: i32, %arg2: i32, %arg3: memref<1x24x256xbf16, #tpu.memory_space<vmem>>, %arg4: memref<256x256xbf16, #tpu.memory_space<vmem>>, %arg5: memref<1x256xf32, #tpu.memory_space<vmem>>, %arg6: memref<1x256xf32, #tpu.memory_space<vmem>>, %arg7: memref<1x24x64xf32, #tpu.memory_space<vmem>>, %arg8: memref<1x24x64xf32, #tpu.memory_space<vmem>>, %arg9: memref<1x24x256xbf16, #tpu.memory_space<vmem>>, %arg10: memref<24x256xf32, #tpu.memory_space<vmem>>) attributes {dimension_semantics = [#tpu.dimension_semantics<parallel>, #tpu.dimension_semantics<parallel>, #tpu.dimension_semantics<arbitrary>], iteration_bounds = array<i64: 2, 1, 1>, scalar_prefetch = 0 : i64, scratch_operands = 1 : i64, tpu.core_type = #tpu.core_type<tc>, window_params = [{transform_indices = @transform_0, window_bounds = array<i64: 1, 24, 256>}, {transform_indices = @transform_1, window_bounds = array<i64: 256, 256>}, {pipeline_mode = #tpu.pipeline_mode<synchronous>, transform_indices = @transform_2, window_bounds = array<i64: 1, 256>}, {pipeline_mode = #tpu.pipeline_mode<synchronous>, transform_indices = @transform_3, window_bounds = array<i64: 1, 256>}, {transform_indices = @transform_4, window_bounds = array<i64: 1, 24, 64>}, {transform_indices = @transform_5, window_bounds = array<i64: 1, 24, 64>}, {transform_indices = @transform_6, window_bounds = array<i64: 1, 24, 256>}]} {
    %c0_i32 = arith.constant 0 : i32
    %0 = arith.cmpi eq, %arg2, %c0_i32 : i32
    %1 = arith.extui %0 : i1 to i32
    %c0_i32_0 = arith.constant 0 : i32
    %2 = arith.cmpi ne, %1, %c0_i32_0 : i32
    scf.if %2 {
      %cst_11 = arith.constant 0.000000e+00 : f32
      %13 = vector.broadcast %cst_11 : f32 to vector<24x256xf32>
      %c0_12 = arith.constant 0 : index
      %c0_13 = arith.constant 0 : index
      %14 = vector.load %arg10[%c0_12, %c0_13] : memref<24x256xf32, #tpu.memory_space<vmem>>, vector<24x256xf32>
      tpu.vector_store %arg10[%c0_12, %c0_13], %13 {strides = array<i32>} : memref<24x256xf32, #tpu.memory_space<vmem>>, vector<24x256xf32>,
    } else {
    }
    %c0 = arith.constant 0 : index
    %c0_1 = arith.constant 0 : index
    %3 = vector.load %arg10[%c0, %c0_1] : memref<24x256xf32, #tpu.memory_space<vmem>>, vector<24x256xf32>
    %c0_2 = arith.constant 0 : index
    %c0_3 = arith.constant 0 : index
    %c0_4 = arith.constant 0 : index
    %4 = vector.load %arg3[%c0_2, %c0_3, %c0_4] : memref<1x24x256xbf16, #tpu.memory_space<vmem>>, vector<1x24x256xbf16>
    %5 = vector.shape_cast %4 : vector<1x24x256xbf16> to vector<24x256xbf16>
    %c0_5 = arith.constant 0 : index
    %c0_6 = arith.constant 0 : index
    %6 = vector.load %arg4[%c0_5, %c0_6] : memref<256x256xbf16, #tpu.memory_space<vmem>>, vector<256x256xbf16>
    %cst = arith.constant dense<0.000000e+00> : vector<24x256xf32>
    %7 = tpu.matmul %5, %6, %cst {dimension_numbers = #tpu.dot_dimension_numbers<[1], [0], [0], [1], [0, 0, 1, 1], [], []>} : vector<24x256xbf16>, vector<256x256xbf16>, vector<24x256xf32> -> vector<24x256xf32>
    %8 = arith.addf %3, %7 : vector<24x256xf32>
    %c0_7 = arith.constant 0 : index
    %c0_8 = arith.constant 0 : index
    %9 = vector.load %arg10[%c0_7, %c0_8] : memref<24x256xf32, #tpu.memory_space<vmem>>, vector<24x256xf32>
    tpu.vector_store %arg10[%c0_7, %c0_8], %8 {strides = array<i32>} : memref<24x256xf32, #tpu.memory_space<vmem>>, vector<24x256xf32>,
    %c0_i32_9 = arith.constant 0 : i32
    %10 = arith.cmpi eq, %arg2, %c0_i32_9 : i32
    %11 = arith.extui %10 : i1 to i32
    %c0_i32_10 = arith.constant 0 : i32
    %12 = arith.cmpi ne, %11, %c0_i32_10 : i32
    scf.if %12 {
      %c0_11 = arith.constant 0 : index
      %c0_12 = arith.constant 0 : index
      %13 = vector.load %arg10[%c0_11, %c0_12] : memref<24x256xf32, #tpu.memory_space<vmem>>, vector<24x256xf32>
      %c0_13 = arith.constant 0 : index
      %c0_14 = arith.constant 0 : index
      %14 = vector.load %arg5[%c0_13, %c0_14] : memref<1x256xf32, #tpu.memory_space<vmem>>, vector<1x256xf32>
      %15 = vector.broadcast %14 : vector<1x256xf32> to vector<24x256xf32>
      %16 = arith.addf %13, %15 : vector<24x256xf32>
      %17 = arith.mulf %16, %16 : vector<24x256xf32>
      %cst_15 = arith.constant dense<0.000000e+00> : vector<24xf32>
      %18 = vector.multi_reduction <add>, %17, %cst_15 [1] : vector<24x256xf32> to vector<24xf32>
      %19 = vector.shape_cast %18 : vector<24xf32> to vector<24x1xf32>
      %cst_16 = arith.constant 2.560000e+02 : f32
      %20 = vector.broadcast %cst_16 : f32 to vector<24x1xf32>
      %21 = arith.divf %19, %20 : vector<24x1xf32>
      %cst_17 = arith.constant 9.99999997E-7 : f32
      %22 = vector.broadcast %cst_17 : f32 to vector<24x1xf32>
      %23 = arith.addf %21, %22 : vector<24x1xf32>
      %24 = math.rsqrt %23 : vector<24x1xf32>
      %25 = vector.broadcast %24 : vector<24x1xf32> to vector<24x256xf32>
      %26 = arith.mulf %16, %25 : vector<24x256xf32>
      %c0_18 = arith.constant 0 : index
      %c0_19 = arith.constant 0 : index
      %27 = vector.load %arg6[%c0_18, %c0_19] : memref<1x256xf32, #tpu.memory_space<vmem>>, vector<1x256xf32>
      %28 = vector.broadcast %27 : vector<1x256xf32> to vector<24x256xf32>
      %29 = arith.mulf %26, %28 : vector<24x256xf32>
      %c0_20 = arith.constant 0 : index
      %c0_21 = arith.constant 0 : index
      %c0_22 = arith.constant 0 : index
      %30 = vector.load %arg7[%c0_20, %c0_21, %c0_22] : memref<1x24x64xf32, #tpu.memory_space<vmem>>, vector<1x24x64xf32>
      %31 = vector.shape_cast %30 : vector<1x24x64xf32> to vector<24x64xf32>
      %c0_23 = arith.constant 0 : index
      %c0_24 = arith.constant 0 : index
      %c0_25 = arith.constant 0 : index
      %32 = vector.load %arg8[%c0_23, %c0_24, %c0_25] : memref<1x24x64xf32, #tpu.memory_space<vmem>>, vector<1x24x64xf32>
      %33 = vector.shape_cast %32 : vector<1x24x64xf32> to vector<24x64xf32>
      %34 = vector.extract_strided_slice %29 {offsets = [0, 0], sizes = [24, 64], strides = [1, 1]} : vector<24x256xf32> to vector<24x64xf32>
      %35 = vector.extract_strided_slice %29 {offsets = [0, 64], sizes = [24, 64], strides = [1, 1]} : vector<24x256xf32> to vector<24x64xf32>
      %36 = arith.mulf %34, %31 : vector<24x64xf32>
      %37 = arith.mulf %35, %33 : vector<24x64xf32>
      %38 = arith.subf %36, %37 : vector<24x64xf32>
      %39 = arith.mulf %34, %33 : vector<24x64xf32>
      %40 = arith.mulf %35, %31 : vector<24x64xf32>
      %41 = arith.addf %39, %40 : vector<24x64xf32>
      %42 = vector.extract_strided_slice %29 {offsets = [0, 128], sizes = [24, 64], strides = [1, 1]} : vector<24x256xf32> to vector<24x64xf32>
      %43 = vector.extract_strided_slice %29 {offsets = [0, 192], sizes = [24, 64], strides = [1, 1]} : vector<24x256xf32> to vector<24x64xf32>
      %44 = arith.mulf %42, %31 : vector<24x64xf32>
      %45 = arith.mulf %43, %33 : vector<24x64xf32>
      %46 = arith.subf %44, %45 : vector<24x64xf32>
      %47 = arith.mulf %42, %33 : vector<24x64xf32>
      %48 = arith.mulf %43, %31 : vector<24x64xf32>
      %49 = arith.addf %47, %48 : vector<24x64xf32>
      %50 = tpu.concatenate %38, %41, %46, %49 in 1 : vector<24x64xf32>, vector<24x64xf32>, vector<24x64xf32>, vector<24x64xf32> -> vector<24x256xf32>
      %51 = arith.truncf %50 : vector<24x256xf32> to vector<24x256xbf16>
      %c0_26 = arith.constant 0 : index
      %c0_27 = arith.constant 0 : index
      %c0_28 = arith.constant 0 : index
      %52 = vector.load %arg9[%c0_26, %c0_27, %c0_28] : memref<1x24x256xbf16, #tpu.memory_space<vmem>>, vector<1x24x256xbf16>
      %53 = vector.shape_cast %52 : vector<1x24x256xbf16> to vector<24x256xbf16>
      %54 = vector.shape_cast %51 : vector<24x256xbf16> to vector<1x24x256xbf16>
      tpu.vector_store %arg9[%c0_26, %c0_27, %c0_28], %54 {strides = array<i32>} : memref<1x24x256xbf16, #tpu.memory_space<vmem>>, vector<1x24x256xbf16>,
    } else {
    }
    return
  }
  func.func @transform_0(%arg0: i32, %arg1: i32, %arg2: i32) -> (i32, i32, i32) {
    %c0_i32 = arith.constant 0 : i32
    return %arg0, %arg1, %arg2 : i32, i32, i32
  }
  func.func @transform_1(%arg0: i32, %arg1: i32, %arg2: i32) -> (i32, i32) {
    %c0_i32 = arith.constant 0 : i32
    %c0_i32_0 = arith.constant 0 : i32
    return %arg2, %c0_i32 : i32, i32
  }
  func.func @transform_2(%arg0: i32, %arg1: i32, %arg2: i32) -> (i32, i32) {
    %c0_i32 = arith.constant 0 : i32
    %c0_i32_0 = arith.constant 0 : i32
    %c0_i32_1 = arith.constant 0 : i32
    return %c0_i32, %c0_i32_0 : i32, i32
  }
  func.func @transform_3(%arg0: i32, %arg1: i32, %arg2: i32) -> (i32, i32) {
    %c0_i32 = arith.constant 0 : i32
    %c0_i32_0 = arith.constant 0 : i32
    %c0_i32_1 = arith.constant 0 : i32
    return %c0_i32, %c0_i32_0 : i32, i32
  }
  func.func @transform_4(%arg0: i32, %arg1: i32, %arg2: i32) -> (i32, i32, i32) {
    %c0_i32 = arith.constant 0 : i32
    %c0_i32_0 = arith.constant 0 : i32
    return %arg0, %arg1, %c0_i32 : i32, i32, i32
  }
  func.func @transform_5(%arg0: i32, %arg1: i32, %arg2: i32) -> (i32, i32, i32) {
    %c0_i32 = arith.constant 0 : i32
    %c0_i32_0 = arith.constant 0 : i32
    return %arg0, %arg1, %c0_i32 : i32, i32, i32
  }
  func.func @transform_6(%arg0: i32, %arg1: i32, %arg2: i32) -> (i32, i32, i32) {
    %c0_i32 = arith.constant 0 : i32
    %c0_i32_0 = arith.constant 0 : i32
    return %arg0, %arg1, %c0_i32 : i32, i32, i32
  }
}

module attributes {stable_mosaic.version = 11 : i64} {
  func.func @_proj_kernel(%arg0: i32, %arg1: i32, %arg2: i32, %arg3: memref<1x24x256xbf16, #tpu.memory_space<vmem>>, %arg4: memref<256x256xbf16, #tpu.memory_space<vmem>>, %arg5: memref<1x256xf32, #tpu.memory_space<vmem>>, %arg6: memref<1x24x256xbf16, #tpu.memory_space<vmem>>, %arg7: memref<24x256xf32, #tpu.memory_space<vmem>>) attributes {dimension_semantics = [#tpu.dimension_semantics<parallel>, #tpu.dimension_semantics<parallel>, #tpu.dimension_semantics<arbitrary>], iteration_bounds = array<i64: 2, 1, 1>, scalar_prefetch = 0 : i64, scratch_operands = 1 : i64, tpu.core_type = #tpu.core_type<tc>, window_params = [{transform_indices = @transform_0, window_bounds = array<i64: 1, 24, 256>}, {transform_indices = @transform_1, window_bounds = array<i64: 256, 256>}, {pipeline_mode = #tpu.pipeline_mode<synchronous>, transform_indices = @transform_2, window_bounds = array<i64: 1, 256>}, {transform_indices = @transform_3, window_bounds = array<i64: 1, 24, 256>}]} {
    %c0_i32 = arith.constant 0 : i32
    %0 = arith.cmpi eq, %arg2, %c0_i32 : i32
    %1 = arith.extui %0 : i1 to i32
    %c0_i32_0 = arith.constant 0 : i32
    %2 = arith.cmpi ne, %1, %c0_i32_0 : i32
    scf.if %2 {
      %cst_11 = arith.constant 0.000000e+00 : f32
      %13 = vector.broadcast %cst_11 : f32 to vector<24x256xf32>
      %c0_12 = arith.constant 0 : index
      %c0_13 = arith.constant 0 : index
      %14 = vector.load %arg7[%c0_12, %c0_13] : memref<24x256xf32, #tpu.memory_space<vmem>>, vector<24x256xf32>
      tpu.vector_store %arg7[%c0_12, %c0_13], %13 {strides = array<i32>} : memref<24x256xf32, #tpu.memory_space<vmem>>, vector<24x256xf32>,
    } else {
    }
    %c0 = arith.constant 0 : index
    %c0_1 = arith.constant 0 : index
    %3 = vector.load %arg7[%c0, %c0_1] : memref<24x256xf32, #tpu.memory_space<vmem>>, vector<24x256xf32>
    %c0_2 = arith.constant 0 : index
    %c0_3 = arith.constant 0 : index
    %c0_4 = arith.constant 0 : index
    %4 = vector.load %arg3[%c0_2, %c0_3, %c0_4] : memref<1x24x256xbf16, #tpu.memory_space<vmem>>, vector<1x24x256xbf16>
    %5 = vector.shape_cast %4 : vector<1x24x256xbf16> to vector<24x256xbf16>
    %c0_5 = arith.constant 0 : index
    %c0_6 = arith.constant 0 : index
    %6 = vector.load %arg4[%c0_5, %c0_6] : memref<256x256xbf16, #tpu.memory_space<vmem>>, vector<256x256xbf16>
    %cst = arith.constant dense<0.000000e+00> : vector<24x256xf32>
    %7 = tpu.matmul %5, %6, %cst {dimension_numbers = #tpu.dot_dimension_numbers<[1], [0], [0], [1], [0, 0, 1, 1], [], []>} : vector<24x256xbf16>, vector<256x256xbf16>, vector<24x256xf32> -> vector<24x256xf32>
    %8 = arith.addf %3, %7 : vector<24x256xf32>
    %c0_7 = arith.constant 0 : index
    %c0_8 = arith.constant 0 : index
    %9 = vector.load %arg7[%c0_7, %c0_8] : memref<24x256xf32, #tpu.memory_space<vmem>>, vector<24x256xf32>
    tpu.vector_store %arg7[%c0_7, %c0_8], %8 {strides = array<i32>} : memref<24x256xf32, #tpu.memory_space<vmem>>, vector<24x256xf32>,
    %c0_i32_9 = arith.constant 0 : i32
    %10 = arith.cmpi eq, %arg2, %c0_i32_9 : i32
    %11 = arith.extui %10 : i1 to i32
    %c0_i32_10 = arith.constant 0 : i32
    %12 = arith.cmpi ne, %11, %c0_i32_10 : i32
    scf.if %12 {
      %c0_11 = arith.constant 0 : index
      %c0_12 = arith.constant 0 : index
      %13 = vector.load %arg7[%c0_11, %c0_12] : memref<24x256xf32, #tpu.memory_space<vmem>>, vector<24x256xf32>
      %c0_13 = arith.constant 0 : index
      %c0_14 = arith.constant 0 : index
      %14 = vector.load %arg5[%c0_13, %c0_14] : memref<1x256xf32, #tpu.memory_space<vmem>>, vector<1x256xf32>
      %15 = vector.broadcast %14 : vector<1x256xf32> to vector<24x256xf32>
      %16 = arith.addf %13, %15 : vector<24x256xf32>
      %17 = arith.truncf %16 : vector<24x256xf32> to vector<24x256xbf16>
      %c0_15 = arith.constant 0 : index
      %c0_16 = arith.constant 0 : index
      %c0_17 = arith.constant 0 : index
      %18 = vector.load %arg6[%c0_15, %c0_16, %c0_17] : memref<1x24x256xbf16, #tpu.memory_space<vmem>>, vector<1x24x256xbf16>
      %19 = vector.shape_cast %18 : vector<1x24x256xbf16> to vector<24x256xbf16>
      %20 = vector.shape_cast %17 : vector<24x256xbf16> to vector<1x24x256xbf16>
      tpu.vector_store %arg6[%c0_15, %c0_16, %c0_17], %20 {strides = array<i32>} : memref<1x24x256xbf16, #tpu.memory_space<vmem>>, vector<1x24x256xbf16>,
    } else {
    }
    return
  }
  func.func @transform_0(%arg0: i32, %arg1: i32, %arg2: i32) -> (i32, i32, i32) {
    %c0_i32 = arith.constant 0 : i32
    return %arg0, %arg1, %arg2 : i32, i32, i32
  }
  func.func @transform_1(%arg0: i32, %arg1: i32, %arg2: i32) -> (i32, i32) {
    %c0_i32 = arith.constant 0 : i32
    %c0_i32_0 = arith.constant 0 : i32
    return %arg2, %c0_i32 : i32, i32
  }
  func.func @transform_2(%arg0: i32, %arg1: i32, %arg2: i32) -> (i32, i32) {
    %c0_i32 = arith.constant 0 : i32
    %c0_i32_0 = arith.constant 0 : i32
    %c0_i32_1 = arith.constant 0 : i32
    return %c0_i32, %c0_i32_0 : i32, i32
  }
  func.func @transform_3(%arg0: i32, %arg1: i32, %arg2: i32) -> (i32, i32, i32) {
    %c0_i32 = arith.constant 0 : i32
    %c0_i32_0 = arith.constant 0 : i32
    return %arg0, %arg1, %c0_i32 : i32, i32, i32
  }
}

module attributes {stable_mosaic.version = 11 : i64} {
  func.func @_ln_scale_shift_kernel(%arg0: i32, %arg1: i32, %arg2: memref<1x24x256xf32, #tpu.memory_space<vmem>>, %arg3: memref<1x1x256xf32, #tpu.memory_space<vmem>>, %arg4: memref<1x1x256xf32, #tpu.memory_space<vmem>>, %arg5: memref<1x24x256xbf16, #tpu.memory_space<vmem>>) attributes {dimension_semantics = [#tpu.dimension_semantics<parallel>, #tpu.dimension_semantics<parallel>], iteration_bounds = array<i64: 2, 1>, scalar_prefetch = 0 : i64, scratch_operands = 0 : i64, tpu.core_type = #tpu.core_type<tc>, window_params = [{transform_indices = @transform_0, window_bounds = array<i64: 1, 24, 256>}, {transform_indices = @transform_1, window_bounds = array<i64: 1, 1, 256>}, {transform_indices = @transform_2, window_bounds = array<i64: 1, 1, 256>}, {transform_indices = @transform_3, window_bounds = array<i64: 1, 24, 256>}]} {
    %c0 = arith.constant 0 : index
    %c0_0 = arith.constant 0 : index
    %c0_1 = arith.constant 0 : index
    %0 = vector.load %arg2[%c0, %c0_0, %c0_1] : memref<1x24x256xf32, #tpu.memory_space<vmem>>, vector<1x24x256xf32>
    %1 = vector.shape_cast %0 : vector<1x24x256xf32> to vector<24x256xf32>
    %cst = arith.constant dense<0.000000e+00> : vector<24xf32>
    %2 = vector.multi_reduction <add>, %1, %cst [1] : vector<24x256xf32> to vector<24xf32>
    %3 = vector.shape_cast %2 : vector<24xf32> to vector<24x1xf32>
    %cst_2 = arith.constant 2.560000e+02 : f32
    %4 = vector.broadcast %cst_2 : f32 to vector<24x1xf32>
    %5 = arith.divf %3, %4 : vector<24x1xf32>
    %6 = vector.broadcast %5 : vector<24x1xf32> to vector<24x256xf32>
    %7 = arith.subf %1, %6 : vector<24x256xf32>
    %8 = arith.mulf %7, %7 : vector<24x256xf32>
    %cst_3 = arith.constant dense<0.000000e+00> : vector<24xf32>
    %9 = vector.multi_reduction <add>, %8, %cst_3 [1] : vector<24x256xf32> to vector<24xf32>
    %10 = vector.shape_cast %9 : vector<24xf32> to vector<24x1xf32>
    %cst_4 = arith.constant 2.560000e+02 : f32
    %11 = vector.broadcast %cst_4 : f32 to vector<24x1xf32>
    %12 = arith.divf %10, %11 : vector<24x1xf32>
    %cst_5 = arith.constant 9.99999997E-7 : f32
    %13 = vector.broadcast %cst_5 : f32 to vector<24x1xf32>
    %14 = arith.addf %12, %13 : vector<24x1xf32>
    %15 = math.rsqrt %14 : vector<24x1xf32>
    %16 = vector.broadcast %15 : vector<24x1xf32> to vector<24x256xf32>
    %17 = arith.mulf %7, %16 : vector<24x256xf32>
    %c0_6 = arith.constant 0 : index
    %c0_7 = arith.constant 0 : index
    %c0_8 = arith.constant 0 : index
    %18 = vector.load %arg3[%c0_6, %c0_7, %c0_8] : memref<1x1x256xf32, #tpu.memory_space<vmem>>, vector<1x1x256xf32>
    %19 = vector.shape_cast %18 : vector<1x1x256xf32> to vector<1x256xf32>
    %20 = vector.broadcast %19 : vector<1x256xf32> to vector<24x256xf32>
    %21 = arith.mulf %17, %20 : vector<24x256xf32>
    %c0_9 = arith.constant 0 : index
    %c0_10 = arith.constant 0 : index
    %c0_11 = arith.constant 0 : index
    %22 = vector.load %arg4[%c0_9, %c0_10, %c0_11] : memref<1x1x256xf32, #tpu.memory_space<vmem>>, vector<1x1x256xf32>
    %23 = vector.shape_cast %22 : vector<1x1x256xf32> to vector<1x256xf32>
    %24 = vector.broadcast %23 : vector<1x256xf32> to vector<24x256xf32>
    %25 = arith.addf %21, %24 : vector<24x256xf32>
    %26 = arith.truncf %25 : vector<24x256xf32> to vector<24x256xbf16>
    %c0_12 = arith.constant 0 : index
    %c0_13 = arith.constant 0 : index
    %c0_14 = arith.constant 0 : index
    %27 = vector.load %arg5[%c0_12, %c0_13, %c0_14] : memref<1x24x256xbf16, #tpu.memory_space<vmem>>, vector<1x24x256xbf16>
    %28 = vector.shape_cast %27 : vector<1x24x256xbf16> to vector<24x256xbf16>
    %29 = vector.shape_cast %26 : vector<24x256xbf16> to vector<1x24x256xbf16>
    tpu.vector_store %arg5[%c0_12, %c0_13, %c0_14], %29 {strides = array<i32>} : memref<1x24x256xbf16, #tpu.memory_space<vmem>>, vector<1x24x256xbf16>,
    return
  }
  func.func @transform_0(%arg0: i32, %arg1: i32) -> (i32, i32, i32) {
    %c0_i32 = arith.constant 0 : i32
    %c0_i32_0 = arith.constant 0 : i32
    return %arg0, %arg1, %c0_i32 : i32, i32, i32
  }
  func.func @transform_1(%arg0: i32, %arg1: i32) -> (i32, i32, i32) {
    %c0_i32 = arith.constant 0 : i32
    %c0_i32_0 = arith.constant 0 : i32
    %c0_i32_1 = arith.constant 0 : i32
    return %arg0, %c0_i32, %c0_i32_0 : i32, i32, i32
  }
  func.func @transform_2(%arg0: i32, %arg1: i32) -> (i32, i32, i32) {
    %c0_i32 = arith.constant 0 : i32
    %c0_i32_0 = arith.constant 0 : i32
    %c0_i32_1 = arith.constant 0 : i32
    return %arg0, %c0_i32, %c0_i32_0 : i32, i32, i32
  }
  func.func @transform_3(%arg0: i32, %arg1: i32) -> (i32, i32, i32) {
    %c0_i32 = arith.constant 0 : i32
    %c0_i32_0 = arith.constant 0 : i32
    return %arg0, %arg1, %c0_i32 : i32, i32, i32
  }
}

module attributes {stable_mosaic.version = 11 : i64} {
  func.func @_flash_kernel(%arg0: i32, %arg1: i32, %arg2: i32, %arg3: i32, %arg4: memref<2xi32, #tpu.memory_space<smem>>, %arg5: memref<1x24x128xbf16, #tpu.memory_space<vmem>>, %arg6: memref<1x24x128xbf16, #tpu.memory_space<vmem>>, %arg7: memref<1x24x128xbf16, #tpu.memory_space<vmem>>, %arg8: memref<1x24x128xbf16, #tpu.memory_space<vmem>>, %arg9: memref<24x1xf32, #tpu.memory_space<vmem>>, %arg10: memref<24x1xf32, #tpu.memory_space<vmem>>, %arg11: memref<24x128xf32, #tpu.memory_space<vmem>>) attributes {dimension_semantics = [#tpu.dimension_semantics<parallel>, #tpu.dimension_semantics<parallel>, #tpu.dimension_semantics<parallel>, #tpu.dimension_semantics<arbitrary>], iteration_bounds = array<i64: 2, 2, 1, 1>, scalar_prefetch = 1 : i64, scratch_operands = 3 : i64, tpu.core_type = #tpu.core_type<tc>, window_params = [{transform_indices = @transform_0, window_bounds = array<i64: 1, 24, 128>}, {transform_indices = @transform_1, window_bounds = array<i64: 1, 24, 128>}, {transform_indices = @transform_2, window_bounds = array<i64: 1, 24, 128>}, {transform_indices = @transform_3, window_bounds = array<i64: 1, 24, 128>}]} {
    %c0_i32 = arith.constant 0 : i32
    %0 = arith.cmpi eq, %arg3, %c0_i32 : i32
    %1 = arith.extui %0 : i1 to i32
    %c0_i32_0 = arith.constant 0 : i32
    %2 = arith.cmpi ne, %1, %c0_i32_0 : i32
    scf.if %2 {
      %cst_28 = arith.constant -1.000000e+30 : f32
      %48 = vector.broadcast %cst_28 : f32 to vector<24x1xf32>
      %c0_29 = arith.constant 0 : index
      %c0_30 = arith.constant 0 : index
      %49 = vector.load %arg9[%c0_29, %c0_30] : memref<24x1xf32, #tpu.memory_space<vmem>>, vector<24x1xf32>
      tpu.vector_store %arg9[%c0_29, %c0_30], %48 {strides = array<i32>} : memref<24x1xf32, #tpu.memory_space<vmem>>, vector<24x1xf32>,
      %cst_31 = arith.constant 0.000000e+00 : f32
      %50 = vector.broadcast %cst_31 : f32 to vector<24x1xf32>
      %c0_32 = arith.constant 0 : index
      %c0_33 = arith.constant 0 : index
      %51 = vector.load %arg10[%c0_32, %c0_33] : memref<24x1xf32, #tpu.memory_space<vmem>>, vector<24x1xf32>
      tpu.vector_store %arg10[%c0_32, %c0_33], %50 {strides = array<i32>} : memref<24x1xf32, #tpu.memory_space<vmem>>, vector<24x1xf32>,
      %cst_34 = arith.constant 0.000000e+00 : f32
      %52 = vector.broadcast %cst_34 : f32 to vector<24x128xf32>
      %c0_35 = arith.constant 0 : index
      %c0_36 = arith.constant 0 : index
      %53 = vector.load %arg11[%c0_35, %c0_36] : memref<24x128xf32, #tpu.memory_space<vmem>>, vector<24x128xf32>
      tpu.vector_store %arg11[%c0_35, %c0_36], %52 {strides = array<i32>} : memref<24x128xf32, #tpu.memory_space<vmem>>, vector<24x128xf32>,
    } else {
    }
    %3 = arith.index_cast %arg0 : i32 to index
    %4 = memref.load %arg4[%3] : memref<2xi32, #tpu.memory_space<smem>>
    %c0 = arith.constant 0 : index
    %c0_1 = arith.constant 0 : index
    %c0_2 = arith.constant 0 : index
    %5 = vector.load %arg5[%c0, %c0_1, %c0_2] : memref<1x24x128xbf16, #tpu.memory_space<vmem>>, vector<1x24x128xbf16>
    %6 = vector.shape_cast %5 : vector<1x24x128xbf16> to vector<24x128xbf16>
    %c0_3 = arith.constant 0 : index
    %c0_4 = arith.constant 0 : index
    %c0_5 = arith.constant 0 : index
    %7 = vector.load %arg6[%c0_3, %c0_4, %c0_5] : memref<1x24x128xbf16, #tpu.memory_space<vmem>>, vector<1x24x128xbf16>
    %8 = vector.shape_cast %7 : vector<1x24x128xbf16> to vector<24x128xbf16>
    %cst = arith.constant dense<0.000000e+00> : vector<24x24xf32>
    %9 = tpu.matmul %6, %8, %cst {dimension_numbers = #tpu.dot_dimension_numbers<[1], [1], [0], [0], [0, 0, 1, 0], [], []>} : vector<24x128xbf16>, vector<24x128xbf16>, vector<24x24xf32> -> vector<24x24xf32>
    %c24_i32 = arith.constant 24 : i32
    %10 = arith.muli %arg3, %c24_i32 : i32
    %11 = tpu.iota {dimensions = array<i32: 1>} : vector<24x24xi32>
    %12 = vector.broadcast %10 : i32 to vector<24x24xi32>
    %13 = arith.addi %12, %11 : vector<24x24xi32>
    %14 = vector.broadcast %4 : i32 to vector<24x24xi32>
    %15 = arith.cmpi slt, %13, %14 : vector<24x24xi32>
    %cst_6 = arith.constant -1.000000e+30 : f32
    %16 = vector.broadcast %cst_6 : f32 to vector<24x24xf32>
    %17 = arith.select %15, %9, %16 : vector<24x24xi1>, vector<24x24xf32>
    %c0_7 = arith.constant 0 : index
    %c0_8 = arith.constant 0 : index
    %18 = vector.load %arg9[%c0_7, %c0_8] : memref<24x1xf32, #tpu.memory_space<vmem>>, vector<24x1xf32>
    %cst_9 = arith.constant dense<0xFF800000> : vector<24xf32>
    %19 = vector.multi_reduction <maximumf>, %17, %cst_9 [1] : vector<24x24xf32> to vector<24xf32>
    %20 = vector.shape_cast %19 : vector<24xf32> to vector<24x1xf32>
    %21 = arith.maximumf %18, %20 : vector<24x1xf32>
    %22 = arith.subf %18, %21 : vector<24x1xf32>
    %23 = math.exp %22 : vector<24x1xf32>
    %24 = vector.broadcast %21 : vector<24x1xf32> to vector<24x24xf32>
    %25 = arith.subf %17, %24 : vector<24x24xf32>
    %26 = math.exp %25 : vector<24x24xf32>
    %cst_10 = arith.constant 0.000000e+00 : f32
    %27 = vector.broadcast %cst_10 : f32 to vector<24x24xf32>
    %28 = arith.select %15, %26, %27 : vector<24x24xi1>, vector<24x24xf32>
    %c0_11 = arith.constant 0 : index
    %c0_12 = arith.constant 0 : index
    %29 = vector.load %arg10[%c0_11, %c0_12] : memref<24x1xf32, #tpu.memory_space<vmem>>, vector<24x1xf32>
    %30 = arith.mulf %23, %29 : vector<24x1xf32>
    %cst_13 = arith.constant dense<0.000000e+00> : vector<24xf32>
    %31 = vector.multi_reduction <add>, %28, %cst_13 [1] : vector<24x24xf32> to vector<24xf32>
    %32 = vector.shape_cast %31 : vector<24xf32> to vector<24x1xf32>
    %33 = arith.addf %30, %32 : vector<24x1xf32>
    %c0_14 = arith.constant 0 : index
    %c0_15 = arith.constant 0 : index
    %34 = vector.load %arg10[%c0_14, %c0_15] : memref<24x1xf32, #tpu.memory_space<vmem>>, vector<24x1xf32>
    tpu.vector_store %arg10[%c0_14, %c0_15], %33 {strides = array<i32>} : memref<24x1xf32, #tpu.memory_space<vmem>>, vector<24x1xf32>,
    %c0_16 = arith.constant 0 : index
    %c0_17 = arith.constant 0 : index
    %35 = vector.load %arg11[%c0_16, %c0_17] : memref<24x128xf32, #tpu.memory_space<vmem>>, vector<24x128xf32>
    %36 = vector.broadcast %23 : vector<24x1xf32> to vector<24x128xf32>
    %37 = arith.mulf %36, %35 : vector<24x128xf32>
    %38 = arith.truncf %28 : vector<24x24xf32> to vector<24x24xbf16>
    %c0_18 = arith.constant 0 : index
    %c0_19 = arith.constant 0 : index
    %c0_20 = arith.constant 0 : index
    %39 = vector.load %arg7[%c0_18, %c0_19, %c0_20] : memref<1x24x128xbf16, #tpu.memory_space<vmem>>, vector<1x24x128xbf16>
    %40 = vector.shape_cast %39 : vector<1x24x128xbf16> to vector<24x128xbf16>
    %cst_21 = arith.constant dense<0.000000e+00> : vector<24x128xf32>
    %41 = tpu.matmul %38, %40, %cst_21 {dimension_numbers = #tpu.dot_dimension_numbers<[1], [0], [0], [1], [0, 0, 1, 1], [], []>} : vector<24x24xbf16>, vector<24x128xbf16>, vector<24x128xf32> -> vector<24x128xf32>
    %42 = arith.addf %37, %41 : vector<24x128xf32>
    %c0_22 = arith.constant 0 : index
    %c0_23 = arith.constant 0 : index
    %43 = vector.load %arg11[%c0_22, %c0_23] : memref<24x128xf32, #tpu.memory_space<vmem>>, vector<24x128xf32>
    tpu.vector_store %arg11[%c0_22, %c0_23], %42 {strides = array<i32>} : memref<24x128xf32, #tpu.memory_space<vmem>>, vector<24x128xf32>,
    %c0_24 = arith.constant 0 : index
    %c0_25 = arith.constant 0 : index
    %44 = vector.load %arg9[%c0_24, %c0_25] : memref<24x1xf32, #tpu.memory_space<vmem>>, vector<24x1xf32>
    tpu.vector_store %arg9[%c0_24, %c0_25], %21 {strides = array<i32>} : memref<24x1xf32, #tpu.memory_space<vmem>>, vector<24x1xf32>,
    %c0_i32_26 = arith.constant 0 : i32
    %45 = arith.cmpi eq, %arg3, %c0_i32_26 : i32
    %46 = arith.extui %45 : i1 to i32
    %c0_i32_27 = arith.constant 0 : i32
    %47 = arith.cmpi ne, %46, %c0_i32_27 : i32
    scf.if %47 {
      %c0_28 = arith.constant 0 : index
      %c0_29 = arith.constant 0 : index
      %48 = vector.load %arg10[%c0_28, %c0_29] : memref<24x1xf32, #tpu.memory_space<vmem>>, vector<24x1xf32>
      %cst_30 = arith.constant 0.000000e+00 : f32
      %49 = vector.broadcast %cst_30 : f32 to vector<24x1xf32>
      %50 = arith.cmpf oeq, %48, %49 : vector<24x1xf32>
      %cst_31 = arith.constant 1.000000e+00 : f32
      %51 = vector.broadcast %cst_31 : f32 to vector<24x1xf32>
      %52 = arith.select %50, %51, %48 : vector<24x1xi1>, vector<24x1xf32>
      %c0_32 = arith.constant 0 : index
      %c0_33 = arith.constant 0 : index
      %53 = vector.load %arg11[%c0_32, %c0_33] : memref<24x128xf32, #tpu.memory_space<vmem>>, vector<24x128xf32>
      %54 = tpu.reciprocal %52 {approx = true} : vector<24x1xf32> -> vector<24x1xf32>
      %55 = vector.broadcast %54 : vector<24x1xf32> to vector<24x128xf32>
      %56 = arith.mulf %53, %55 : vector<24x128xf32>
      %57 = arith.truncf %56 : vector<24x128xf32> to vector<24x128xbf16>
      %c0_34 = arith.constant 0 : index
      %c0_35 = arith.constant 0 : index
      %c0_36 = arith.constant 0 : index
      %58 = vector.load %arg8[%c0_34, %c0_35, %c0_36] : memref<1x24x128xbf16, #tpu.memory_space<vmem>>, vector<1x24x128xbf16>
      %59 = vector.shape_cast %58 : vector<1x24x128xbf16> to vector<24x128xbf16>
      %60 = vector.shape_cast %57 : vector<24x128xbf16> to vector<1x24x128xbf16>
      tpu.vector_store %arg8[%c0_34, %c0_35, %c0_36], %60 {strides = array<i32>} : memref<1x24x128xbf16, #tpu.memory_space<vmem>>, vector<1x24x128xbf16>,
    } else {
    }
    return
  }
  func.func @transform_0(%arg0: i32, %arg1: i32, %arg2: i32, %arg3: i32, %arg4: memref<2xi32, #tpu.memory_space<smem>>) -> (i32, i32, i32) {
    %c0_i32 = arith.constant 0 : i32
    return %arg0, %arg2, %arg1 : i32, i32, i32
  }
  func.func @transform_1(%arg0: i32, %arg1: i32, %arg2: i32, %arg3: i32, %arg4: memref<2xi32, #tpu.memory_space<smem>>) -> (i32, i32, i32) {
    %c0_i32 = arith.constant 0 : i32
    return %arg0, %arg3, %arg1 : i32, i32, i32
  }
  func.func @transform_2(%arg0: i32, %arg1: i32, %arg2: i32, %arg3: i32, %arg4: memref<2xi32, #tpu.memory_space<smem>>) -> (i32, i32, i32) {
    %c0_i32 = arith.constant 0 : i32
    return %arg0, %arg3, %arg1 : i32, i32, i32
  }
  func.func @transform_3(%arg0: i32, %arg1: i32, %arg2: i32, %arg3: i32, %arg4: memref<2xi32, #tpu.memory_space<smem>>) -> (i32, i32, i32) {
    %c0_i32 = arith.constant 0 : i32
    return %arg0, %arg2, %arg1 : i32, i32, i32
  }
}

module attributes {stable_mosaic.version = 11 : i64} {
  func.func @_linear_kernel(%arg0: i32, %arg1: i32, %arg2: i32, %arg3: i32, %arg4: memref<1x24x256xbf16, #tpu.memory_space<vmem>>, %arg5: memref<256x256xbf16, #tpu.memory_space<vmem>>, %arg6: memref<1x256xf32, #tpu.memory_space<vmem>>, %arg7: memref<1x24x256xf32, #tpu.memory_space<vmem>>, %arg8: memref<1x1x256xf32, #tpu.memory_space<vmem>>, %arg9: memref<1x24x256xf32, #tpu.memory_space<vmem>>, %arg10: memref<24x256xf32, #tpu.memory_space<vmem>>) attributes {dimension_semantics = [#tpu.dimension_semantics<parallel>, #tpu.dimension_semantics<parallel>, #tpu.dimension_semantics<parallel>, #tpu.dimension_semantics<arbitrary>], iteration_bounds = array<i64: 2, 1, 1, 1>, scalar_prefetch = 0 : i64, scratch_operands = 1 : i64, tpu.core_type = #tpu.core_type<tc>, window_params = [{transform_indices = @transform_0, window_bounds = array<i64: 1, 24, 256>}, {transform_indices = @transform_1, window_bounds = array<i64: 256, 256>}, {transform_indices = @transform_2, window_bounds = array<i64: 1, 256>}, {transform_indices = @transform_3, window_bounds = array<i64: 1, 24, 256>}, {transform_indices = @transform_4, window_bounds = array<i64: 1, 1, 256>}, {transform_indices = @transform_5, window_bounds = array<i64: 1, 24, 256>}]} {
    %c0_i32 = arith.constant 0 : i32
    %0 = arith.cmpi eq, %arg3, %c0_i32 : i32
    %1 = arith.extui %0 : i1 to i32
    %c0_i32_0 = arith.constant 0 : i32
    %2 = arith.cmpi ne, %1, %c0_i32_0 : i32
    scf.if %2 {
      %cst_11 = arith.constant 0.000000e+00 : f32
      %13 = vector.broadcast %cst_11 : f32 to vector<24x256xf32>
      %c0_12 = arith.constant 0 : index
      %c0_13 = arith.constant 0 : index
      %14 = vector.load %arg10[%c0_12, %c0_13] : memref<24x256xf32, #tpu.memory_space<vmem>>, vector<24x256xf32>
      tpu.vector_store %arg10[%c0_12, %c0_13], %13 {strides = array<i32>} : memref<24x256xf32, #tpu.memory_space<vmem>>, vector<24x256xf32>,
    } else {
    }
    %c0 = arith.constant 0 : index
    %c0_1 = arith.constant 0 : index
    %3 = vector.load %arg10[%c0, %c0_1] : memref<24x256xf32, #tpu.memory_space<vmem>>, vector<24x256xf32>
    %c0_2 = arith.constant 0 : index
    %c0_3 = arith.constant 0 : index
    %c0_4 = arith.constant 0 : index
    %4 = vector.load %arg4[%c0_2, %c0_3, %c0_4] : memref<1x24x256xbf16, #tpu.memory_space<vmem>>, vector<1x24x256xbf16>
    %5 = vector.shape_cast %4 : vector<1x24x256xbf16> to vector<24x256xbf16>
    %c0_5 = arith.constant 0 : index
    %c0_6 = arith.constant 0 : index
    %6 = vector.load %arg5[%c0_5, %c0_6] : memref<256x256xbf16, #tpu.memory_space<vmem>>, vector<256x256xbf16>
    %cst = arith.constant dense<0.000000e+00> : vector<24x256xf32>
    %7 = tpu.matmul %5, %6, %cst {dimension_numbers = #tpu.dot_dimension_numbers<[1], [0], [0], [1], [0, 0, 1, 1], [], []>} : vector<24x256xbf16>, vector<256x256xbf16>, vector<24x256xf32> -> vector<24x256xf32>
    %8 = arith.addf %3, %7 : vector<24x256xf32>
    %c0_7 = arith.constant 0 : index
    %c0_8 = arith.constant 0 : index
    %9 = vector.load %arg10[%c0_7, %c0_8] : memref<24x256xf32, #tpu.memory_space<vmem>>, vector<24x256xf32>
    tpu.vector_store %arg10[%c0_7, %c0_8], %8 {strides = array<i32>} : memref<24x256xf32, #tpu.memory_space<vmem>>, vector<24x256xf32>,
    %c0_i32_9 = arith.constant 0 : i32
    %10 = arith.cmpi eq, %arg3, %c0_i32_9 : i32
    %11 = arith.extui %10 : i1 to i32
    %c0_i32_10 = arith.constant 0 : i32
    %12 = arith.cmpi ne, %11, %c0_i32_10 : i32
    scf.if %12 {
      %c0_11 = arith.constant 0 : index
      %c0_12 = arith.constant 0 : index
      %13 = vector.load %arg10[%c0_11, %c0_12] : memref<24x256xf32, #tpu.memory_space<vmem>>, vector<24x256xf32>
      %c0_13 = arith.constant 0 : index
      %c0_14 = arith.constant 0 : index
      %14 = vector.load %arg6[%c0_13, %c0_14] : memref<1x256xf32, #tpu.memory_space<vmem>>, vector<1x256xf32>
      %15 = vector.broadcast %14 : vector<1x256xf32> to vector<24x256xf32>
      %16 = arith.addf %13, %15 : vector<24x256xf32>
      %c0_15 = arith.constant 0 : index
      %c0_16 = arith.constant 0 : index
      %c0_17 = arith.constant 0 : index
      %17 = vector.load %arg7[%c0_15, %c0_16, %c0_17] : memref<1x24x256xf32, #tpu.memory_space<vmem>>, vector<1x24x256xf32>
      %18 = vector.shape_cast %17 : vector<1x24x256xf32> to vector<24x256xf32>
      %c0_18 = arith.constant 0 : index
      %c0_19 = arith.constant 0 : index
      %c0_20 = arith.constant 0 : index
      %19 = vector.load %arg8[%c0_18, %c0_19, %c0_20] : memref<1x1x256xf32, #tpu.memory_space<vmem>>, vector<1x1x256xf32>
      %20 = vector.shape_cast %19 : vector<1x1x256xf32> to vector<1x256xf32>
      %21 = vector.broadcast %20 : vector<1x256xf32> to vector<24x256xf32>
      %22 = arith.mulf %16, %21 : vector<24x256xf32>
      %23 = arith.addf %18, %22 : vector<24x256xf32>
      %c0_21 = arith.constant 0 : index
      %c0_22 = arith.constant 0 : index
      %c0_23 = arith.constant 0 : index
      %24 = vector.load %arg9[%c0_21, %c0_22, %c0_23] : memref<1x24x256xf32, #tpu.memory_space<vmem>>, vector<1x24x256xf32>
      %25 = vector.shape_cast %24 : vector<1x24x256xf32> to vector<24x256xf32>
      %26 = vector.shape_cast %23 : vector<24x256xf32> to vector<1x24x256xf32>
      tpu.vector_store %arg9[%c0_21, %c0_22, %c0_23], %26 {strides = array<i32>} : memref<1x24x256xf32, #tpu.memory_space<vmem>>, vector<1x24x256xf32>,
    } else {
    }
    return
  }
  func.func @transform_0(%arg0: i32, %arg1: i32, %arg2: i32, %arg3: i32) -> (i32, i32, i32) {
    %c0_i32 = arith.constant 0 : i32
    return %arg0, %arg1, %arg3 : i32, i32, i32
  }
  func.func @transform_1(%arg0: i32, %arg1: i32, %arg2: i32, %arg3: i32) -> (i32, i32) {
    %c0_i32 = arith.constant 0 : i32
    return %arg3, %arg2 : i32, i32
  }
  func.func @transform_2(%arg0: i32, %arg1: i32, %arg2: i32, %arg3: i32) -> (i32, i32) {
    %c0_i32 = arith.constant 0 : i32
    %c0_i32_0 = arith.constant 0 : i32
    return %c0_i32, %arg2 : i32, i32
  }
  func.func @transform_3(%arg0: i32, %arg1: i32, %arg2: i32, %arg3: i32) -> (i32, i32, i32) {
    %c0_i32 = arith.constant 0 : i32
    return %arg0, %arg1, %arg2 : i32, i32, i32
  }
  func.func @transform_4(%arg0: i32, %arg1: i32, %arg2: i32, %arg3: i32) -> (i32, i32, i32) {
    %c0_i32 = arith.constant 0 : i32
    %c0_i32_0 = arith.constant 0 : i32
    return %arg0, %c0_i32, %arg2 : i32, i32, i32
  }
  func.func @transform_5(%arg0: i32, %arg1: i32, %arg2: i32, %arg3: i32) -> (i32, i32, i32) {
    %c0_i32 = arith.constant 0 : i32
    return %arg0, %arg1, %arg2 : i32, i32, i32
  }
}

module attributes {stable_mosaic.version = 11 : i64} {
  func.func @_proj_kernel(%arg0: i32, %arg1: i32, %arg2: i32, %arg3: memref<1x24x256xbf16, #tpu.memory_space<vmem>>, %arg4: memref<256x256xbf16, #tpu.memory_space<vmem>>, %arg5: memref<1x256xf32, #tpu.memory_space<vmem>>, %arg6: memref<1x256xf32, #tpu.memory_space<vmem>>, %arg7: memref<1x24x256xbf16, #tpu.memory_space<vmem>>, %arg8: memref<24x256xf32, #tpu.memory_space<vmem>>) attributes {dimension_semantics = [#tpu.dimension_semantics<parallel>, #tpu.dimension_semantics<parallel>, #tpu.dimension_semantics<arbitrary>], iteration_bounds = array<i64: 2, 1, 1>, scalar_prefetch = 0 : i64, scratch_operands = 1 : i64, tpu.core_type = #tpu.core_type<tc>, window_params = [{transform_indices = @transform_0, window_bounds = array<i64: 1, 24, 256>}, {transform_indices = @transform_1, window_bounds = array<i64: 256, 256>}, {pipeline_mode = #tpu.pipeline_mode<synchronous>, transform_indices = @transform_2, window_bounds = array<i64: 1, 256>}, {pipeline_mode = #tpu.pipeline_mode<synchronous>, transform_indices = @transform_3, window_bounds = array<i64: 1, 256>}, {transform_indices = @transform_4, window_bounds = array<i64: 1, 24, 256>}]} {
    %c0_i32 = arith.constant 0 : i32
    %0 = arith.cmpi eq, %arg2, %c0_i32 : i32
    %1 = arith.extui %0 : i1 to i32
    %c0_i32_0 = arith.constant 0 : i32
    %2 = arith.cmpi ne, %1, %c0_i32_0 : i32
    scf.if %2 {
      %cst_11 = arith.constant 0.000000e+00 : f32
      %13 = vector.broadcast %cst_11 : f32 to vector<24x256xf32>
      %c0_12 = arith.constant 0 : index
      %c0_13 = arith.constant 0 : index
      %14 = vector.load %arg8[%c0_12, %c0_13] : memref<24x256xf32, #tpu.memory_space<vmem>>, vector<24x256xf32>
      tpu.vector_store %arg8[%c0_12, %c0_13], %13 {strides = array<i32>} : memref<24x256xf32, #tpu.memory_space<vmem>>, vector<24x256xf32>,
    } else {
    }
    %c0 = arith.constant 0 : index
    %c0_1 = arith.constant 0 : index
    %3 = vector.load %arg8[%c0, %c0_1] : memref<24x256xf32, #tpu.memory_space<vmem>>, vector<24x256xf32>
    %c0_2 = arith.constant 0 : index
    %c0_3 = arith.constant 0 : index
    %c0_4 = arith.constant 0 : index
    %4 = vector.load %arg3[%c0_2, %c0_3, %c0_4] : memref<1x24x256xbf16, #tpu.memory_space<vmem>>, vector<1x24x256xbf16>
    %5 = vector.shape_cast %4 : vector<1x24x256xbf16> to vector<24x256xbf16>
    %c0_5 = arith.constant 0 : index
    %c0_6 = arith.constant 0 : index
    %6 = vector.load %arg4[%c0_5, %c0_6] : memref<256x256xbf16, #tpu.memory_space<vmem>>, vector<256x256xbf16>
    %cst = arith.constant dense<0.000000e+00> : vector<24x256xf32>
    %7 = tpu.matmul %5, %6, %cst {dimension_numbers = #tpu.dot_dimension_numbers<[1], [0], [0], [1], [0, 0, 1, 1], [], []>} : vector<24x256xbf16>, vector<256x256xbf16>, vector<24x256xf32> -> vector<24x256xf32>
    %8 = arith.addf %3, %7 : vector<24x256xf32>
    %c0_7 = arith.constant 0 : index
    %c0_8 = arith.constant 0 : index
    %9 = vector.load %arg8[%c0_7, %c0_8] : memref<24x256xf32, #tpu.memory_space<vmem>>, vector<24x256xf32>
    tpu.vector_store %arg8[%c0_7, %c0_8], %8 {strides = array<i32>} : memref<24x256xf32, #tpu.memory_space<vmem>>, vector<24x256xf32>,
    %c0_i32_9 = arith.constant 0 : i32
    %10 = arith.cmpi eq, %arg2, %c0_i32_9 : i32
    %11 = arith.extui %10 : i1 to i32
    %c0_i32_10 = arith.constant 0 : i32
    %12 = arith.cmpi ne, %11, %c0_i32_10 : i32
    scf.if %12 {
      %c0_11 = arith.constant 0 : index
      %c0_12 = arith.constant 0 : index
      %13 = vector.load %arg8[%c0_11, %c0_12] : memref<24x256xf32, #tpu.memory_space<vmem>>, vector<24x256xf32>
      %c0_13 = arith.constant 0 : index
      %c0_14 = arith.constant 0 : index
      %14 = vector.load %arg5[%c0_13, %c0_14] : memref<1x256xf32, #tpu.memory_space<vmem>>, vector<1x256xf32>
      %15 = vector.broadcast %14 : vector<1x256xf32> to vector<24x256xf32>
      %16 = arith.addf %13, %15 : vector<24x256xf32>
      %17 = arith.mulf %16, %16 : vector<24x256xf32>
      %cst_15 = arith.constant dense<0.000000e+00> : vector<24xf32>
      %18 = vector.multi_reduction <add>, %17, %cst_15 [1] : vector<24x256xf32> to vector<24xf32>
      %19 = vector.shape_cast %18 : vector<24xf32> to vector<24x1xf32>
      %cst_16 = arith.constant 2.560000e+02 : f32
      %20 = vector.broadcast %cst_16 : f32 to vector<24x1xf32>
      %21 = arith.divf %19, %20 : vector<24x1xf32>
      %cst_17 = arith.constant 9.99999997E-7 : f32
      %22 = vector.broadcast %cst_17 : f32 to vector<24x1xf32>
      %23 = arith.addf %21, %22 : vector<24x1xf32>
      %24 = math.rsqrt %23 : vector<24x1xf32>
      %25 = vector.broadcast %24 : vector<24x1xf32> to vector<24x256xf32>
      %26 = arith.mulf %16, %25 : vector<24x256xf32>
      %c0_18 = arith.constant 0 : index
      %c0_19 = arith.constant 0 : index
      %27 = vector.load %arg6[%c0_18, %c0_19] : memref<1x256xf32, #tpu.memory_space<vmem>>, vector<1x256xf32>
      %28 = vector.broadcast %27 : vector<1x256xf32> to vector<24x256xf32>
      %29 = arith.mulf %26, %28 : vector<24x256xf32>
      %30 = arith.truncf %29 : vector<24x256xf32> to vector<24x256xbf16>
      %c0_20 = arith.constant 0 : index
      %c0_21 = arith.constant 0 : index
      %c0_22 = arith.constant 0 : index
      %31 = vector.load %arg7[%c0_20, %c0_21, %c0_22] : memref<1x24x256xbf16, #tpu.memory_space<vmem>>, vector<1x24x256xbf16>
      %32 = vector.shape_cast %31 : vector<1x24x256xbf16> to vector<24x256xbf16>
      %33 = vector.shape_cast %30 : vector<24x256xbf16> to vector<1x24x256xbf16>
      tpu.vector_store %arg7[%c0_20, %c0_21, %c0_22], %33 {strides = array<i32>} : memref<1x24x256xbf16, #tpu.memory_space<vmem>>, vector<1x24x256xbf16>,
    } else {
    }
    return
  }
  func.func @transform_0(%arg0: i32, %arg1: i32, %arg2: i32) -> (i32, i32, i32) {
    %c0_i32 = arith.constant 0 : i32
    return %arg0, %arg1, %arg2 : i32, i32, i32
  }
  func.func @transform_1(%arg0: i32, %arg1: i32, %arg2: i32) -> (i32, i32) {
    %c0_i32 = arith.constant 0 : i32
    %c0_i32_0 = arith.constant 0 : i32
    return %arg2, %c0_i32 : i32, i32
  }
  func.func @transform_2(%arg0: i32, %arg1: i32, %arg2: i32) -> (i32, i32) {
    %c0_i32 = arith.constant 0 : i32
    %c0_i32_0 = arith.constant 0 : i32
    %c0_i32_1 = arith.constant 0 : i32
    return %c0_i32, %c0_i32_0 : i32, i32
  }
  func.func @transform_3(%arg0: i32, %arg1: i32, %arg2: i32) -> (i32, i32) {
    %c0_i32 = arith.constant 0 : i32
    %c0_i32_0 = arith.constant 0 : i32
    %c0_i32_1 = arith.constant 0 : i32
    return %c0_i32, %c0_i32_0 : i32, i32
  }
  func.func @transform_4(%arg0: i32, %arg1: i32, %arg2: i32) -> (i32, i32, i32) {
    %c0_i32 = arith.constant 0 : i32
    %c0_i32_0 = arith.constant 0 : i32
    return %arg0, %arg1, %c0_i32 : i32, i32, i32
  }
}

module attributes {stable_mosaic.version = 11 : i64} {
  func.func @_proj_kernel(%arg0: i32, %arg1: i32, %arg2: i32, %arg3: memref<1x16x256xbf16, #tpu.memory_space<vmem>>, %arg4: memref<256x256xbf16, #tpu.memory_space<vmem>>, %arg5: memref<1x256xf32, #tpu.memory_space<vmem>>, %arg6: memref<1x16x256xbf16, #tpu.memory_space<vmem>>, %arg7: memref<16x256xf32, #tpu.memory_space<vmem>>) attributes {dimension_semantics = [#tpu.dimension_semantics<parallel>, #tpu.dimension_semantics<parallel>, #tpu.dimension_semantics<arbitrary>], iteration_bounds = array<i64: 2, 1, 1>, scalar_prefetch = 0 : i64, scratch_operands = 1 : i64, tpu.core_type = #tpu.core_type<tc>, window_params = [{transform_indices = @transform_0, window_bounds = array<i64: 1, 16, 256>}, {transform_indices = @transform_1, window_bounds = array<i64: 256, 256>}, {pipeline_mode = #tpu.pipeline_mode<synchronous>, transform_indices = @transform_2, window_bounds = array<i64: 1, 256>}, {transform_indices = @transform_3, window_bounds = array<i64: 1, 16, 256>}]} {
    %c0_i32 = arith.constant 0 : i32
    %0 = arith.cmpi eq, %arg2, %c0_i32 : i32
    %1 = arith.extui %0 : i1 to i32
    %c0_i32_0 = arith.constant 0 : i32
    %2 = arith.cmpi ne, %1, %c0_i32_0 : i32
    scf.if %2 {
      %cst_11 = arith.constant 0.000000e+00 : f32
      %13 = vector.broadcast %cst_11 : f32 to vector<16x256xf32>
      %c0_12 = arith.constant 0 : index
      %c0_13 = arith.constant 0 : index
      %14 = vector.load %arg7[%c0_12, %c0_13] : memref<16x256xf32, #tpu.memory_space<vmem>>, vector<16x256xf32>
      tpu.vector_store %arg7[%c0_12, %c0_13], %13 {strides = array<i32>} : memref<16x256xf32, #tpu.memory_space<vmem>>, vector<16x256xf32>,
    } else {
    }
    %c0 = arith.constant 0 : index
    %c0_1 = arith.constant 0 : index
    %3 = vector.load %arg7[%c0, %c0_1] : memref<16x256xf32, #tpu.memory_space<vmem>>, vector<16x256xf32>
    %c0_2 = arith.constant 0 : index
    %c0_3 = arith.constant 0 : index
    %c0_4 = arith.constant 0 : index
    %4 = vector.load %arg3[%c0_2, %c0_3, %c0_4] : memref<1x16x256xbf16, #tpu.memory_space<vmem>>, vector<1x16x256xbf16>
    %5 = vector.shape_cast %4 : vector<1x16x256xbf16> to vector<16x256xbf16>
    %c0_5 = arith.constant 0 : index
    %c0_6 = arith.constant 0 : index
    %6 = vector.load %arg4[%c0_5, %c0_6] : memref<256x256xbf16, #tpu.memory_space<vmem>>, vector<256x256xbf16>
    %cst = arith.constant dense<0.000000e+00> : vector<16x256xf32>
    %7 = tpu.matmul %5, %6, %cst {dimension_numbers = #tpu.dot_dimension_numbers<[1], [0], [0], [1], [0, 0, 1, 1], [], []>} : vector<16x256xbf16>, vector<256x256xbf16>, vector<16x256xf32> -> vector<16x256xf32>
    %8 = arith.addf %3, %7 : vector<16x256xf32>
    %c0_7 = arith.constant 0 : index
    %c0_8 = arith.constant 0 : index
    %9 = vector.load %arg7[%c0_7, %c0_8] : memref<16x256xf32, #tpu.memory_space<vmem>>, vector<16x256xf32>
    tpu.vector_store %arg7[%c0_7, %c0_8], %8 {strides = array<i32>} : memref<16x256xf32, #tpu.memory_space<vmem>>, vector<16x256xf32>,
    %c0_i32_9 = arith.constant 0 : i32
    %10 = arith.cmpi eq, %arg2, %c0_i32_9 : i32
    %11 = arith.extui %10 : i1 to i32
    %c0_i32_10 = arith.constant 0 : i32
    %12 = arith.cmpi ne, %11, %c0_i32_10 : i32
    scf.if %12 {
      %c0_11 = arith.constant 0 : index
      %c0_12 = arith.constant 0 : index
      %13 = vector.load %arg7[%c0_11, %c0_12] : memref<16x256xf32, #tpu.memory_space<vmem>>, vector<16x256xf32>
      %c0_13 = arith.constant 0 : index
      %c0_14 = arith.constant 0 : index
      %14 = vector.load %arg5[%c0_13, %c0_14] : memref<1x256xf32, #tpu.memory_space<vmem>>, vector<1x256xf32>
      %15 = vector.broadcast %14 : vector<1x256xf32> to vector<16x256xf32>
      %16 = arith.addf %13, %15 : vector<16x256xf32>
      %17 = arith.truncf %16 : vector<16x256xf32> to vector<16x256xbf16>
      %c0_15 = arith.constant 0 : index
      %c0_16 = arith.constant 0 : index
      %c0_17 = arith.constant 0 : index
      %18 = vector.load %arg6[%c0_15, %c0_16, %c0_17] : memref<1x16x256xbf16, #tpu.memory_space<vmem>>, vector<1x16x256xbf16>
      %19 = vector.shape_cast %18 : vector<1x16x256xbf16> to vector<16x256xbf16>
      %20 = vector.shape_cast %17 : vector<16x256xbf16> to vector<1x16x256xbf16>
      tpu.vector_store %arg6[%c0_15, %c0_16, %c0_17], %20 {strides = array<i32>} : memref<1x16x256xbf16, #tpu.memory_space<vmem>>, vector<1x16x256xbf16>,
    } else {
    }
    return
  }
  func.func @transform_0(%arg0: i32, %arg1: i32, %arg2: i32) -> (i32, i32, i32) {
    %c0_i32 = arith.constant 0 : i32
    return %arg0, %arg1, %arg2 : i32, i32, i32
  }
  func.func @transform_1(%arg0: i32, %arg1: i32, %arg2: i32) -> (i32, i32) {
    %c0_i32 = arith.constant 0 : i32
    %c0_i32_0 = arith.constant 0 : i32
    return %arg2, %c0_i32 : i32, i32
  }
  func.func @transform_2(%arg0: i32, %arg1: i32, %arg2: i32) -> (i32, i32) {
    %c0_i32 = arith.constant 0 : i32
    %c0_i32_0 = arith.constant 0 : i32
    %c0_i32_1 = arith.constant 0 : i32
    return %c0_i32, %c0_i32_0 : i32, i32
  }
  func.func @transform_3(%arg0: i32, %arg1: i32, %arg2: i32) -> (i32, i32, i32) {
    %c0_i32 = arith.constant 0 : i32
    %c0_i32_0 = arith.constant 0 : i32
    return %arg0, %arg1, %c0_i32 : i32, i32, i32
  }
}

module attributes {stable_mosaic.version = 11 : i64} {
  func.func @_proj_kernel(%arg0: i32, %arg1: i32, %arg2: i32, %arg3: memref<1x16x256xbf16, #tpu.memory_space<vmem>>, %arg4: memref<256x256xbf16, #tpu.memory_space<vmem>>, %arg5: memref<1x256xf32, #tpu.memory_space<vmem>>, %arg6: memref<1x256xf32, #tpu.memory_space<vmem>>, %arg7: memref<1x16x256xbf16, #tpu.memory_space<vmem>>, %arg8: memref<16x256xf32, #tpu.memory_space<vmem>>) attributes {dimension_semantics = [#tpu.dimension_semantics<parallel>, #tpu.dimension_semantics<parallel>, #tpu.dimension_semantics<arbitrary>], iteration_bounds = array<i64: 2, 1, 1>, scalar_prefetch = 0 : i64, scratch_operands = 1 : i64, tpu.core_type = #tpu.core_type<tc>, window_params = [{transform_indices = @transform_0, window_bounds = array<i64: 1, 16, 256>}, {transform_indices = @transform_1, window_bounds = array<i64: 256, 256>}, {pipeline_mode = #tpu.pipeline_mode<synchronous>, transform_indices = @transform_2, window_bounds = array<i64: 1, 256>}, {pipeline_mode = #tpu.pipeline_mode<synchronous>, transform_indices = @transform_3, window_bounds = array<i64: 1, 256>}, {transform_indices = @transform_4, window_bounds = array<i64: 1, 16, 256>}]} {
    %c0_i32 = arith.constant 0 : i32
    %0 = arith.cmpi eq, %arg2, %c0_i32 : i32
    %1 = arith.extui %0 : i1 to i32
    %c0_i32_0 = arith.constant 0 : i32
    %2 = arith.cmpi ne, %1, %c0_i32_0 : i32
    scf.if %2 {
      %cst_11 = arith.constant 0.000000e+00 : f32
      %13 = vector.broadcast %cst_11 : f32 to vector<16x256xf32>
      %c0_12 = arith.constant 0 : index
      %c0_13 = arith.constant 0 : index
      %14 = vector.load %arg8[%c0_12, %c0_13] : memref<16x256xf32, #tpu.memory_space<vmem>>, vector<16x256xf32>
      tpu.vector_store %arg8[%c0_12, %c0_13], %13 {strides = array<i32>} : memref<16x256xf32, #tpu.memory_space<vmem>>, vector<16x256xf32>,
    } else {
    }
    %c0 = arith.constant 0 : index
    %c0_1 = arith.constant 0 : index
    %3 = vector.load %arg8[%c0, %c0_1] : memref<16x256xf32, #tpu.memory_space<vmem>>, vector<16x256xf32>
    %c0_2 = arith.constant 0 : index
    %c0_3 = arith.constant 0 : index
    %c0_4 = arith.constant 0 : index
    %4 = vector.load %arg3[%c0_2, %c0_3, %c0_4] : memref<1x16x256xbf16, #tpu.memory_space<vmem>>, vector<1x16x256xbf16>
    %5 = vector.shape_cast %4 : vector<1x16x256xbf16> to vector<16x256xbf16>
    %c0_5 = arith.constant 0 : index
    %c0_6 = arith.constant 0 : index
    %6 = vector.load %arg4[%c0_5, %c0_6] : memref<256x256xbf16, #tpu.memory_space<vmem>>, vector<256x256xbf16>
    %cst = arith.constant dense<0.000000e+00> : vector<16x256xf32>
    %7 = tpu.matmul %5, %6, %cst {dimension_numbers = #tpu.dot_dimension_numbers<[1], [0], [0], [1], [0, 0, 1, 1], [], []>} : vector<16x256xbf16>, vector<256x256xbf16>, vector<16x256xf32> -> vector<16x256xf32>
    %8 = arith.addf %3, %7 : vector<16x256xf32>
    %c0_7 = arith.constant 0 : index
    %c0_8 = arith.constant 0 : index
    %9 = vector.load %arg8[%c0_7, %c0_8] : memref<16x256xf32, #tpu.memory_space<vmem>>, vector<16x256xf32>
    tpu.vector_store %arg8[%c0_7, %c0_8], %8 {strides = array<i32>} : memref<16x256xf32, #tpu.memory_space<vmem>>, vector<16x256xf32>,
    %c0_i32_9 = arith.constant 0 : i32
    %10 = arith.cmpi eq, %arg2, %c0_i32_9 : i32
    %11 = arith.extui %10 : i1 to i32
    %c0_i32_10 = arith.constant 0 : i32
    %12 = arith.cmpi ne, %11, %c0_i32_10 : i32
    scf.if %12 {
      %c0_11 = arith.constant 0 : index
      %c0_12 = arith.constant 0 : index
      %13 = vector.load %arg8[%c0_11, %c0_12] : memref<16x256xf32, #tpu.memory_space<vmem>>, vector<16x256xf32>
      %c0_13 = arith.constant 0 : index
      %c0_14 = arith.constant 0 : index
      %14 = vector.load %arg5[%c0_13, %c0_14] : memref<1x256xf32, #tpu.memory_space<vmem>>, vector<1x256xf32>
      %15 = vector.broadcast %14 : vector<1x256xf32> to vector<16x256xf32>
      %16 = arith.addf %13, %15 : vector<16x256xf32>
      %17 = arith.mulf %16, %16 : vector<16x256xf32>
      %cst_15 = arith.constant dense<0.000000e+00> : vector<16xf32>
      %18 = vector.multi_reduction <add>, %17, %cst_15 [1] : vector<16x256xf32> to vector<16xf32>
      %19 = vector.shape_cast %18 : vector<16xf32> to vector<16x1xf32>
      %cst_16 = arith.constant 2.560000e+02 : f32
      %20 = vector.broadcast %cst_16 : f32 to vector<16x1xf32>
      %21 = arith.divf %19, %20 : vector<16x1xf32>
      %cst_17 = arith.constant 9.99999997E-7 : f32
      %22 = vector.broadcast %cst_17 : f32 to vector<16x1xf32>
      %23 = arith.addf %21, %22 : vector<16x1xf32>
      %24 = math.rsqrt %23 : vector<16x1xf32>
      %25 = vector.broadcast %24 : vector<16x1xf32> to vector<16x256xf32>
      %26 = arith.mulf %16, %25 : vector<16x256xf32>
      %c0_18 = arith.constant 0 : index
      %c0_19 = arith.constant 0 : index
      %27 = vector.load %arg6[%c0_18, %c0_19] : memref<1x256xf32, #tpu.memory_space<vmem>>, vector<1x256xf32>
      %28 = vector.broadcast %27 : vector<1x256xf32> to vector<16x256xf32>
      %29 = arith.mulf %26, %28 : vector<16x256xf32>
      %30 = arith.truncf %29 : vector<16x256xf32> to vector<16x256xbf16>
      %c0_20 = arith.constant 0 : index
      %c0_21 = arith.constant 0 : index
      %c0_22 = arith.constant 0 : index
      %31 = vector.load %arg7[%c0_20, %c0_21, %c0_22] : memref<1x16x256xbf16, #tpu.memory_space<vmem>>, vector<1x16x256xbf16>
      %32 = vector.shape_cast %31 : vector<1x16x256xbf16> to vector<16x256xbf16>
      %33 = vector.shape_cast %30 : vector<16x256xbf16> to vector<1x16x256xbf16>
      tpu.vector_store %arg7[%c0_20, %c0_21, %c0_22], %33 {strides = array<i32>} : memref<1x16x256xbf16, #tpu.memory_space<vmem>>, vector<1x16x256xbf16>,
    } else {
    }
    return
  }
  func.func @transform_0(%arg0: i32, %arg1: i32, %arg2: i32) -> (i32, i32, i32) {
    %c0_i32 = arith.constant 0 : i32
    return %arg0, %arg1, %arg2 : i32, i32, i32
  }
  func.func @transform_1(%arg0: i32, %arg1: i32, %arg2: i32) -> (i32, i32) {
    %c0_i32 = arith.constant 0 : i32
    %c0_i32_0 = arith.constant 0 : i32
    return %arg2, %c0_i32 : i32, i32
  }
  func.func @transform_2(%arg0: i32, %arg1: i32, %arg2: i32) -> (i32, i32) {
    %c0_i32 = arith.constant 0 : i32
    %c0_i32_0 = arith.constant 0 : i32
    %c0_i32_1 = arith.constant 0 : i32
    return %c0_i32, %c0_i32_0 : i32, i32
  }
  func.func @transform_3(%arg0: i32, %arg1: i32, %arg2: i32) -> (i32, i32) {
    %c0_i32 = arith.constant 0 : i32
    %c0_i32_0 = arith.constant 0 : i32
    %c0_i32_1 = arith.constant 0 : i32
    return %c0_i32, %c0_i32_0 : i32, i32
  }
  func.func @transform_4(%arg0: i32, %arg1: i32, %arg2: i32) -> (i32, i32, i32) {
    %c0_i32 = arith.constant 0 : i32
    %c0_i32_0 = arith.constant 0 : i32
    return %arg0, %arg1, %c0_i32 : i32, i32, i32
  }
}

module attributes {stable_mosaic.version = 11 : i64} {
  func.func @_flash_kernel(%arg0: i32, %arg1: i32, %arg2: i32, %arg3: i32, %arg4: memref<2xi32, #tpu.memory_space<smem>>, %arg5: memref<1x24x128xbf16, #tpu.memory_space<vmem>>, %arg6: memref<1x16x128xbf16, #tpu.memory_space<vmem>>, %arg7: memref<1x16x128xbf16, #tpu.memory_space<vmem>>, %arg8: memref<1x24x128xbf16, #tpu.memory_space<vmem>>, %arg9: memref<24x1xf32, #tpu.memory_space<vmem>>, %arg10: memref<24x1xf32, #tpu.memory_space<vmem>>, %arg11: memref<24x128xf32, #tpu.memory_space<vmem>>) attributes {dimension_semantics = [#tpu.dimension_semantics<parallel>, #tpu.dimension_semantics<parallel>, #tpu.dimension_semantics<parallel>, #tpu.dimension_semantics<arbitrary>], iteration_bounds = array<i64: 2, 2, 1, 1>, scalar_prefetch = 1 : i64, scratch_operands = 3 : i64, tpu.core_type = #tpu.core_type<tc>, window_params = [{transform_indices = @transform_0, window_bounds = array<i64: 1, 24, 128>}, {transform_indices = @transform_1, window_bounds = array<i64: 1, 16, 128>}, {transform_indices = @transform_2, window_bounds = array<i64: 1, 16, 128>}, {transform_indices = @transform_3, window_bounds = array<i64: 1, 24, 128>}]} {
    %c0_i32 = arith.constant 0 : i32
    %0 = arith.cmpi eq, %arg3, %c0_i32 : i32
    %1 = arith.extui %0 : i1 to i32
    %c0_i32_0 = arith.constant 0 : i32
    %2 = arith.cmpi ne, %1, %c0_i32_0 : i32
    scf.if %2 {
      %cst_28 = arith.constant -1.000000e+30 : f32
      %48 = vector.broadcast %cst_28 : f32 to vector<24x1xf32>
      %c0_29 = arith.constant 0 : index
      %c0_30 = arith.constant 0 : index
      %49 = vector.load %arg9[%c0_29, %c0_30] : memref<24x1xf32, #tpu.memory_space<vmem>>, vector<24x1xf32>
      tpu.vector_store %arg9[%c0_29, %c0_30], %48 {strides = array<i32>} : memref<24x1xf32, #tpu.memory_space<vmem>>, vector<24x1xf32>,
      %cst_31 = arith.constant 0.000000e+00 : f32
      %50 = vector.broadcast %cst_31 : f32 to vector<24x1xf32>
      %c0_32 = arith.constant 0 : index
      %c0_33 = arith.constant 0 : index
      %51 = vector.load %arg10[%c0_32, %c0_33] : memref<24x1xf32, #tpu.memory_space<vmem>>, vector<24x1xf32>
      tpu.vector_store %arg10[%c0_32, %c0_33], %50 {strides = array<i32>} : memref<24x1xf32, #tpu.memory_space<vmem>>, vector<24x1xf32>,
      %cst_34 = arith.constant 0.000000e+00 : f32
      %52 = vector.broadcast %cst_34 : f32 to vector<24x128xf32>
      %c0_35 = arith.constant 0 : index
      %c0_36 = arith.constant 0 : index
      %53 = vector.load %arg11[%c0_35, %c0_36] : memref<24x128xf32, #tpu.memory_space<vmem>>, vector<24x128xf32>
      tpu.vector_store %arg11[%c0_35, %c0_36], %52 {strides = array<i32>} : memref<24x128xf32, #tpu.memory_space<vmem>>, vector<24x128xf32>,
    } else {
    }
    %3 = arith.index_cast %arg0 : i32 to index
    %4 = memref.load %arg4[%3] : memref<2xi32, #tpu.memory_space<smem>>
    %c0 = arith.constant 0 : index
    %c0_1 = arith.constant 0 : index
    %c0_2 = arith.constant 0 : index
    %5 = vector.load %arg5[%c0, %c0_1, %c0_2] : memref<1x24x128xbf16, #tpu.memory_space<vmem>>, vector<1x24x128xbf16>
    %6 = vector.shape_cast %5 : vector<1x24x128xbf16> to vector<24x128xbf16>
    %c0_3 = arith.constant 0 : index
    %c0_4 = arith.constant 0 : index
    %c0_5 = arith.constant 0 : index
    %7 = vector.load %arg6[%c0_3, %c0_4, %c0_5] : memref<1x16x128xbf16, #tpu.memory_space<vmem>>, vector<1x16x128xbf16>
    %8 = vector.shape_cast %7 : vector<1x16x128xbf16> to vector<16x128xbf16>
    %cst = arith.constant dense<0.000000e+00> : vector<24x16xf32>
    %9 = tpu.matmul %6, %8, %cst {dimension_numbers = #tpu.dot_dimension_numbers<[1], [1], [0], [0], [0, 0, 1, 0], [], []>} : vector<24x128xbf16>, vector<16x128xbf16>, vector<24x16xf32> -> vector<24x16xf32>
    %c16_i32 = arith.constant 16 : i32
    %10 = arith.muli %arg3, %c16_i32 : i32
    %11 = tpu.iota {dimensions = array<i32: 1>} : vector<24x16xi32>
    %12 = vector.broadcast %10 : i32 to vector<24x16xi32>
    %13 = arith.addi %12, %11 : vector<24x16xi32>
    %14 = vector.broadcast %4 : i32 to vector<24x16xi32>
    %15 = arith.cmpi slt, %13, %14 : vector<24x16xi32>
    %cst_6 = arith.constant -1.000000e+30 : f32
    %16 = vector.broadcast %cst_6 : f32 to vector<24x16xf32>
    %17 = arith.select %15, %9, %16 : vector<24x16xi1>, vector<24x16xf32>
    %c0_7 = arith.constant 0 : index
    %c0_8 = arith.constant 0 : index
    %18 = vector.load %arg9[%c0_7, %c0_8] : memref<24x1xf32, #tpu.memory_space<vmem>>, vector<24x1xf32>
    %cst_9 = arith.constant dense<0xFF800000> : vector<24xf32>
    %19 = vector.multi_reduction <maximumf>, %17, %cst_9 [1] : vector<24x16xf32> to vector<24xf32>
    %20 = vector.shape_cast %19 : vector<24xf32> to vector<24x1xf32>
    %21 = arith.maximumf %18, %20 : vector<24x1xf32>
    %22 = arith.subf %18, %21 : vector<24x1xf32>
    %23 = math.exp %22 : vector<24x1xf32>
    %24 = vector.broadcast %21 : vector<24x1xf32> to vector<24x16xf32>
    %25 = arith.subf %17, %24 : vector<24x16xf32>
    %26 = math.exp %25 : vector<24x16xf32>
    %cst_10 = arith.constant 0.000000e+00 : f32
    %27 = vector.broadcast %cst_10 : f32 to vector<24x16xf32>
    %28 = arith.select %15, %26, %27 : vector<24x16xi1>, vector<24x16xf32>
    %c0_11 = arith.constant 0 : index
    %c0_12 = arith.constant 0 : index
    %29 = vector.load %arg10[%c0_11, %c0_12] : memref<24x1xf32, #tpu.memory_space<vmem>>, vector<24x1xf32>
    %30 = arith.mulf %23, %29 : vector<24x1xf32>
    %cst_13 = arith.constant dense<0.000000e+00> : vector<24xf32>
    %31 = vector.multi_reduction <add>, %28, %cst_13 [1] : vector<24x16xf32> to vector<24xf32>
    %32 = vector.shape_cast %31 : vector<24xf32> to vector<24x1xf32>
    %33 = arith.addf %30, %32 : vector<24x1xf32>
    %c0_14 = arith.constant 0 : index
    %c0_15 = arith.constant 0 : index
    %34 = vector.load %arg10[%c0_14, %c0_15] : memref<24x1xf32, #tpu.memory_space<vmem>>, vector<24x1xf32>
    tpu.vector_store %arg10[%c0_14, %c0_15], %33 {strides = array<i32>} : memref<24x1xf32, #tpu.memory_space<vmem>>, vector<24x1xf32>,
    %c0_16 = arith.constant 0 : index
    %c0_17 = arith.constant 0 : index
    %35 = vector.load %arg11[%c0_16, %c0_17] : memref<24x128xf32, #tpu.memory_space<vmem>>, vector<24x128xf32>
    %36 = vector.broadcast %23 : vector<24x1xf32> to vector<24x128xf32>
    %37 = arith.mulf %36, %35 : vector<24x128xf32>
    %38 = arith.truncf %28 : vector<24x16xf32> to vector<24x16xbf16>
    %c0_18 = arith.constant 0 : index
    %c0_19 = arith.constant 0 : index
    %c0_20 = arith.constant 0 : index
    %39 = vector.load %arg7[%c0_18, %c0_19, %c0_20] : memref<1x16x128xbf16, #tpu.memory_space<vmem>>, vector<1x16x128xbf16>
    %40 = vector.shape_cast %39 : vector<1x16x128xbf16> to vector<16x128xbf16>
    %cst_21 = arith.constant dense<0.000000e+00> : vector<24x128xf32>
    %41 = tpu.matmul %38, %40, %cst_21 {dimension_numbers = #tpu.dot_dimension_numbers<[1], [0], [0], [1], [0, 0, 1, 1], [], []>} : vector<24x16xbf16>, vector<16x128xbf16>, vector<24x128xf32> -> vector<24x128xf32>
    %42 = arith.addf %37, %41 : vector<24x128xf32>
    %c0_22 = arith.constant 0 : index
    %c0_23 = arith.constant 0 : index
    %43 = vector.load %arg11[%c0_22, %c0_23] : memref<24x128xf32, #tpu.memory_space<vmem>>, vector<24x128xf32>
    tpu.vector_store %arg11[%c0_22, %c0_23], %42 {strides = array<i32>} : memref<24x128xf32, #tpu.memory_space<vmem>>, vector<24x128xf32>,
    %c0_24 = arith.constant 0 : index
    %c0_25 = arith.constant 0 : index
    %44 = vector.load %arg9[%c0_24, %c0_25] : memref<24x1xf32, #tpu.memory_space<vmem>>, vector<24x1xf32>
    tpu.vector_store %arg9[%c0_24, %c0_25], %21 {strides = array<i32>} : memref<24x1xf32, #tpu.memory_space<vmem>>, vector<24x1xf32>,
    %c0_i32_26 = arith.constant 0 : i32
    %45 = arith.cmpi eq, %arg3, %c0_i32_26 : i32
    %46 = arith.extui %45 : i1 to i32
    %c0_i32_27 = arith.constant 0 : i32
    %47 = arith.cmpi ne, %46, %c0_i32_27 : i32
    scf.if %47 {
      %c0_28 = arith.constant 0 : index
      %c0_29 = arith.constant 0 : index
      %48 = vector.load %arg10[%c0_28, %c0_29] : memref<24x1xf32, #tpu.memory_space<vmem>>, vector<24x1xf32>
      %cst_30 = arith.constant 0.000000e+00 : f32
      %49 = vector.broadcast %cst_30 : f32 to vector<24x1xf32>
      %50 = arith.cmpf oeq, %48, %49 : vector<24x1xf32>
      %cst_31 = arith.constant 1.000000e+00 : f32
      %51 = vector.broadcast %cst_31 : f32 to vector<24x1xf32>
      %52 = arith.select %50, %51, %48 : vector<24x1xi1>, vector<24x1xf32>
      %c0_32 = arith.constant 0 : index
      %c0_33 = arith.constant 0 : index
      %53 = vector.load %arg11[%c0_32, %c0_33] : memref<24x128xf32, #tpu.memory_space<vmem>>, vector<24x128xf32>
      %54 = tpu.reciprocal %52 {approx = true} : vector<24x1xf32> -> vector<24x1xf32>
      %55 = vector.broadcast %54 : vector<24x1xf32> to vector<24x128xf32>
      %56 = arith.mulf %53, %55 : vector<24x128xf32>
      %57 = arith.truncf %56 : vector<24x128xf32> to vector<24x128xbf16>
      %c0_34 = arith.constant 0 : index
      %c0_35 = arith.constant 0 : index
      %c0_36 = arith.constant 0 : index
      %58 = vector.load %arg8[%c0_34, %c0_35, %c0_36] : memref<1x24x128xbf16, #tpu.memory_space<vmem>>, vector<1x24x128xbf16>
      %59 = vector.shape_cast %58 : vector<1x24x128xbf16> to vector<24x128xbf16>
      %60 = vector.shape_cast %57 : vector<24x128xbf16> to vector<1x24x128xbf16>
      tpu.vector_store %arg8[%c0_34, %c0_35, %c0_36], %60 {strides = array<i32>} : memref<1x24x128xbf16, #tpu.memory_space<vmem>>, vector<1x24x128xbf16>,
    } else {
    }
    return
  }
  func.func @transform_0(%arg0: i32, %arg1: i32, %arg2: i32, %arg3: i32, %arg4: memref<2xi32, #tpu.memory_space<smem>>) -> (i32, i32, i32) {
    %c0_i32 = arith.constant 0 : i32
    return %arg0, %arg2, %arg1 : i32, i32, i32
  }
  func.func @transform_1(%arg0: i32, %arg1: i32, %arg2: i32, %arg3: i32, %arg4: memref<2xi32, #tpu.memory_space<smem>>) -> (i32, i32, i32) {
    %c0_i32 = arith.constant 0 : i32
    return %arg0, %arg3, %arg1 : i32, i32, i32
  }
  func.func @transform_2(%arg0: i32, %arg1: i32, %arg2: i32, %arg3: i32, %arg4: memref<2xi32, #tpu.memory_space<smem>>) -> (i32, i32, i32) {
    %c0_i32 = arith.constant 0 : i32
    return %arg0, %arg3, %arg1 : i32, i32, i32
  }
  func.func @transform_3(%arg0: i32, %arg1: i32, %arg2: i32, %arg3: i32, %arg4: memref<2xi32, #tpu.memory_space<smem>>) -> (i32, i32, i32) {
    %c0_i32 = arith.constant 0 : i32
    return %arg0, %arg2, %arg1 : i32, i32, i32
  }
}

module attributes {stable_mosaic.version = 11 : i64} {
  func.func @_linear_kernel(%arg0: i32, %arg1: i32, %arg2: i32, %arg3: i32, %arg4: memref<1x24x256xbf16, #tpu.memory_space<vmem>>, %arg5: memref<256x256xbf16, #tpu.memory_space<vmem>>, %arg6: memref<1x256xf32, #tpu.memory_space<vmem>>, %arg7: memref<1x24x256xf32, #tpu.memory_space<vmem>>, %arg8: memref<1x24x256xf32, #tpu.memory_space<vmem>>, %arg9: memref<24x256xf32, #tpu.memory_space<vmem>>) attributes {dimension_semantics = [#tpu.dimension_semantics<parallel>, #tpu.dimension_semantics<parallel>, #tpu.dimension_semantics<parallel>, #tpu.dimension_semantics<arbitrary>], iteration_bounds = array<i64: 2, 1, 1, 1>, scalar_prefetch = 0 : i64, scratch_operands = 1 : i64, tpu.core_type = #tpu.core_type<tc>, window_params = [{transform_indices = @transform_0, window_bounds = array<i64: 1, 24, 256>}, {transform_indices = @transform_1, window_bounds = array<i64: 256, 256>}, {transform_indices = @transform_2, window_bounds = array<i64: 1, 256>}, {transform_indices = @transform_3, window_bounds = array<i64: 1, 24, 256>}, {transform_indices = @transform_4, window_bounds = array<i64: 1, 24, 256>}]} {
    %c0_i32 = arith.constant 0 : i32
    %0 = arith.cmpi eq, %arg3, %c0_i32 : i32
    %1 = arith.extui %0 : i1 to i32
    %c0_i32_0 = arith.constant 0 : i32
    %2 = arith.cmpi ne, %1, %c0_i32_0 : i32
    scf.if %2 {
      %cst_11 = arith.constant 0.000000e+00 : f32
      %13 = vector.broadcast %cst_11 : f32 to vector<24x256xf32>
      %c0_12 = arith.constant 0 : index
      %c0_13 = arith.constant 0 : index
      %14 = vector.load %arg9[%c0_12, %c0_13] : memref<24x256xf32, #tpu.memory_space<vmem>>, vector<24x256xf32>
      tpu.vector_store %arg9[%c0_12, %c0_13], %13 {strides = array<i32>} : memref<24x256xf32, #tpu.memory_space<vmem>>, vector<24x256xf32>,
    } else {
    }
    %c0 = arith.constant 0 : index
    %c0_1 = arith.constant 0 : index
    %3 = vector.load %arg9[%c0, %c0_1] : memref<24x256xf32, #tpu.memory_space<vmem>>, vector<24x256xf32>
    %c0_2 = arith.constant 0 : index
    %c0_3 = arith.constant 0 : index
    %c0_4 = arith.constant 0 : index
    %4 = vector.load %arg4[%c0_2, %c0_3, %c0_4] : memref<1x24x256xbf16, #tpu.memory_space<vmem>>, vector<1x24x256xbf16>
    %5 = vector.shape_cast %4 : vector<1x24x256xbf16> to vector<24x256xbf16>
    %c0_5 = arith.constant 0 : index
    %c0_6 = arith.constant 0 : index
    %6 = vector.load %arg5[%c0_5, %c0_6] : memref<256x256xbf16, #tpu.memory_space<vmem>>, vector<256x256xbf16>
    %cst = arith.constant dense<0.000000e+00> : vector<24x256xf32>
    %7 = tpu.matmul %5, %6, %cst {dimension_numbers = #tpu.dot_dimension_numbers<[1], [0], [0], [1], [0, 0, 1, 1], [], []>} : vector<24x256xbf16>, vector<256x256xbf16>, vector<24x256xf32> -> vector<24x256xf32>
    %8 = arith.addf %3, %7 : vector<24x256xf32>
    %c0_7 = arith.constant 0 : index
    %c0_8 = arith.constant 0 : index
    %9 = vector.load %arg9[%c0_7, %c0_8] : memref<24x256xf32, #tpu.memory_space<vmem>>, vector<24x256xf32>
    tpu.vector_store %arg9[%c0_7, %c0_8], %8 {strides = array<i32>} : memref<24x256xf32, #tpu.memory_space<vmem>>, vector<24x256xf32>,
    %c0_i32_9 = arith.constant 0 : i32
    %10 = arith.cmpi eq, %arg3, %c0_i32_9 : i32
    %11 = arith.extui %10 : i1 to i32
    %c0_i32_10 = arith.constant 0 : i32
    %12 = arith.cmpi ne, %11, %c0_i32_10 : i32
    scf.if %12 {
      %c0_11 = arith.constant 0 : index
      %c0_12 = arith.constant 0 : index
      %13 = vector.load %arg9[%c0_11, %c0_12] : memref<24x256xf32, #tpu.memory_space<vmem>>, vector<24x256xf32>
      %c0_13 = arith.constant 0 : index
      %c0_14 = arith.constant 0 : index
      %14 = vector.load %arg6[%c0_13, %c0_14] : memref<1x256xf32, #tpu.memory_space<vmem>>, vector<1x256xf32>
      %15 = vector.broadcast %14 : vector<1x256xf32> to vector<24x256xf32>
      %16 = arith.addf %13, %15 : vector<24x256xf32>
      %c0_15 = arith.constant 0 : index
      %c0_16 = arith.constant 0 : index
      %c0_17 = arith.constant 0 : index
      %17 = vector.load %arg7[%c0_15, %c0_16, %c0_17] : memref<1x24x256xf32, #tpu.memory_space<vmem>>, vector<1x24x256xf32>
      %18 = vector.shape_cast %17 : vector<1x24x256xf32> to vector<24x256xf32>
      %19 = arith.addf %18, %16 : vector<24x256xf32>
      %c0_18 = arith.constant 0 : index
      %c0_19 = arith.constant 0 : index
      %c0_20 = arith.constant 0 : index
      %20 = vector.load %arg8[%c0_18, %c0_19, %c0_20] : memref<1x24x256xf32, #tpu.memory_space<vmem>>, vector<1x24x256xf32>
      %21 = vector.shape_cast %20 : vector<1x24x256xf32> to vector<24x256xf32>
      %22 = vector.shape_cast %19 : vector<24x256xf32> to vector<1x24x256xf32>
      tpu.vector_store %arg8[%c0_18, %c0_19, %c0_20], %22 {strides = array<i32>} : memref<1x24x256xf32, #tpu.memory_space<vmem>>, vector<1x24x256xf32>,
    } else {
    }
    return
  }
  func.func @transform_0(%arg0: i32, %arg1: i32, %arg2: i32, %arg3: i32) -> (i32, i32, i32) {
    %c0_i32 = arith.constant 0 : i32
    return %arg0, %arg1, %arg3 : i32, i32, i32
  }
  func.func @transform_1(%arg0: i32, %arg1: i32, %arg2: i32, %arg3: i32) -> (i32, i32) {
    %c0_i32 = arith.constant 0 : i32
    return %arg3, %arg2 : i32, i32
  }
  func.func @transform_2(%arg0: i32, %arg1: i32, %arg2: i32, %arg3: i32) -> (i32, i32) {
    %c0_i32 = arith.constant 0 : i32
    %c0_i32_0 = arith.constant 0 : i32
    return %c0_i32, %arg2 : i32, i32
  }
  func.func @transform_3(%arg0: i32, %arg1: i32, %arg2: i32, %arg3: i32) -> (i32, i32, i32) {
    %c0_i32 = arith.constant 0 : i32
    return %arg0, %arg1, %arg2 : i32, i32, i32
  }
  func.func @transform_4(%arg0: i32, %arg1: i32, %arg2: i32, %arg3: i32) -> (i32, i32, i32) {
    %c0_i32 = arith.constant 0 : i32
    return %arg0, %arg1, %arg2 : i32, i32, i32
  }
}

module attributes {stable_mosaic.version = 11 : i64} {
  func.func @_linear_kernel(%arg0: i32, %arg1: i32, %arg2: i32, %arg3: i32, %arg4: memref<1x24x256xbf16, #tpu.memory_space<vmem>>, %arg5: memref<256x256xbf16, #tpu.memory_space<vmem>>, %arg6: memref<1x256xf32, #tpu.memory_space<vmem>>, %arg7: memref<1x24x256xbf16, #tpu.memory_space<vmem>>, %arg8: memref<24x256xf32, #tpu.memory_space<vmem>>) attributes {dimension_semantics = [#tpu.dimension_semantics<parallel>, #tpu.dimension_semantics<parallel>, #tpu.dimension_semantics<parallel>, #tpu.dimension_semantics<arbitrary>], iteration_bounds = array<i64: 2, 1, 2, 1>, scalar_prefetch = 0 : i64, scratch_operands = 1 : i64, tpu.core_type = #tpu.core_type<tc>, window_params = [{transform_indices = @transform_0, window_bounds = array<i64: 1, 24, 256>}, {transform_indices = @transform_1, window_bounds = array<i64: 256, 256>}, {transform_indices = @transform_2, window_bounds = array<i64: 1, 256>}, {transform_indices = @transform_3, window_bounds = array<i64: 1, 24, 256>}]} {
    %c0_i32 = arith.constant 0 : i32
    %0 = arith.cmpi eq, %arg3, %c0_i32 : i32
    %1 = arith.extui %0 : i1 to i32
    %c0_i32_0 = arith.constant 0 : i32
    %2 = arith.cmpi ne, %1, %c0_i32_0 : i32
    scf.if %2 {
      %cst_11 = arith.constant 0.000000e+00 : f32
      %13 = vector.broadcast %cst_11 : f32 to vector<24x256xf32>
      %c0_12 = arith.constant 0 : index
      %c0_13 = arith.constant 0 : index
      %14 = vector.load %arg8[%c0_12, %c0_13] : memref<24x256xf32, #tpu.memory_space<vmem>>, vector<24x256xf32>
      tpu.vector_store %arg8[%c0_12, %c0_13], %13 {strides = array<i32>} : memref<24x256xf32, #tpu.memory_space<vmem>>, vector<24x256xf32>,
    } else {
    }
    %c0 = arith.constant 0 : index
    %c0_1 = arith.constant 0 : index
    %3 = vector.load %arg8[%c0, %c0_1] : memref<24x256xf32, #tpu.memory_space<vmem>>, vector<24x256xf32>
    %c0_2 = arith.constant 0 : index
    %c0_3 = arith.constant 0 : index
    %c0_4 = arith.constant 0 : index
    %4 = vector.load %arg4[%c0_2, %c0_3, %c0_4] : memref<1x24x256xbf16, #tpu.memory_space<vmem>>, vector<1x24x256xbf16>
    %5 = vector.shape_cast %4 : vector<1x24x256xbf16> to vector<24x256xbf16>
    %c0_5 = arith.constant 0 : index
    %c0_6 = arith.constant 0 : index
    %6 = vector.load %arg5[%c0_5, %c0_6] : memref<256x256xbf16, #tpu.memory_space<vmem>>, vector<256x256xbf16>
    %cst = arith.constant dense<0.000000e+00> : vector<24x256xf32>
    %7 = tpu.matmul %5, %6, %cst {dimension_numbers = #tpu.dot_dimension_numbers<[1], [0], [0], [1], [0, 0, 1, 1], [], []>} : vector<24x256xbf16>, vector<256x256xbf16>, vector<24x256xf32> -> vector<24x256xf32>
    %8 = arith.addf %3, %7 : vector<24x256xf32>
    %c0_7 = arith.constant 0 : index
    %c0_8 = arith.constant 0 : index
    %9 = vector.load %arg8[%c0_7, %c0_8] : memref<24x256xf32, #tpu.memory_space<vmem>>, vector<24x256xf32>
    tpu.vector_store %arg8[%c0_7, %c0_8], %8 {strides = array<i32>} : memref<24x256xf32, #tpu.memory_space<vmem>>, vector<24x256xf32>,
    %c0_i32_9 = arith.constant 0 : i32
    %10 = arith.cmpi eq, %arg3, %c0_i32_9 : i32
    %11 = arith.extui %10 : i1 to i32
    %c0_i32_10 = arith.constant 0 : i32
    %12 = arith.cmpi ne, %11, %c0_i32_10 : i32
    scf.if %12 {
      %c0_11 = arith.constant 0 : index
      %c0_12 = arith.constant 0 : index
      %13 = vector.load %arg8[%c0_11, %c0_12] : memref<24x256xf32, #tpu.memory_space<vmem>>, vector<24x256xf32>
      %c0_13 = arith.constant 0 : index
      %c0_14 = arith.constant 0 : index
      %14 = vector.load %arg6[%c0_13, %c0_14] : memref<1x256xf32, #tpu.memory_space<vmem>>, vector<1x256xf32>
      %15 = vector.broadcast %14 : vector<1x256xf32> to vector<24x256xf32>
      %16 = arith.addf %13, %15 : vector<24x256xf32>
      %cst_15 = arith.constant 5.000000e-01 : f32
      %17 = vector.broadcast %cst_15 : f32 to vector<24x256xf32>
      %18 = arith.mulf %17, %16 : vector<24x256xf32>
      %cst_16 = arith.constant 4.471500e-02 : f32
      %19 = vector.broadcast %cst_16 : f32 to vector<24x256xf32>
      %20 = arith.mulf %19, %16 : vector<24x256xf32>
      %21 = arith.mulf %20, %16 : vector<24x256xf32>
      %22 = arith.mulf %21, %16 : vector<24x256xf32>
      %23 = arith.addf %16, %22 : vector<24x256xf32>
      %cst_17 = arith.constant 0.797884583 : f32
      %24 = vector.broadcast %cst_17 : f32 to vector<24x256xf32>
      %25 = arith.mulf %24, %23 : vector<24x256xf32>
      %26 = math.tanh %25 : vector<24x256xf32>
      %cst_18 = arith.constant 1.000000e+00 : f32
      %27 = vector.broadcast %cst_18 : f32 to vector<24x256xf32>
      %28 = arith.addf %27, %26 : vector<24x256xf32>
      %29 = arith.mulf %18, %28 : vector<24x256xf32>
      %30 = arith.truncf %29 : vector<24x256xf32> to vector<24x256xbf16>
      %c0_19 = arith.constant 0 : index
      %c0_20 = arith.constant 0 : index
      %c0_21 = arith.constant 0 : index
      %31 = vector.load %arg7[%c0_19, %c0_20, %c0_21] : memref<1x24x256xbf16, #tpu.memory_space<vmem>>, vector<1x24x256xbf16>
      %32 = vector.shape_cast %31 : vector<1x24x256xbf16> to vector<24x256xbf16>
      %33 = vector.shape_cast %30 : vector<24x256xbf16> to vector<1x24x256xbf16>
      tpu.vector_store %arg7[%c0_19, %c0_20, %c0_21], %33 {strides = array<i32>} : memref<1x24x256xbf16, #tpu.memory_space<vmem>>, vector<1x24x256xbf16>,
    } else {
    }
    return
  }
  func.func @transform_0(%arg0: i32, %arg1: i32, %arg2: i32, %arg3: i32) -> (i32, i32, i32) {
    %c0_i32 = arith.constant 0 : i32
    return %arg0, %arg1, %arg3 : i32, i32, i32
  }
  func.func @transform_1(%arg0: i32, %arg1: i32, %arg2: i32, %arg3: i32) -> (i32, i32) {
    %c0_i32 = arith.constant 0 : i32
    return %arg3, %arg2 : i32, i32
  }
  func.func @transform_2(%arg0: i32, %arg1: i32, %arg2: i32, %arg3: i32) -> (i32, i32) {
    %c0_i32 = arith.constant 0 : i32
    %c0_i32_0 = arith.constant 0 : i32
    return %c0_i32, %arg2 : i32, i32
  }
  func.func @transform_3(%arg0: i32, %arg1: i32, %arg2: i32, %arg3: i32) -> (i32, i32, i32) {
    %c0_i32 = arith.constant 0 : i32
    return %arg0, %arg1, %arg2 : i32, i32, i32
  }
}

module attributes {stable_mosaic.version = 11 : i64} {
  func.func @_linear_kernel(%arg0: i32, %arg1: i32, %arg2: i32, %arg3: i32, %arg4: memref<1x24x512xbf16, #tpu.memory_space<vmem>>, %arg5: memref<512x256xbf16, #tpu.memory_space<vmem>>, %arg6: memref<1x256xf32, #tpu.memory_space<vmem>>, %arg7: memref<1x24x256xf32, #tpu.memory_space<vmem>>, %arg8: memref<1x1x256xf32, #tpu.memory_space<vmem>>, %arg9: memref<1x24x256xf32, #tpu.memory_space<vmem>>, %arg10: memref<24x256xf32, #tpu.memory_space<vmem>>) attributes {dimension_semantics = [#tpu.dimension_semantics<parallel>, #tpu.dimension_semantics<parallel>, #tpu.dimension_semantics<parallel>, #tpu.dimension_semantics<arbitrary>], iteration_bounds = array<i64: 2, 1, 1, 1>, scalar_prefetch = 0 : i64, scratch_operands = 1 : i64, tpu.core_type = #tpu.core_type<tc>, window_params = [{transform_indices = @transform_0, window_bounds = array<i64: 1, 24, 512>}, {transform_indices = @transform_1, window_bounds = array<i64: 512, 256>}, {transform_indices = @transform_2, window_bounds = array<i64: 1, 256>}, {transform_indices = @transform_3, window_bounds = array<i64: 1, 24, 256>}, {transform_indices = @transform_4, window_bounds = array<i64: 1, 1, 256>}, {transform_indices = @transform_5, window_bounds = array<i64: 1, 24, 256>}]} {
    %c0_i32 = arith.constant 0 : i32
    %0 = arith.cmpi eq, %arg3, %c0_i32 : i32
    %1 = arith.extui %0 : i1 to i32
    %c0_i32_0 = arith.constant 0 : i32
    %2 = arith.cmpi ne, %1, %c0_i32_0 : i32
    scf.if %2 {
      %cst_11 = arith.constant 0.000000e+00 : f32
      %13 = vector.broadcast %cst_11 : f32 to vector<24x256xf32>
      %c0_12 = arith.constant 0 : index
      %c0_13 = arith.constant 0 : index
      %14 = vector.load %arg10[%c0_12, %c0_13] : memref<24x256xf32, #tpu.memory_space<vmem>>, vector<24x256xf32>
      tpu.vector_store %arg10[%c0_12, %c0_13], %13 {strides = array<i32>} : memref<24x256xf32, #tpu.memory_space<vmem>>, vector<24x256xf32>,
    } else {
    }
    %c0 = arith.constant 0 : index
    %c0_1 = arith.constant 0 : index
    %3 = vector.load %arg10[%c0, %c0_1] : memref<24x256xf32, #tpu.memory_space<vmem>>, vector<24x256xf32>
    %c0_2 = arith.constant 0 : index
    %c0_3 = arith.constant 0 : index
    %c0_4 = arith.constant 0 : index
    %4 = vector.load %arg4[%c0_2, %c0_3, %c0_4] : memref<1x24x512xbf16, #tpu.memory_space<vmem>>, vector<1x24x512xbf16>
    %5 = vector.shape_cast %4 : vector<1x24x512xbf16> to vector<24x512xbf16>
    %c0_5 = arith.constant 0 : index
    %c0_6 = arith.constant 0 : index
    %6 = vector.load %arg5[%c0_5, %c0_6] : memref<512x256xbf16, #tpu.memory_space<vmem>>, vector<512x256xbf16>
    %cst = arith.constant dense<0.000000e+00> : vector<24x256xf32>
    %7 = tpu.matmul %5, %6, %cst {dimension_numbers = #tpu.dot_dimension_numbers<[1], [0], [0], [1], [0, 0, 1, 1], [], []>} : vector<24x512xbf16>, vector<512x256xbf16>, vector<24x256xf32> -> vector<24x256xf32>
    %8 = arith.addf %3, %7 : vector<24x256xf32>
    %c0_7 = arith.constant 0 : index
    %c0_8 = arith.constant 0 : index
    %9 = vector.load %arg10[%c0_7, %c0_8] : memref<24x256xf32, #tpu.memory_space<vmem>>, vector<24x256xf32>
    tpu.vector_store %arg10[%c0_7, %c0_8], %8 {strides = array<i32>} : memref<24x256xf32, #tpu.memory_space<vmem>>, vector<24x256xf32>,
    %c0_i32_9 = arith.constant 0 : i32
    %10 = arith.cmpi eq, %arg3, %c0_i32_9 : i32
    %11 = arith.extui %10 : i1 to i32
    %c0_i32_10 = arith.constant 0 : i32
    %12 = arith.cmpi ne, %11, %c0_i32_10 : i32
    scf.if %12 {
      %c0_11 = arith.constant 0 : index
      %c0_12 = arith.constant 0 : index
      %13 = vector.load %arg10[%c0_11, %c0_12] : memref<24x256xf32, #tpu.memory_space<vmem>>, vector<24x256xf32>
      %c0_13 = arith.constant 0 : index
      %c0_14 = arith.constant 0 : index
      %14 = vector.load %arg6[%c0_13, %c0_14] : memref<1x256xf32, #tpu.memory_space<vmem>>, vector<1x256xf32>
      %15 = vector.broadcast %14 : vector<1x256xf32> to vector<24x256xf32>
      %16 = arith.addf %13, %15 : vector<24x256xf32>
      %c0_15 = arith.constant 0 : index
      %c0_16 = arith.constant 0 : index
      %c0_17 = arith.constant 0 : index
      %17 = vector.load %arg7[%c0_15, %c0_16, %c0_17] : memref<1x24x256xf32, #tpu.memory_space<vmem>>, vector<1x24x256xf32>
      %18 = vector.shape_cast %17 : vector<1x24x256xf32> to vector<24x256xf32>
      %c0_18 = arith.constant 0 : index
      %c0_19 = arith.constant 0 : index
      %c0_20 = arith.constant 0 : index
      %19 = vector.load %arg8[%c0_18, %c0_19, %c0_20] : memref<1x1x256xf32, #tpu.memory_space<vmem>>, vector<1x1x256xf32>
      %20 = vector.shape_cast %19 : vector<1x1x256xf32> to vector<1x256xf32>
      %21 = vector.broadcast %20 : vector<1x256xf32> to vector<24x256xf32>
      %22 = arith.mulf %16, %21 : vector<24x256xf32>
      %23 = arith.addf %18, %22 : vector<24x256xf32>
      %c0_21 = arith.constant 0 : index
      %c0_22 = arith.constant 0 : index
      %c0_23 = arith.constant 0 : index
      %24 = vector.load %arg9[%c0_21, %c0_22, %c0_23] : memref<1x24x256xf32, #tpu.memory_space<vmem>>, vector<1x24x256xf32>
      %25 = vector.shape_cast %24 : vector<1x24x256xf32> to vector<24x256xf32>
      %26 = vector.shape_cast %23 : vector<24x256xf32> to vector<1x24x256xf32>
      tpu.vector_store %arg9[%c0_21, %c0_22, %c0_23], %26 {strides = array<i32>} : memref<1x24x256xf32, #tpu.memory_space<vmem>>, vector<1x24x256xf32>,
    } else {
    }
    return
  }
  func.func @transform_0(%arg0: i32, %arg1: i32, %arg2: i32, %arg3: i32) -> (i32, i32, i32) {
    %c0_i32 = arith.constant 0 : i32
    return %arg0, %arg1, %arg3 : i32, i32, i32
  }
  func.func @transform_1(%arg0: i32, %arg1: i32, %arg2: i32, %arg3: i32) -> (i32, i32) {
    %c0_i32 = arith.constant 0 : i32
    return %arg3, %arg2 : i32, i32
  }
  func.func @transform_2(%arg0: i32, %arg1: i32, %arg2: i32, %arg3: i32) -> (i32, i32) {
    %c0_i32 = arith.constant 0 : i32
    %c0_i32_0 = arith.constant 0 : i32
    return %c0_i32, %arg2 : i32, i32
  }
  func.func @transform_3(%arg0: i32, %arg1: i32, %arg2: i32, %arg3: i32) -> (i32, i32, i32) {
    %c0_i32 = arith.constant 0 : i32
    return %arg0, %arg1, %arg2 : i32, i32, i32
  }
  func.func @transform_4(%arg0: i32, %arg1: i32, %arg2: i32, %arg3: i32) -> (i32, i32, i32) {
    %c0_i32 = arith.constant 0 : i32
    %c0_i32_0 = arith.constant 0 : i32
    return %arg0, %c0_i32, %arg2 : i32, i32, i32
  }
  func.func @transform_5(%arg0: i32, %arg1: i32, %arg2: i32, %arg3: i32) -> (i32, i32, i32) {
    %c0_i32 = arith.constant 0 : i32
    return %arg0, %arg1, %arg2 : i32, i32, i32
  }
}

</mosaic_0001>

<bundles_post_ra>
// kernel: wan_block_forward.15
= control target key start
LH: loop header
LB: loop body
LE: loop exit
PB: predicated region body
PF: predicated region fallthrough
CT: control target
= control target key end

     0   :  { %s576_s12 = smov 0   ;;  %s578_s13 = smov 0   ;;  %s620_s0 = inlined_call_operand.vmem [shape: f32[2,24,256], index: 0, kind: input, shape index: {}]   ;;  %s621_s1 = inlined_call_operand.vmem [shape: f32[2,1,256], index: 1, kind: input, shape index: {}]   ;;  %s622_s2 = inlined_call_operand.vmem [shape: f32[2,1,256], index: 2, kind: input, shape index: {}]   ;;  %s623_s3 = inlined_call_operand.vmem [shape: bf16[2,24,256], index: 3, kind: output, shape index: {}]  }
   0x1   :  { %s580_s14 = smov 0  }
   0x2 LB: > { %s25_s15 = sadd.s32 1, %s550_s13  ;;  %p487_p0 = scmp.ge.s32.totalorder %s554_s14, 1  ;;  %s554_s14 = sphi %s580_s14, %s13_s14   ;;  %s550_s13 = sphi %s578_s13, %s625_s13   ;;  %s546_s12 = sphi %s576_s12, %s624_s12  }
   0x3   : > { %p27_p1 = scmp.ge.s32.totalorder %s25_s15, 2  ;;  %p177_p2 = scmp.lt.s32.totalorder %s554_s14, 3 }
   0x5   : > { %s627_s15 = smov (%p27_p1, %s25_s15), 0  ;;  %p178_p3 = pnand %p487_p0, %p177_p2 }
   0x6   : > { %p220_p4 = scmp.lt.s32.totalorder (!%p178_p3), %s546_s12, 1  ;;  %v306_v32 = vlaneseq (!%p178_p3) }
   0x7   : > { %181 = sbr.rel (%p178_p3) target bundleno = 342 (0x156), region = 32 }
   0x8   : > { %v307_v38 = vshrl.u32 (!%p178_p3), %v306_v32, 7 }
   0xa   : > { %v308_v41 = vsub.s32 (!%p178_p3), 0, %v307_v38  ;;  %v312_v42 = vsub.s32 (!%p178_p3), 1, %v307_v38 }
   0xe   : > { %s629_s12 = smov (!%p220_p4, %s546_s12), 1 }
   0xf   : > { %s500_s16 = smul.u32 48, %s629_s12  ;;  %s489_s20 = sshll.u32 %s629_s12, 1 }
  0x10   : > { %s233_s23 = scalar_lea.vmem %s621_s1, %s489_s20  ;;  %s237_s26 = scalar_lea.vmem %s622_s2, %s489_s20 }
  0x11   : > { %s228_s19 = scalar_lea.vmem %s620_s0, %s500_s16  ;;  %v304_v43 = vld [vmem:[%s233_s23] sm:$0x3]  ;;  %s501_s27 = smul.u32 24, %s629_s12 }
  0x12   : > { %v249_v0 = vld [vmem:[%s228_s19] sm:$0xff]  ;;  %v250_v1 = vld [vmem:[%s228_s19 + $0x8] sm:$0xff]  ;;  %v251_v5 = vld [vmem:[%s228_s19 + $0x10] sm:$0xff]  ;;  %v309_v45 = vrot.slane %v304_v43, %v308_v41  ;;  %v313_v46 = vrot.slane %v304_v43, %v312_v42 }
  0x13   : > { %v253_v2 = vld [vmem:[%s228_s19 + $0x20] sm:$0xff]  ;;  %v255_v3 = vadd.f32 %v250_v1, %v249_v0  ;;  %v254_v4 = vld [vmem:[%s228_s19 + $0x28] sm:$0xff]  ;;  %v252_v6 = vld [vmem:[%s228_s19 + $0x18] sm:$0xff]  ;;  %s247_s30 = scalar_lea.vmem %s623_s3, %s501_s27 }
  0x14   : > { %v261_v7 = vadd.f32 %v254_v4, %v253_v2  ;;  %v258_v8 = vadd.f32 %v252_v6, %v251_v5  ;;  %v322_v44 = vld [vmem:[%s237_s26] sm:$0x3] }
  0x15   : > { %256 = vadd.xlane.f32.xlu0 %v255_v3  ;;  %v327_v48 = vrot.slane %v322_v44, %v308_v41  ;;  %v331_v49 = vrot.slane %v322_v44, %v312_v42 }
  0x16   : > { %262 = vadd.xlane.f32.xlu1 %v261_v7 }
  0x19   : > { %259 = vadd.xlane.f32.xlu0 %v258_v8 }
  0xa2   : > { %v257_v9 = vpop.xlane.xlu0 %256 }
  0xa3   : > { %v265_v10 = vmul.f32 0.00390625, %v257_v9  ;;  %v263_v11 = vpop.xlane.xlu1 %262 }
  0xa4   : > { %v267_v12 = vmul.f32 0.00390625, %v263_v11 }
  0xa5   : > { %v268_v13 = vsub.f32 %v249_v0, %v265_v10  ;;  %v269_v14 = vsub.f32 %v250_v1, %v265_v10 }
  0xa6   : > { %v272_v15 = vsub.f32 %v253_v2, %v267_v12  ;;  %v273_v16 = vsub.f32 %v254_v4, %v267_v12  ;;  %v260_v17 = vpop.xlane.xlu0 %259 }
  0xa7   : > { %v266_v18 = vmul.f32 0.00390625, %v260_v17  ;;  %v274_v19 = vmul.f32 %v268_v13, %v268_v13  ;;  %v275_v20 = vmul.f32 %v269_v14, %v269_v14 }
  0xa8   : > { %v278_v21 = vmul.f32 %v272_v15, %v272_v15  ;;  %v279_v22 = vmul.f32 %v273_v16, %v273_v16 }
  0xa9   : > { %v270_v23 = vsub.f32 %v251_v5, %v266_v18  ;;  %v271_v24 = vsub.f32 %v252_v6, %v266_v18  ;;  %v280_v25 = vadd.f32 %v275_v20, %v274_v19 }
  0xaa   : > { %v286_v26 = vadd.f32 %v279_v22, %v278_v21 }
  0xab   : > { %281 = vadd.xlane.f32.xlu1 %v280_v25  ;;  %v276_v27 = vmul.f32 %v270_v23, %v270_v23  ;;  %v277_v28 = vmul.f32 %v271_v24, %v271_v24 }
  0xad   : > { %v283_v29 = vadd.f32 %v277_v28, %v276_v27 }
  0xaf   : > { %287 = vadd.xlane.f32.xlu1 %v286_v26  ;;  %284 = vadd.xlane.f32.xlu0 %v283_v29 }
 0x138   : > { %v282_v30 = vpop.xlane.xlu1 %281 }
 0x139   : > { %v289_v31 = vmul.f32 0.00390625, %v282_v30 }
 0x13b   : > { %v292_v33 = vadd.f32 1e-06, %v289_v31 }
 0x13c   : > { %v288_v34 = vpop.xlane.xlu1 %287  ;;  %v285_v35 = vpop.xlane.xlu0 %284 }
 0x13d   : > { %526 = vrsqrt.f32 %v292_v33  ;;  %v291_v36 = vmul.f32 0.00390625, %v288_v34  ;;  %v290_v37 = vmul.f32 0.00390625, %v285_v35 }
 0x13f   : > { %v294_v39 = vadd.f32 1e-06, %v291_v36  ;;  %v293_v40 = vadd.f32 1e-06, %v290_v37 }
 0x141   : > { %528 = vrsqrt.f32 %v294_v39 }
 0x142   : > { %530 = vrsqrt.f32 %v293_v40 }
 0x147   : > { %v527_v47 = vpop.eup %526 }
 0x148   : > { %v298_v50 = vmul.f32 %v527_v47, %v268_v13  ;;  %v299_v51 = vmul.f32 %v527_v47, %v269_v14 }
 0x14a   : > { %v316_v52 = vmul.f32 %v309_v45, %v298_v50  ;;  %v317_v53 = vmul.f32 %v313_v46, %v299_v51 }
 0x14b   : > { %v529_v54 = vpop.eup %528 }
 0x14c   : > { %v531_v55 = vpop.eup %530  ;;  %v334_v56 = vadd.f32 %v327_v48, %v316_v52  ;;  %v335_v57 = vadd.f32 %v331_v49, %v317_v53  ;;  %v302_v58 = vmul.f32 %v529_v54, %v272_v15  ;;  %v303_v59 = vmul.f32 %v529_v54, %v273_v16 }
 0x14d   : > { %v300_v60 = vmul.f32 %v531_v55, %v270_v23  ;;  %v301_v61 = vmul.f32 %v531_v55, %v271_v24 }
 0x14e   : > { %v497_v62 = vpack.c.bf16 %v335_v57, %v334_v56  ;;  %v320_v63 = vmul.f32 %v309_v45, %v302_v58  ;;  %v321_v0 = vmul.f32 %v313_v46, %v303_v59 }
 0x14f   : > { %v318_v1 = vmul.f32 %v309_v45, %v300_v60  ;;  %v319_v2 = vmul.f32 %v313_v46, %v301_v61 }
 0x150   : > { %360 = vst [vmem:[%s247_s30] sm:$0xff] %v497_v62  ;;  %v338_v3 = vadd.f32 %v327_v48, %v320_v63  ;;  %v339_v4 = vadd.f32 %v331_v49, %v321_v0 }
 0x151   : > { %v336_v5 = vadd.f32 %v327_v48, %v318_v1  ;;  %v337_v6 = vadd.f32 %v331_v49, %v319_v2 }
 0x152   : > { %v499_v7 = vpack.c.bf16 %v339_v4, %v338_v3 }
 0x153   : > { %v498_v8 = vpack.c.bf16 %v337_v6, %v336_v5 }
 0x154   : > { %362 = vst [vmem:[%s247_s30 + $0x10] sm:$0xff] %v499_v7 }
 0x155   : > { %361 = vst [vmem:[%s247_s30 + $0x8] sm:$0xff] %v498_v8 }
 0x156 PF: > { %s13_s14 = sadd.s32 1, %s554_s14   ;;  %s624_s12 = smov %s550_s13 }
 0x157   : > { %p10_p5 = scmp.ge.s32.totalorder %s13_s14, 4   ;;  %s625_s13 = smov %s627_s15 }
 0x159   :  { %12 = sbr.rel (!%p10_p5) target bundleno = 2 (0x2), region = 68 }

// kernel: wan_block_forward.18
= control target key start
LH: loop header
LB: loop body
LE: loop exit
PB: predicated region body
PF: predicated region fallthrough
CT: control target
= control target key end

     0   :  { %s927_s12 = smov 0   ;;  %s929_s13 = smov 0   ;;  %s1081_s0 = inlined_call_operand.vmem [shape: bf16[2,24,256], index: 0, kind: input, shape index: {}]   ;;  %s1082_s1 = inlined_call_operand.vmem [shape: bf16[256,256], index: 1, kind: input, shape index: {}]   ;;  %s1083_s2 = inlined_call_operand.vmem [shape: f32[1,256], index: 2, kind: input, shape index: {}]   ;;  %s1084_s3 = inlined_call_operand.vmem [shape: bf16[2,24,256], index: 3, kind: output, shape index: {}]  }
   0x1   :  { %s931_s14 = smov 0  }
   0x2 LB: > { %s32_s15 = sadd.s32 1, %s901_s13  ;;  %p726_p0 = scmp.ge.s32.totalorder %s905_s14, 1  ;;  %s905_s14 = sphi %s931_s14, %s13_s14   ;;  %s901_s13 = sphi %s929_s13, %s1086_s13   ;;  %s897_s12 = sphi %s927_s12, %s1085_s12  }
   0x3   : > { %p34_p1 = scmp.ge.s32.totalorder %s32_s15, 2  ;;  %p185_p2 = scmp.lt.s32.totalorder %s905_s14, 3 }
   0x5   : > { %s1088_s15 = smov (%p34_p1, %s32_s15), 0  ;;  %p186_p3 = pnand %p726_p0, %p185_p2 }
   0x6   : > { %v830_v0 = vld [vmem:[%s1082_s1 + $0x4] ss:$8 sps:$4 sm:$0xff] (!%p186_p3)   ;;  %v832_v1 = vld [vmem:[%s1082_s1] ss:$8 sps:$4 sm:$0xff] (!%p186_p3)   ;;  %v833_v2 = vld [vmem:[%s1082_s1 + $0x14] ss:$8 sps:$4 sm:$0xff] (!%p186_p3)   ;;  %v565_v37 = vlaneseq (!%p186_p3) }
   0x7   : > { %189 = sbr.rel (%p186_p3) target bundleno = 291 (0x123), region = 32  ;;  %491 = vmatprep.subr.bf16.mxu0 (!%p186_p3), %v830_v0  ;;  %773 = vmatprep.subr.bf16.mxu1 (!%p186_p3), %v830_v0  ;;  %v835_v3 = vld [vmem:[%s1082_s1 + $0x10] ss:$8 sps:$4 sm:$0xff] (!%p186_p3)   ;;  %v836_v4 = vld [vmem:[%s1082_s1 + $0x24] ss:$8 sps:$4 sm:$0xff] (!%p186_p3)   ;;  %p231_p4 = scmp.lt.s32.totalorder (!%p186_p3), %s897_s12, 1 }
   0x8   : > { %492 = vmatpush1.bf16.msra.mxu0 (!%p186_p3), %v832_v1  ;;  %789 = vmatpush1.bf16.msra.mxu1 (!%p186_p3), %v832_v1  ;;  %v838_v5 = vld [vmem:[%s1082_s1 + $0x20] ss:$8 sps:$4 sm:$0xff] (!%p186_p3)   ;;  %v839_v6 = vld [vmem:[%s1082_s1 + $0x34] ss:$8 sps:$4 sm:$0xff] (!%p186_p3)   ;;  %v841_v7 = vld [vmem:[%s1082_s1 + $0x30] ss:$8 sps:$4 sm:$0xff] (!%p186_p3)  }
   0x9   : > { %493 = vmatprep.subr.bf16.mxu0 (!%p186_p3), %v833_v2  ;;  %774 = vmatprep.subr.bf16.mxu1 (!%p186_p3), %v833_v2  ;;  %v842_v8 = vld [vmem:[%s1082_s1 + $0x44] ss:$8 sps:$4 sm:$0xff] (!%p186_p3)   ;;  %v844_v9 = vld [vmem:[%s1082_s1 + $0x40] ss:$8 sps:$4 sm:$0xff] (!%p186_p3)   ;;  %v845_v10 = vld [vmem:[%s1082_s1 + $0x54] ss:$8 sps:$4 sm:$0xff] (!%p186_p3)  }
   0xa   : > { %v847_v11 = vld [vmem:[%s1082_s1 + $0x50] ss:$8 sps:$4 sm:$0xff] (!%p186_p3)   ;;  %v848_v12 = vld [vmem:[%s1082_s1 + $0x64] ss:$8 sps:$4 sm:$0xff] (!%p186_p3)   ;;  %v850_v15 = vld [vmem:[%s1082_s1 + $0x60] ss:$8 sps:$4 sm:$0xff] (!%p186_p3)  }
   0xb   : > { %v851_v17 = vld [vmem:[%s1082_s1 + $0x74] ss:$8 sps:$4 sm:$0xff] (!%p186_p3)   ;;  %v853_v18 = vld [vmem:[%s1082_s1 + $0x70] ss:$8 sps:$4 sm:$0xff] (!%p186_p3)   ;;  %v854_v19 = vld [vmem:[%s1082_s1 + $0x84] ss:$8 sps:$4 sm:$0xff] (!%p186_p3)  }
   0xc   : > { %494 = vmatpush1.bf16.msra.mxu0 (!%p186_p3), %v835_v3  ;;  %790 = vmatpush1.bf16.msra.mxu1 (!%p186_p3), %v835_v3  ;;  %v856_v20 = vld [vmem:[%s1082_s1 + $0x80] ss:$8 sps:$4 sm:$0xff] (!%p186_p3)   ;;  %v857_v21 = vld [vmem:[%s1082_s1 + $0x94] ss:$8 sps:$4 sm:$0xff] (!%p186_p3)   ;;  %v859_v22 = vld [vmem:[%s1082_s1 + $0x90] ss:$8 sps:$4 sm:$0xff] (!%p186_p3)  }
   0xd   : > { %495 = vmatprep.subr.bf16.mxu0 (!%p186_p3), %v836_v4  ;;  %775 = vmatprep.subr.bf16.mxu1 (!%p186_p3), %v836_v4  ;;  %v860_v23 = vld [vmem:[%s1082_s1 + $0xa4] ss:$8 sps:$4 sm:$0xff] (!%p186_p3)   ;;  %v862_v24 = vld [vmem:[%s1082_s1 + $0xa0] ss:$8 sps:$4 sm:$0xff] (!%p186_p3)   ;;  %v863_v25 = vld [vmem:[%s1082_s1 + $0xb4] ss:$8 sps:$4 sm:$0xff] (!%p186_p3)  }
   0xe   : > { %s1090_s12 = smov (!%p231_p4, %s897_s12), 1  ;;  %v865_v26 = vld [vmem:[%s1082_s1 + $0xb0] ss:$8 sps:$4 sm:$0xff]   ;;  %v866_v27 = vld [vmem:[%s1082_s1 + $0xc4] ss:$8 sps:$4 sm:$0xff]   ;;  %v566_v38 = vshrl.u32 %v565_v37, 7 }
   0xf   : > { %s805_s9 = smul.u32 24, %s1090_s12  ;;  %v868_v28 = vld [vmem:[%s1082_s1 + $0xc0] ss:$8 sps:$4 sm:$0xff]   ;;  %v869_v29 = vld [vmem:[%s1082_s1 + $0xd4] ss:$8 sps:$4 sm:$0xff]  }
  0x10   : > { %496 = vmatpush1.bf16.msra.mxu0 %v838_v5  ;;  %791 = vmatpush1.bf16.msra.mxu1 %v838_v5  ;;  %v871_v30 = vld [vmem:[%s1082_s1 + $0xd0] ss:$8 sps:$4 sm:$0xff]   ;;  %v872_v31 = vld [vmem:[%s1082_s1 + $0xe4] ss:$8 sps:$4 sm:$0xff]   ;;  %v874_v32 = vld [vmem:[%s1082_s1 + $0xe0] ss:$8 sps:$4 sm:$0xff]  }
  0x11   : > { %497 = vmatprep.subr.bf16.mxu0 %v839_v6  ;;  %776 = vmatprep.subr.bf16.mxu1 %v839_v6  ;;  %s993_s20 = scalar_lea.vmem %s1081_s0, %s805_s9  ;;  %v875_v33 = vld [vmem:[%s1082_s1 + $0xf4] ss:$8 sps:$4 sm:$0xff]   ;;  %v877_v34 = vld [vmem:[%s1082_s1 + $0xf0] ss:$8 sps:$4 sm:$0xff]   ;;  %v567_v39 = vsub.s32 0, %v566_v38  ;;  %v571_v41 = vsub.s32 1, %v566_v38  ;;  %s261_s22 = scalar_lea.vmem %s1084_s3, %s805_s9 }
  0x12   : > { %v880_v13 = vld [vmem:[%s993_s20 + $0x4] ss:$8 sps:$4 sm:$0xff]   ;;  %v1000_v14 = vld [vmem:[%s993_s20 + $0x10] sm:$0xff]  ;;  %v878_v35 = vld [vmem:[%s993_s20] ss:$8 sps:$4 sm:$0xff]  }
  0x13   : > { %v732_v16 = vcombine.high %v1000_v14, %v1000_v14  ;;  %523 = vmatprep.mubr.bf16.mxu0 %v880_v13  ;;  %v731_v36 = vcombine.low %v1000_v14, %v1000_v14  ;;  %v563_v40 = vld [vmem:[%s1083_s2] sm:$0x3] }
  0x14   : > { %498 = vmatpush1.bf16.msra.mxu0 %v841_v7  ;;  %792 = vmatpush1.bf16.msra.mxu1 %v841_v7  ;;  %v568_v42 = vrot.slane %v563_v40, %v567_v39  ;;  %v572_v43 = vrot.slane %v563_v40, %v571_v41 }
  0x15   : > { %499 = vmatprep.subr.bf16.mxu0 %v842_v8  ;;  %777 = vmatprep.subr.bf16.mxu1 %v842_v8 }
  0x16   : > { %533 = vmatprep.mubr.bf16.mxu1 %v732_v16 }
  0x18   : > { %500 = vmatpush1.bf16.msra.mxu0 %v844_v9  ;;  %793 = vmatpush1.bf16.msra.mxu1 %v844_v9 }
  0x19   : > { %501 = vmatprep.subr.bf16.mxu0 %v845_v10  ;;  %778 = vmatprep.subr.bf16.mxu1 %v845_v10 }
  0x1c   : > { %502 = vmatpush1.bf16.msra.mxu0 %v847_v11  ;;  %794 = vmatpush1.bf16.msra.mxu1 %v847_v11 }
  0x1d   : > { %503 = vmatprep.subr.bf16.mxu0 %v848_v12  ;;  %779 = vmatprep.subr.bf16.mxu1 %v848_v12 }
  0x20   : > { %504 = vmatpush1.bf16.msra.mxu0 %v850_v15  ;;  %795 = vmatpush1.bf16.msra.mxu1 %v850_v15 }
  0x21   : > { %505 = vmatprep.subr.bf16.mxu0 %v851_v17  ;;  %780 = vmatprep.subr.bf16.mxu1 %v851_v17 }
  0x24   : > { %506 = vmatpush1.bf16.msra.mxu0 %v853_v18  ;;  %796 = vmatpush1.bf16.msra.mxu1 %v853_v18 }
  0x25   : > { %507 = vmatprep.subr.bf16.mxu0 %v854_v19  ;;  %781 = vmatprep.subr.bf16.mxu1 %v854_v19 }
  0x28   : > { %508 = vmatpush1.bf16.msra.mxu0 %v856_v20  ;;  %797 = vmatpush1.bf16.msra.mxu1 %v856_v20 }
  0x29   : > { %509 = vmatprep.subr.bf16.mxu0 %v857_v21  ;;  %782 = vmatprep.subr.bf16.mxu1 %v857_v21 }
  0x2c   : > { %510 = vmatpush1.bf16.msra.mxu0 %v859_v22  ;;  %798 = vmatpush1.bf16.msra.mxu1 %v859_v22 }
  0x2d   : > { %511 = vmatprep.subr.bf16.mxu0 %v860_v23  ;;  %783 = vmatprep.subr.bf16.mxu1 %v860_v23 }
  0x30   : > { %512 = vmatpush1.bf16.msra.mxu0 %v862_v24  ;;  %799 = vmatpush1.bf16.msra.mxu1 %v862_v24 }
  0x31   : > { %513 = vmatprep.subr.bf16.mxu0 %v863_v25  ;;  %784 = vmatprep.subr.bf16.mxu1 %v863_v25 }
  0x34   : > { %514 = vmatpush1.bf16.msra.mxu0 %v865_v26  ;;  %800 = vmatpush1.bf16.msra.mxu1 %v865_v26 }
  0x35   : > { %515 = vmatprep.subr.bf16.mxu0 %v866_v27  ;;  %785 = vmatprep.subr.bf16.mxu1 %v866_v27 }
  0x38   : > { %516 = vmatpush1.bf16.msra.mxu0 %v868_v28  ;;  %801 = vmatpush1.bf16.msra.mxu1 %v868_v28 }
  0x39   : > { %517 = vmatprep.subr.bf16.mxu0 %v869_v29  ;;  %786 = vmatprep.subr.bf16.mxu1 %v869_v29 }
  0x3c   : > { %518 = vmatpush1.bf16.msra.mxu0 %v871_v30  ;;  %802 = vmatpush1.bf16.msra.mxu1 %v871_v30 }
  0x3d   : > { %519 = vmatprep.subr.bf16.mxu0 %v872_v31  ;;  %787 = vmatprep.subr.bf16.mxu1 %v872_v31 }
  0x40   : > { %520 = vmatpush1.bf16.msra.mxu0 %v874_v32  ;;  %803 = vmatpush1.bf16.msra.mxu1 %v874_v32 }
  0x41   : > { %521 = vmatprep.subr.bf16.mxu0 %v875_v33  ;;  %788 = vmatprep.subr.bf16.mxu1 %v875_v33 }
  0x44   : > { %522 = vmatpush1.bf16.msra.mxu0 %v877_v34  ;;  %804 = vmatpush1.bf16.msra.mxu1 %v877_v34 }
  0x47   : > { %524 = vmatmul.mubr.bf16.vlgmr.msra.gmra.mrb[0].mxu0 %v878_v35  ;;  %534 = vmatmul.mubr.bf16.vlgmr.msra.gmra.mrb[0].mxu1 %v731_v36 }
 0x11a   : > { %v525_v44 = vpop.f32.mrb[0].mxu0  ;;  %v535_v45 = vpop.f32.mrb[0].mxu1 }
 0x11b   : > { %v575_v46 = vadd.f32 %v568_v42, %v525_v44  ;;  %v579_v47 = vadd.f32 %v568_v42, %v535_v45  ;;  %v527_v48 = vpop.f32.mrb[1].mxu0  ;;  %v537_v49 = vpop.f32.mrb[1].mxu1 }
 0x11c   : > { %v576_v50 = vadd.f32 %v572_v43, %v527_v48  ;;  %v580_v51 = vadd.f32 %v572_v43, %v537_v49  ;;  %v529_v52 = vpop.f32.mrb[2].mxu0  ;;  %v539_v53 = vpop.f32.mrb[2].mxu1 }
 0x11d   : > { %v577_v54 = vadd.f32 %v568_v42, %v529_v52  ;;  %v531_v55 = vpop.f32.mrb[3].mxu0  ;;  %v540_v56 = vpop.f32.mrb[3].mxu1 }
 0x11e   : > { %v770_v57 = vpack.c.bf16 %v576_v50, %v575_v46  ;;  %v772_v58 = vpack.c.bf16 %v580_v51, %v579_v47  ;;  %v578_v59 = vadd.f32 %v572_v43, %v531_v55 }
 0x120   : > { %601 = vst [vmem:[%s261_s22] sm:$0xff] %v770_v57  ;;  %603 = vst [vmem:[%s261_s22 + $0x10] sm:$0xff] %v772_v58  ;;  %v771_v60 = vpack.c.bf16 %v578_v59, %v577_v54 }
 0x122   : > { %602 = vst [vmem:[%s261_s22 + $0x8] sm:$0xff] %v771_v60 }
 0x123 PF: > { %s13_s14 = sadd.s32 1, %s905_s14   ;;  %s1085_s12 = smov %s901_s13 }
 0x124   : > { %p10_p5 = scmp.ge.s32.totalorder %s13_s14, 4   ;;  %s1086_s13 = smov %s1088_s15 }
 0x126   :  { %12 = sbr.rel (!%p10_p5) target bundleno = 2 (0x2), region = 73 }

// kernel: wan_block_forward.16
= control target key start
LH: loop header
LB: loop body
LE: loop exit
PB: predicated region body
PF: predicated region fallthrough
CT: control target
= control target key end

     0   :  { %s1350_s21 = smov 0   ;;  %s1352_s22 = smov 0   ;;  %s1609_s0 = inlined_call_operand.vmem [shape: bf16[2,24,256], index: 0, kind: input, shape index: {}]   ;;  %s1610_s1 = inlined_call_operand.vmem [shape: bf16[256,256], index: 1, kind: input, shape index: {}]   ;;  %s1611_s2 = inlined_call_operand.vmem [shape: f32[1,256], index: 2, kind: input, shape index: {}]   ;;  %s1612_s3 = inlined_call_operand.vmem [shape: f32[1,256], index: 3, kind: input, shape index: {}]   ;;  %s1613_s4 = inlined_call_operand.vmem [shape: f32[2,24,64], index: 4, kind: input, shape index: {}]   ;;  %s1614_s5 = inlined_call_operand.vmem [shape: f32[2,24,64], index: 5, kind: input, shape index: {}]   ;;  %s1615_s6 = inlined_call_operand.vmem [shape: bf16[2,24,256], index: 6, kind: output, shape index: {}]  }
   0x1   :  { %s1354_s23 = smov 0  }
   0x2 LB: > { %s35_s24 = sadd.s32 1, %s1308_s22  ;;  %p1109_p0 = scmp.ge.s32.totalorder %s1312_s23, 1  ;;  %s1312_s23 = sphi %s1354_s23, %s16_s23   ;;  %s1308_s22 = sphi %s1352_s22, %s1617_s22   ;;  %s1304_s21 = sphi %s1350_s21, %s1616_s21  }
   0x3   : > { %p37_p1 = scmp.ge.s32.totalorder %s35_s24, 2  ;;  %p294_p2 = scmp.lt.s32.totalorder %s1312_s23, 3 }
   0x5   : > { %s1619_s24 = smov (%p37_p1, %s35_s24), 0  ;;  %p295_p3 = pnand %p1109_p0, %p294_p2 }
   0x6   : > { %v1231_v0 = vld [vmem:[%s1610_s1 + $0x4] ss:$8 sps:$4 sm:$0xff] (!%p295_p3)   ;;  %v1233_v1 = vld [vmem:[%s1610_s1] ss:$8 sps:$4 sm:$0xff] (!%p295_p3)   ;;  %v1234_v2 = vld [vmem:[%s1610_s1 + $0x14] ss:$8 sps:$4 sm:$0xff] (!%p295_p3)   ;;  %v718_v37 = vlaneseq (!%p295_p3) }
   0x7   : > { %298 = sbr.rel (%p295_p3) target bundleno = 702 (0x2be), region = 44  ;;  %644 = vmatprep.subr.bf16.mxu0 (!%p295_p3), %v1231_v0  ;;  %1158 = vmatprep.subr.bf16.mxu1 (!%p295_p3), %v1231_v0  ;;  %v1236_v3 = vld [vmem:[%s1610_s1 + $0x10] ss:$8 sps:$4 sm:$0xff] (!%p295_p3)   ;;  %v1237_v4 = vld [vmem:[%s1610_s1 + $0x24] ss:$8 sps:$4 sm:$0xff] (!%p295_p3)   ;;  %p364_p4 = scmp.lt.s32.totalorder (!%p295_p3), %s1304_s21, 1 }
   0x8   : > { %645 = vmatpush1.bf16.msra.mxu0 (!%p295_p3), %v1233_v1  ;;  %1174 = vmatpush1.bf16.msra.mxu1 (!%p295_p3), %v1233_v1  ;;  %v1239_v5 = vld [vmem:[%s1610_s1 + $0x20] ss:$8 sps:$4 sm:$0xff] (!%p295_p3)   ;;  %v1240_v6 = vld [vmem:[%s1610_s1 + $0x34] ss:$8 sps:$4 sm:$0xff] (!%p295_p3)   ;;  %v1242_v7 = vld [vmem:[%s1610_s1 + $0x30] ss:$8 sps:$4 sm:$0xff] (!%p295_p3)  }
   0x9   : > { %646 = vmatprep.subr.bf16.mxu0 (!%p295_p3), %v1234_v2  ;;  %1159 = vmatprep.subr.bf16.mxu1 (!%p295_p3), %v1234_v2  ;;  %v1243_v8 = vld [vmem:[%s1610_s1 + $0x44] ss:$8 sps:$4 sm:$0xff] (!%p295_p3)   ;;  %v1245_v9 = vld [vmem:[%s1610_s1 + $0x40] ss:$8 sps:$4 sm:$0xff] (!%p295_p3)   ;;  %v1246_v10 = vld [vmem:[%s1610_s1 + $0x54] ss:$8 sps:$4 sm:$0xff] (!%p295_p3)  }
   0xa   : > { %v1248_v11 = vld [vmem:[%s1610_s1 + $0x50] ss:$8 sps:$4 sm:$0xff] (!%p295_p3)   ;;  %v1249_v12 = vld [vmem:[%s1610_s1 + $0x64] ss:$8 sps:$4 sm:$0xff] (!%p295_p3)   ;;  %v1251_v15 = vld [vmem:[%s1610_s1 + $0x60] ss:$8 sps:$4 sm:$0xff] (!%p295_p3)  }
   0xb   : > { %v1252_v17 = vld [vmem:[%s1610_s1 + $0x74] ss:$8 sps:$4 sm:$0xff] (!%p295_p3)   ;;  %v1254_v18 = vld [vmem:[%s1610_s1 + $0x70] ss:$8 sps:$4 sm:$0xff] (!%p295_p3)   ;;  %v1255_v19 = vld [vmem:[%s1610_s1 + $0x84] ss:$8 sps:$4 sm:$0xff] (!%p295_p3)  }
   0xc   : > { %647 = vmatpush1.bf16.msra.mxu0 (!%p295_p3), %v1236_v3  ;;  %1175 = vmatpush1.bf16.msra.mxu1 (!%p295_p3), %v1236_v3  ;;  %v1257_v20 = vld [vmem:[%s1610_s1 + $0x80] ss:$8 sps:$4 sm:$0xff] (!%p295_p3)   ;;  %v1258_v21 = vld [vmem:[%s1610_s1 + $0x94] ss:$8 sps:$4 sm:$0xff] (!%p295_p3)   ;;  %v1260_v22 = vld [vmem:[%s1610_s1 + $0x90] ss:$8 sps:$4 sm:$0xff] (!%p295_p3)  }
   0xd   : > { %648 = vmatprep.subr.bf16.mxu0 (!%p295_p3), %v1237_v4  ;;  %1160 = vmatprep.subr.bf16.mxu1 (!%p295_p3), %v1237_v4  ;;  %v1261_v23 = vld [vmem:[%s1610_s1 + $0xa4] ss:$8 sps:$4 sm:$0xff] (!%p295_p3)   ;;  %v1263_v24 = vld [vmem:[%s1610_s1 + $0xa0] ss:$8 sps:$4 sm:$0xff] (!%p295_p3)   ;;  %v1264_v25 = vld [vmem:[%s1610_s1 + $0xb4] ss:$8 sps:$4 sm:$0xff] (!%p295_p3)  }
   0xe   : > { %s1621_s21 = smov (!%p364_p4, %s1304_s21), 1  ;;  %v1266_v26 = vld [vmem:[%s1610_s1 + $0xb0] ss:$8 sps:$4 sm:$0xff]   ;;  %v1267_v27 = vld [vmem:[%s1610_s1 + $0xc4] ss:$8 sps:$4 sm:$0xff]   ;;  %v1485_v38 = vshrl.u32 %v718_v37, 7 }
   0xf   : > { %s1402_s25 = smul.u32 24, %s1621_s21  ;;  %v1269_v28 = vld [vmem:[%s1610_s1 + $0xc0] ss:$8 sps:$4 sm:$0xff]   ;;  %v1270_v29 = vld [vmem:[%s1610_s1 + $0xd4] ss:$8 sps:$4 sm:$0xff]   ;;  %s1314_s14 = smov 64  }
  0x10   : > { %649 = vmatpush1.bf16.msra.mxu0 %v1239_v5  ;;  %1176 = vmatpush1.bf16.msra.mxu1 %v1239_v5  ;;  %v1272_v30 = vld [vmem:[%s1610_s1 + $0xd0] ss:$8 sps:$4 sm:$0xff]   ;;  %v1273_v31 = vld [vmem:[%s1610_s1 + $0xe4] ss:$8 sps:$4 sm:$0xff]   ;;  %v1275_v32 = vld [vmem:[%s1610_s1 + $0xe0] ss:$8 sps:$4 sm:$0xff]  }
  0x11   : > { %650 = vmatprep.subr.bf16.mxu0 %v1240_v6  ;;  %1161 = vmatprep.subr.bf16.mxu1 %v1240_v6  ;;  %s1414_s8 = scalar_lea.vmem %s1609_s0, %s1402_s25  ;;  %v1276_v33 = vld [vmem:[%s1610_s1 + $0xf4] ss:$8 sps:$4 sm:$0xff]   ;;  %v1278_v34 = vld [vmem:[%s1610_s1 + $0xf0] ss:$8 sps:$4 sm:$0xff]   ;;  %v720_v39 = vsub.s32 0, %v1485_v38  ;;  %v724_v41 = vsub.s32 1, %v1485_v38  ;;  %s393_s13 = scalar_lea.vmem %s1613_s4, %s1402_s25 }
  0x12   : > { %v1281_v13 = vld [vmem:[%s1414_s8 + $0x4] ss:$8 sps:$4 sm:$0xff]   ;;  %v1421_v14 = vld [vmem:[%s1414_s8 + $0x10] sm:$0xff]  ;;  %v1279_v35 = vld [vmem:[%s1414_s8] ss:$8 sps:$4 sm:$0xff]   ;;  %s403_s17 = scalar_lea.vmem %s1614_s5, %s1402_s25  ;;  %vm921_vm0 = vcmask 523264   ;;  %s414_s27 = scalar_lea.vmem %s1615_s6, %s1402_s25 }
  0x13   : > { %v1117_v16 = vcombine.high %v1421_v14, %v1421_v14  ;;  %676 = vmatprep.mubr.bf16.mxu0 %v1281_v13  ;;  %v1116_v36 = vcombine.low %v1421_v14, %v1421_v14  ;;  %v716_v40 = vld [vmem:[%s1611_s2] sm:$0x3]  ;;  %v1500_v4 = vld [vmem:[%s393_s13 + $0x10] sm:$0xff]  ;;  %v1510_v6 = vld [vmem:[%s393_s13 + $0x8] sm:$0xff] }
  0x14   : > { %651 = vmatpush1.bf16.msra.mxu0 %v1242_v7  ;;  %1177 = vmatpush1.bf16.msra.mxu1 %v1242_v7  ;;  %v721_v42 = vrot.slane %v716_v40, %v720_v39  ;;  %v725_v43 = vrot.slane %v716_v40, %v724_v41  ;;  %v1496_v3 = vld [vmem:[%s393_s13] sm:$0xff]  ;;  %v1516_v7 = vld [vmem:[%s403_s17 + $0x8] sm:$0xff] }
  0x15   : > { %652 = vmatprep.subr.bf16.mxu0 %v1243_v8  ;;  %1162 = vmatprep.subr.bf16.mxu1 %v1243_v8  ;;  %v1508_v5 = vld [vmem:[%s403_s17] sm:$0xff]  ;;  %v1518_v8 = vld [vmem:[%s403_s17 + $0x10] sm:$0xff] }
  0x16   : > { %686 = vmatprep.mubr.bf16.mxu1 %v1117_v16 }
  0x18   : > { %653 = vmatpush1.bf16.msra.mxu0 %v1245_v9  ;;  %1178 = vmatpush1.bf16.msra.mxu1 %v1245_v9 }
  0x19   : > { %654 = vmatprep.subr.bf16.mxu0 %v1246_v10  ;;  %1163 = vmatprep.subr.bf16.mxu1 %v1246_v10 }
  0x1c   : > { %655 = vmatpush1.bf16.msra.mxu0 %v1248_v11  ;;  %1179 = vmatpush1.bf16.msra.mxu1 %v1248_v11 }
  0x1d   : > { %656 = vmatprep.subr.bf16.mxu0 %v1249_v12  ;;  %1164 = vmatprep.subr.bf16.mxu1 %v1249_v12 }
  0x20   : > { %657 = vmatpush1.bf16.msra.mxu0 %v1251_v15  ;;  %1180 = vmatpush1.bf16.msra.mxu1 %v1251_v15 }
  0x21   : > { %658 = vmatprep.subr.bf16.mxu0 %v1252_v17  ;;  %1165 = vmatprep.subr.bf16.mxu1 %v1252_v17 }
  0x24   : > { %659 = vmatpush1.bf16.msra.mxu0 %v1254_v18  ;;  %1181 = vmatpush1.bf16.msra.mxu1 %v1254_v18  ;;  %v765_v18 = vld [vmem:[%s1612_s3] sm:$0x3] }
  0x25   : > { %660 = vmatprep.subr.bf16.mxu0 %v1255_v19  ;;  %1166 = vmatprep.subr.bf16.mxu1 %v1255_v19 }
  0x28   : > { %661 = vmatpush1.bf16.msra.mxu0 %v1257_v20  ;;  %1182 = vmatpush1.bf16.msra.mxu1 %v1257_v20  ;;  %v770_v20 = vrot.slane %v765_v18, %v720_v39 }
  0x29   : > { %662 = vmatprep.subr.bf16.mxu0 %v1258_v21  ;;  %1167 = vmatprep.subr.bf16.mxu1 %v1258_v21  ;;  %v774_v21 = vrot.slane %v765_v18, %v724_v41 }
  0x2c   : > { %663 = vmatpush1.bf16.msra.mxu0 %v1260_v22  ;;  %1183 = vmatpush1.bf16.msra.mxu1 %v1260_v22 }
  0x2d   : > { %664 = vmatprep.subr.bf16.mxu0 %v1261_v23  ;;  %1168 = vmatprep.subr.bf16.mxu1 %v1261_v23 }
  0x30   : > { %665 = vmatpush1.bf16.msra.mxu0 %v1263_v24  ;;  %1184 = vmatpush1.bf16.msra.mxu1 %v1263_v24 }
  0x31   : > { %666 = vmatprep.subr.bf16.mxu0 %v1264_v25  ;;  %1169 = vmatprep.subr.bf16.mxu1 %v1264_v25 }
  0x34   : > { %667 = vmatpush1.bf16.msra.mxu0 %v1266_v26  ;;  %1185 = vmatpush1.bf16.msra.mxu1 %v1266_v26 }
  0x35   : > { %668 = vmatprep.subr.bf16.mxu0 %v1267_v27  ;;  %1170 = vmatprep.subr.bf16.mxu1 %v1267_v27 }
  0x38   : > { %669 = vmatpush1.bf16.msra.mxu0 %v1269_v28  ;;  %1186 = vmatpush1.bf16.msra.mxu1 %v1269_v28 }
  0x39   : > { %670 = vmatprep.subr.bf16.mxu0 %v1270_v29  ;;  %1171 = vmatprep.subr.bf16.mxu1 %v1270_v29 }
  0x3c   : > { %671 = vmatpush1.bf16.msra.mxu0 %v1272_v30  ;;  %1187 = vmatpush1.bf16.msra.mxu1 %v1272_v30 }
  0x3d   : > { %672 = vmatprep.subr.bf16.mxu0 %v1273_v31  ;;  %1172 = vmatprep.subr.bf16.mxu1 %v1273_v31 }
  0x40   : > { %673 = vmatpush1.bf16.msra.mxu0 %v1275_v32  ;;  %1188 = vmatpush1.bf16.msra.mxu1 %v1275_v32 }
  0x41   : > { %674 = vmatprep.subr.bf16.mxu0 %v1276_v33  ;;  %1173 = vmatprep.subr.bf16.mxu1 %v1276_v33 }
  0x44   : > { %675 = vmatpush1.bf16.msra.mxu0 %v1278_v34  ;;  %1189 = vmatpush1.bf16.msra.mxu1 %v1278_v34 }
  0x47   : > { %677 = vmatmul.mubr.bf16.vlgmr.msra.gmra.mrb[0].mxu0 %v1279_v35  ;;  %687 = vmatmul.mubr.bf16.vlgmr.msra.gmra.mrb[0].mxu1 %v1116_v36 }
 0x11a   : > { %v678_v44 = vpop.f32.mrb[0].mxu0  ;;  %v688_v45 = vpop.f32.mrb[0].mxu1 }
 0x11b   : > { %v728_v46 = vadd.f32 %v721_v42, %v678_v44  ;;  %v732_v47 = vadd.f32 %v721_v42, %v688_v45  ;;  %v680_v48 = vpop.f32.mrb[1].mxu0  ;;  %v690_v49 = vpop.f32.mrb[1].mxu1 }
 0x11c   : > { %v729_v50 = vadd.f32 %v725_v43, %v680_v48  ;;  %v733_v51 = vadd.f32 %v725_v43, %v690_v49  ;;  %v682_v52 = vpop.f32.mrb[2].mxu0  ;;  %v692_v53 = vpop.f32.mrb[2].mxu1 }
 0x11d   : > { %v730_v54 = vadd.f32 %v721_v42, %v682_v52  ;;  %v684_v55 = vpop.f32.mrb[3].mxu0  ;;  %v693_v56 = vpop.f32.mrb[3].mxu1  ;;  %v738_v57 = vmul.f32 %v732_v47, %v732_v47  ;;  %v734_v58 = vmul.f32 %v728_v46, %v728_v46 }
 0x11e   : > { %v731_v59 = vadd.f32 %v725_v43, %v684_v55  ;;  %v739_v60 = vmul.f32 %v733_v51, %v733_v51  ;;  %v735_v61 = vmul.f32 %v729_v50, %v729_v50 }
 0x11f   : > { %v736_v62 = vmul.f32 %v730_v54, %v730_v54 }
 0x120   : > { %v737_v63 = vmul.f32 %v731_v59, %v731_v59  ;;  %v746_v0 = vadd.f32 %v739_v60, %v738_v57  ;;  %v740_v1 = vadd.f32 %v735_v61, %v734_v58 }
 0x122   : > { %747 = vadd.xlane.f32.xlu1 %v746_v0  ;;  %741 = vadd.xlane.f32.xlu0 %v740_v1  ;;  %v743_v2 = vadd.f32 %v737_v63, %v736_v62 }
 0x126   : > { %744 = vadd.xlane.f32.xlu0 %v743_v2 }
 0x133   : > { %828 = vrot.lane.b32.xlu1 %v1496_v3, %s1314_s14 }
 0x137   : > { %832 = vrot.lane.b32.xlu1 %v1500_v4, %s1314_s14 }
 0x13b   : > { %795 = vrot.lane.b32.xlu1 %v1508_v5, %s1314_s14 }
 0x13c   : > { %830 = vrot.lane.b32.xlu0 %v1510_v6, %s1314_s14 }
 0x13f   : > { %797 = vrot.lane.b32.xlu1 %v1516_v7, %s1314_s14 }
 0x140   : > { %799 = vrot.lane.b32.xlu0 %v1518_v8, %s1314_s14 }
 0x1af   : > { %v748_v9 = vpop.xlane.xlu1 %747  ;;  %v742_v10 = vpop.xlane.xlu0 %741 }
 0x1b0   : > { %v752_v11 = vmul.f32 0.00390625, %v748_v9  ;;  %v750_v12 = vmul.f32 0.00390625, %v742_v10 }
 0x1b2   : > { %v755_v13 = vadd.f32 1e-06, %v752_v11  ;;  %v753_v14 = vadd.f32 1e-06, %v750_v12 }
 0x1b3   : > { %v745_v15 = vpop.xlane.xlu0 %744  ;;  %v829_v26 = vpop.permute.xlu1 %828 }
 0x1b4   : > { %1284 = vrsqrt.f32 %v755_v13  ;;  %v751_v16 = vmul.f32 0.00390625, %v745_v15 }
 0x1b5   : > { %1286 = vrsqrt.f32 %v753_v14 }
 0x1b6   : > { %v754_v17 = vadd.f32 1e-06, %v751_v16 }
 0x1b7   : > { %v831_v37 = vpop.permute.xlu0 %830  ;;  %v833_v38 = vpop.permute.xlu1 %832 }
 0x1b8   : > { %1288 = vrsqrt.f32 %v754_v17 }
 0x1bb   : > { %v796_v45 = vpop.permute.xlu1 %795  ;;  %v800_v48 = vpop.permute.xlu0 %799 }
 0x1be   : > { %v1285_v19 = vpop.eup %1284 }
 0x1bf   : > { %v1287_v22 = vpop.eup %1286  ;;  %v763_v25 = vmul.f32 %v1285_v19, %v732_v47  ;;  %v764_v30 = vmul.f32 %v1285_v19, %v733_v51  ;;  %v798_v51 = vpop.permute.xlu1 %797 }
 0x1c0   : > { %v759_v23 = vmul.f32 %v1287_v22, %v728_v46  ;;  %v760_v24 = vmul.f32 %v1287_v22, %v729_v50 }
 0x1c1   : > { %v1533_v34 = vmul.f32 %v770_v20, %v763_v25  ;;  %v1540_v40 = vmul.f32 %v774_v21, %v764_v30 }
 0x1c2   : > { %v1289_v27 = vpop.eup %1288  ;;  %v1527_v28 = vmul.f32 %v770_v20, %v759_v23  ;;  %v1529_v29 = vmul.f32 %v774_v21, %v760_v24 }
 0x1c3   : > { %v761_v31 = vmul.f32 %v1289_v27, %v730_v54  ;;  %v762_v35 = vmul.f32 %v1289_v27, %v731_v59  ;;  %v839_v41 = vmul.f32 %v833_v38, %v1533_v34  ;;  %v881_v43 = vmul.f32 %v833_v38, %v1540_v40 }
 0x1c4   : > { %v837_v32 = vmul.f32 %v829_v26, %v1527_v28  ;;  %v879_v33 = vmul.f32 %v829_v26, %v1529_v29  ;;  %v804_v46 = vmul.f32 %v796_v45, %v1527_v28  ;;  %v858_v47 = vmul.f32 %v796_v45, %v1529_v29 }
 0x1c5   : > { %v1535_v36 = vmul.f32 %v770_v20, %v761_v31  ;;  %v1543_v42 = vmul.f32 %v774_v21, %v762_v35  ;;  %v806_v49 = vmul.f32 %v800_v48, %v1533_v34  ;;  %v860_v50 = vmul.f32 %v800_v48, %v1540_v40 }
 0x1c6   : > { %843 = vrot.lane.b32.xlu1 %v837_v32, %s1314_s14  ;;  %885 = vrot.lane.b32.xlu0 %v879_v33, %s1314_s14  ;;  %v822_v56 = vmul.f32 %v1508_v5, %v1527_v28  ;;  %v876_v57 = vmul.f32 %v1508_v5, %v1529_v29  ;;  %v824_v58 = vmul.f32 %v1518_v8, %v1533_v34 }
 0x1c7   : > { %v838_v39 = vmul.f32 %v831_v37, %v1535_v36  ;;  %v880_v44 = vmul.f32 %v831_v37, %v1543_v42  ;;  %v805_v52 = vmul.f32 %v798_v51, %v1535_v36  ;;  %v859_v53 = vmul.f32 %v798_v51, %v1543_v42 }
 0x1c8   : > { %v823_v59 = vmul.f32 %v1516_v7, %v1535_v36  ;;  %v877_v10 = vmul.f32 %v1516_v7, %v1543_v42  ;;  %v878_v5 = vmul.f32 %v1518_v8, %v1540_v40  ;;  %v789_v8 = vmul.f32 %v1496_v3, %v1527_v28 }
 0x1c9   : > { %v855_v21 = vmul.f32 %v1496_v3, %v1529_v29  ;;  %v791_v30 = vmul.f32 %v1500_v4, %v1533_v34  ;;  %v857_v31 = vmul.f32 %v1500_v4, %v1540_v40  ;;  %v856_v32 = vmul.f32 %v1510_v6, %v1543_v42 }
 0x1ca   : > { %847 = vrot.lane.b32.xlu1 %v839_v41, %s1314_s14  ;;  %845 = vrot.lane.b32.xlu0 %v838_v39, %s1314_s14  ;;  %v790_v28 = vmul.f32 %v1510_v6, %v1535_v36 }
 0x1ce   : > { %887 = vrot.lane.b32.xlu1 %v880_v44, %s1314_s14  ;;  %889 = vrot.lane.b32.xlu0 %v881_v43, %s1314_s14 }
 0x1d2   : > { %810 = vrot.lane.b32.xlu1 %v804_v46, %s1314_s14  ;;  %864 = vrot.lane.b32.xlu0 %v858_v47, %s1314_s14 }
 0x1d6   : > { %868 = vrot.lane.b32.xlu0 %v860_v50, %s1314_s14  ;;  %814 = vrot.lane.b32.xlu1 %v806_v49, %s1314_s14 }
 0x1da   : > { %812 = vrot.lane.b32.xlu0 %v805_v52, %s1314_s14  ;;  %866 = vrot.lane.b32.xlu1 %v859_v53, %s1314_s14 }
 0x238   : > { %v844_v54 = vpop.permute.xlu1 %843  ;;  %v886_v55 = vpop.permute.xlu0 %885 }
 0x239   : > { %v852_v62 = vadd.f32 %v844_v54, %v822_v56  ;;  %v894_v63 = vadd.f32 %v886_v55, %v876_v57 }
 0x23c   : > { %v848_v60 = vpop.permute.xlu1 %847  ;;  %v846_v61 = vpop.permute.xlu0 %845 }
 0x23d   : > { %v854_v0 = vadd.f32 %v848_v60, %v824_v58  ;;  %v853_v1 = vadd.f32 %v846_v61, %v823_v59 }
 0x23f   : > { %v1221_v2 = vpack.i.bf16 %v894_v63, %v854_v0  ;;  %v1216_v9 = vpack.i.bf16 %v853_v1, %v852_v62 }
 0x240   : > { %v888_v11 = vpop.permute.xlu1 %887  ;;  %v890_v12 = vpop.permute.xlu0 %889 }
 0x241   : > { %v895_v13 = vadd.f32 %v888_v11, %v877_v10  ;;  %v896_v14 = vadd.f32 %v890_v12, %v878_v5  ;;  %1222 = vrot.lane.b32.xlu0 %v1221_v2, %s1314_s14  ;;  %1217 = vrot.lane.b32.xlu1 %v1216_v9, %s1314_s14 }
 0x243   : > { %v1226_v15 = vpack.i.bf16 %v896_v14, %v895_v13 }
 0x244   : > { %v811_v16 = vpop.permute.xlu1 %810  ;;  %v865_v17 = vpop.permute.xlu0 %864 }
 0x245   : > { %1227 = vrot.lane.b32.xlu1 %v1226_v15, %s1314_s14  ;;  %v819_v24 = vsub.f32 %v789_v8, %v811_v16  ;;  %v873_v25 = vsub.f32 %v855_v21, %v865_v17 }
 0x248   : > { %v815_v18 = vpop.permute.xlu1 %814  ;;  %v869_v19 = vpop.permute.xlu0 %868 }
 0x249   : > { %v821_v34 = vsub.f32 %v791_v30, %v815_v18  ;;  %v875_v37 = vsub.f32 %v857_v31, %v869_v19 }
 0x24c   : > { %v867_v20 = vpop.permute.xlu1 %866  ;;  %v813_v7 = vpop.permute.xlu0 %812 }
 0x24d   : > { %v874_v39 = vsub.f32 %v856_v32, %v867_v20  ;;  %v820_v40 = vsub.f32 %v790_v28, %v813_v7 }
 0x2b3   : > { %v1218_v22 = vpop.permute.xlu1 %1217  ;;  %v1223_v23 = vpop.permute.xlu0 %1222 }
 0x2b4   : > { %v1219_v26 = vunpack.i.l.bf16 %v1218_v22  ;;  %v1225_v27 = vunpack.i.h.bf16 %v1223_v23  ;;  %v1220_v3 = vunpack.i.h.bf16 %v1218_v22  ;;  %v1224_v35 = vunpack.i.l.bf16 %v1223_v23 }
 0x2b6   : > { %v922_v29 = vsel %vm921_vm0, %v819_v24, %v1219_v26  ;;  %v925_v33 = vsel %vm921_vm0, %v873_v25, %v1225_v27  ;;  %v923_v6 = vsel %vm921_vm0, %v820_v40, %v1220_v3  ;;  %v924_v36 = vsel %vm921_vm0, %v821_v34, %v1224_v35 }
 0x2b7   : > { %v1155_v38 = vpack.c.bf16 %v925_v33, %v922_v29  ;;  %v1228_v4 = vpop.permute.xlu1 %1227 }
 0x2b8   : > { %v1230_v41 = vunpack.i.h.bf16 %v1228_v4  ;;  %v1229_v42 = vunpack.i.l.bf16 %v1228_v4 }
 0x2b9   : > { %948 = vst [vmem:[%s414_s27] sm:$0xff] %v1155_v38 }
 0x2ba   : > { %v926_v43 = vsel %vm921_vm0, %v874_v39, %v1229_v42  ;;  %v927_v44 = vsel %vm921_vm0, %v875_v37, %v1230_v41 }
 0x2bb   : > { %v1156_v45 = vpack.c.bf16 %v926_v43, %v923_v6  ;;  %v1157_v46 = vpack.c.bf16 %v927_v44, %v924_v36 }
 0x2bd   : > { %949 = vst [vmem:[%s414_s27 + $0x8] sm:$0xff] %v1156_v45  ;;  %950 = vst [vmem:[%s414_s27 + $0x10] sm:$0xff] %v1157_v46 }
 0x2be PF: > { %s16_s23 = sadd.s32 1, %s1312_s23   ;;  %s1616_s21 = smov %s1308_s22 }
 0x2bf   : > { %p13_p5 = scmp.ge.s32.totalorder %s16_s23, 4   ;;  %s1617_s22 = smov %s1619_s24 }
 0x2c1   :  { %15 = sbr.rel (!%p13_p5) target bundleno = 2 (0x2), region = 91 }

// kernel: wan_block_forward.19
= control target key start
LH: loop header
LB: loop body
LE: loop exit
PB: predicated region body
PF: predicated region fallthrough
CT: control target
= control target key end

     0   :  { %s1347_s0 = inlined_call_operand.vmem [shape: s32[2], index: 0, kind: input, shape index: {}]   ;;  %s1348_s1 = inlined_call_operand.vmem [shape: bf16[2,24,256], index: 1, kind: input, shape index: {}]   ;;  %s1349_s2 = inlined_call_operand.vmem [shape: bf16[2,24,256], index: 2, kind: input, shape index: {}]   ;;  %s1350_s3 = inlined_call_operand.vmem [shape: bf16[2,24,256], index: 3, kind: input, shape index: {}]   ;;  %s1351_s4 = inlined_call_operand.vmem [shape: bf16[2,24,256], index: 4, kind: output, shape index: {}]  }
   0x1   :  { %s9_s17 = sshll.u32 %s1347_s0, 4  ;;  %s10_s17 = int_to_ptr.vmem [resolvable:$true] %s9_s17 }
   0x2   :  { %s1084_s18 = scalar_lea.vmem %s10_s17, 16  ;;  %p1089_p1 = scmp.lt.s32.totalorder %s10_s17, %s10_s17 }
   0x3   :  { %p1085_p0 = scmp.ne.s32.totalorder %s10_s17, %s1084_s18  ;;  %p1090_p2 = scmp.lt.s32.totalorder %s1084_s18, %s1084_s18 }
   0x5   :  { %p1091_p3 = por %p1090_p2, %p1089_p1 }
   0x7   :  { %p1092_p4 = pnand %p1091_p3, %p1085_p0 }
   0x9   :  { %1095 = shalt.err (!%p1092_p4)  }
   0xa   :  { %s1154_s19 = smov [#allocation6]  }
   0xb   :  { %12 = dma.vmem_to_smem %s10_s17, 16, %s1154_s19, [#allocation5] }
   0xc   :  { %1124 = dma.done.wait [#allocation5], 16 }
   0xd   :  { %1125 = vsyncadd [#allocation5], 4294967280 }
   0xe   :  { %14 = sfence }
   0xf   :  { %s1186_s20 = smov 0   ;;  %s1188_s21 = smov 0  }
  0x10   :  { %s1190_s22 = smov 0   ;;  %s1192_s0 = smov 0  }
  0x11   :  { %s1194_s23 = smov 0   ;;  %s1196_s24 = smov 0  }
  0x12   :  { %s1198_s25 = smov 0  }
  0x13 LB: > { %s42_s26 = sadd.s32 1, %s1144_s23  ;;  %s46_s27 = sadd.s32 1, %s1148_s24  ;;  %s1152_s25 = sphi %s1198_s25, %s20_s25   ;;  %s1148_s24 = sphi %s1196_s24, %s1361_s24   ;;  %s1144_s23 = sphi %s1194_s23, %s1360_s23   ;;  %s1140_s0 = sphi %s1192_s0, %s1359_s0   ;;  %s1136_s22 = sphi %s1190_s22, %s1358_s22   ;;  %s1132_s21 = sphi %s1188_s21, %s1357_s21   ;;  %s1128_s20 = sphi %s1186_s20, %s1356_s20  }
  0x14   : > { %p44_p5 = scmp.ge.s32.totalorder %s42_s26, 2  ;;  %s935_s28 = sadd.s32 4294967295, %s1152_s25  }
  0x15   : > { %p64_p6 = scmp.ne.s32.totalorder %s1132_s21, %s1128_s20  ;;  %p65_p7 = scmp.eq.s32.totalorder %s1152_s25, 0 }
  0x16   : > { %s1363_s26 = smov (%p44_p5, %s42_s26), 0  ;;  %s1365_s27 = smov (!%p44_p5, %s46_s27), %s1148_s24 }
  0x17   : > { %p48_p8 = scmp.ge.s32.totalorder %s1365_s27, 2  ;;  %p158_p9 = scmp.eq.s32.totalorder %s935_s28, 3 }
  0x18   : > { %s53_s29 = ssub.s32 %s1144_s23, %s1363_s26  ;;  %p1232_p10 = por %p65_p7, %p64_p6 }
  0x19   : > { %s1367_s27 = smov (%p48_p8, %s1365_s27), 0  ;;  %p1238_p11 = por %p158_p9, %p64_p6 }
  0x1a   : > { %s50_s6 = ssub.s32 %s1148_s24, %s1367_s27  ;;  %s57_s8 = sadd.s32 1, %s1132_s21 }
  0x1b   : > { %s54_s7 = sor.u32 %s53_s29, %s50_s6  ;;  %p938_p13 = scmp.ge.s32.totalorder %s1152_s25, 4 }
  0x1c   : > { %p55_p12 = scmp.eq.s32.totalorder %s54_s7, 0 }
  0x1d   : > { %180 = sbr.rel (%p938_p13) target bundleno = 63 (0x3f), region = 16 }
  0x1e   : > { %s1246_s9 = scalar_select %p55_p12, %s1132_s21, %s57_s8  }
  0x24   : > { %183 = sbr.rel (!%p1232_p10) target bundleno = 45 (0x2d), region = 20  ;;  %s185_s10 = sand.u32 (%p1232_p10), 1, %s1132_s21  }
  0x25   : > { %s991_s11 = smul.u32 (%p1232_p10), 6, %s1148_s24 }
  0x26   : > { %s990_s12 = smul.u32 (%p1232_p10), 12, %s185_s10 }
  0x27   : > { %s192_s13 = sadd.s32 (%p1232_p10), %s1144_s23, %s991_s11 }
  0x28   : > { %s939_s14 = sshll.u32 (%p1232_p10), %s192_s13, 2  ;;  %s187_s18 = scalar_lea.vmem (%p1232_p10), [#allocation7], %s990_s12 }
  0x29   : > { %s194_s17 = scalar_lea.vmem (%p1232_p10), %s1348_s1, %s939_s14 }
  0x2a   : > { %v210_v0 = vld [vmem:[%s194_s17] sm:$0xf] (%p1232_p10)  ;;  %v212_v1 = vld [vmem:[%s194_s17 + $0x8] sm:$0xf] (%p1232_p10)  ;;  %v214_v2 = vld [vmem:[%s194_s17 + $0x10] sm:$0xf] (%p1232_p10) }
  0x2b   : > { %211 = vst [vmem:[%s187_s18] sm:$0xf] %v210_v0  ;;  %213 = vst [vmem:[%s187_s18 + $0x4] sm:$0xf] %v212_v1 }
  0x2c   : > { %215 = vst [vmem:[%s187_s18 + $0x8] sm:$0xf] %v214_v2 }
  0x2d PF: > { %244 = sbr.rel (!%p1232_p10) target bundleno = 54 (0x36), region = 61  ;;  %s246_s19 = sand.u32 (%p1232_p10), 1, %s1132_s21  }
  0x2e   : > { %s993_s28 = smul.u32 (%p1232_p10), 6, %s1148_s24 }
  0x2f   : > { %s992_s29 = smul.u32 (%p1232_p10), 12, %s246_s19 }
  0x30   : > { %s253_s6 = sadd.s32 (%p1232_p10), %s1144_s23, %s993_s28 }
  0x31   : > { %s940_s7 = sshll.u32 (%p1232_p10), %s253_s6, 2  ;;  %s248_s12 = scalar_lea.vmem (%p1232_p10), [#allocation8], %s992_s29 }
  0x32   : > { %s255_s11 = scalar_lea.vmem (%p1232_p10), %s1349_s2, %s940_s7 }
  0x33   : > { %v271_v3 = vld [vmem:[%s255_s11] sm:$0xf] (%p1232_p10)  ;;  %v273_v4 = vld [vmem:[%s255_s11 + $0x8] sm:$0xf] (%p1232_p10)  ;;  %v275_v5 = vld [vmem:[%s255_s11 + $0x10] sm:$0xf] (%p1232_p10) }
  0x34   : > { %272 = vst [vmem:[%s248_s12] sm:$0xf] %v271_v3  ;;  %274 = vst [vmem:[%s248_s12 + $0x4] sm:$0xf] %v273_v4 }
  0x35   : > { %276 = vst [vmem:[%s248_s12 + $0x8] sm:$0xf] %v275_v5 }
  0x36 PF: > { %305 = sbr.rel (!%p1232_p10) target bundleno = 63 (0x3f), region = 102  ;;  %s307_s13 = sand.u32 (%p1232_p10), 1, %s1132_s21  }
  0x37   : > { %s995_s14 = smul.u32 (%p1232_p10), 6, %s1148_s24 }
  0x38   : > { %s994_s15 = smul.u32 (%p1232_p10), 12, %s307_s13 }
  0x39   : > { %s314_s16 = sadd.s32 (%p1232_p10), %s1144_s23, %s995_s14 }
  0x3a   : > { %s941_s17 = sshll.u32 (%p1232_p10), %s314_s16, 2  ;;  %s309_s29 = scalar_lea.vmem (%p1232_p10), [#allocation9], %s994_s15 }
  0x3b   : > { %s316_s28 = scalar_lea.vmem (%p1232_p10), %s1350_s3, %s941_s17 }
  0x3c   : > { %v332_v6 = vld [vmem:[%s316_s28] sm:$0xf] (%p1232_p10)  ;;  %v334_v7 = vld [vmem:[%s316_s28 + $0x8] sm:$0xf] (%p1232_p10)  ;;  %v336_v8 = vld [vmem:[%s316_s28 + $0x10] sm:$0xf] (%p1232_p10) }
  0x3d   : > { %333 = vst [vmem:[%s309_s29] sm:$0xf] %v332_v6  ;;  %335 = vst [vmem:[%s309_s29 + $0x4] sm:$0xf] %v334_v7 }
  0x3e   : > { %337 = vst [vmem:[%s309_s29 + $0x8] sm:$0xf] %v336_v8 }
  0x3f PF: > { %p942_p0 = scmp.ge.s32.totalorder %s1152_s25, 1  ;;  %p365_p1 = scmp.lt.s32.totalorder %s1152_s25, 5 }
  0x41   : > { %p366_p2 = pnand %p942_p0, %p365_p1 }
  0x42   : > { %s372_s30 = sand.u32 (!%p366_p2), 1, %s1128_s20   ;;  %vm425_vm0 = vcmask (!%p366_p2), 7168   ;;  %v1155_v13 = vmov (!%p366_p2), -1e+30   ;;  %s435_s20 = sld [smem:[#allocation6 + %s1140_s0]] (!%p366_p2)  ;;  %v511_v14 = vlaneseq (!%p366_p2)  ;;  %vm523_vm2 = vcmask (!%p366_p2), 195584  }
  0x43   : > { %369 = sbr.rel (%p366_p2) target bundleno = 907 (0x38b), region = 143  ;;  %428 = vst.msk [vmem:[#allocation2 + $0x10] sm:$0xff] (!%p366_p2), %vm425_vm0, %v1155_v13  ;;  %426 = vst.msk [vmem:[#allocation2] sm:$0xff] (!%p366_p2), %vm425_vm0, %v1155_v13  ;;  %v1156_v28 = vmov (!%p366_p2), 0   ;;  %v1157_v29 = vmov (!%p366_p2), 0.0   ;;  %vm635_vm3 = vcmask (!%p366_p2), 1043456  }
  0x44   : > { %s1276_s6 = smul.u32 (!%p366_p2), 12, %s372_s30  ;;  %427 = vst.msk [vmem:[#allocation2 + $0x8] sm:$0xff] (!%p366_p2), %vm425_vm0, %v1155_v13  ;;  %v512_v15 = vand.u32 (!%p366_p2), 127, %v511_v14  ;;  %1058 = vset.pattern.permute.xlu1 (!%p366_p2), %v1156_v28  ;;  %1059 = vset.pattern.permute.xlu0 (!%p366_p2), %v1156_v28  ;;  %429 = vst.msk [vmem:[#allocation3] sm:$0xff] (!%p366_p2), %vm425_vm0, %v1157_v29 }
  0x45   : > { %430 = vst.msk [vmem:[#allocation3 + $0x8] sm:$0xff] (!%p366_p2), %vm425_vm0, %v1157_v29  ;;  %431 = vst.msk [vmem:[#allocation3 + $0x10] sm:$0xff] (!%p366_p2), %vm425_vm0, %v1157_v29 }
  0x46   : > { %s381_s7 = scalar_lea.vmem (!%p366_p2), [#allocation8], %s1276_s6  ;;  %s374_s8 = scalar_lea.vmem (!%p366_p2), [#allocation7], %s1276_s6 }
  0x47   : > { %v1060_v9 = vld [vmem:[%s381_s7] sm:$0xff] (!%p366_p2)   ;;  %v1061_v10 = vld [vmem:[%s381_s7 + $0x8] ss:$0 sps:$4 sm:$0xff] (!%p366_p2)   ;;  %v1063_v12 = vld [vmem:[%s374_s8 + $0x8] ss:$0 sps:$4 sm:$0xff] (!%p366_p2)   ;;  %s388_s10 = scalar_lea.vmem (!%p366_p2), [#allocation9], %s1276_s6 }
  0x48   : > { %973 = vmatprep.subr.bf16.mxu0 (!%p366_p2), %v1060_v9  ;;  %v1062_v11 = vld [vmem:[%s374_s8] sm:$0xff] (!%p366_p2)   ;;  %v515_v16 = vstv (!%p366_p2), %s435_s20  ;;  %v1064_v42 = vld [vmem:[%s388_s10] sm:$0xff] (!%p366_p2)   ;;  %v1065_v43 = vld [vmem:[%s388_s10 + $0x8] ss:$0 sps:$4 sm:$0xff] (!%p366_p2)   ;;  %s415_s11 = scalar_lea.vmem (!%p366_p2), [#allocation10], %s1276_s6 }
  0x49   : > { %974 = vmatpush3.bf16.xpose.msra.mxu0 (!%p366_p2), %v1060_v9  ;;  %977 = vmatprep.mubr.bf16.mxu0 (!%p366_p2), %v1062_v11  ;;  %vm1284_vm1 = vcmp.lt.s32.totalorder (!%p366_p2), %v512_v15, %v515_v16  ;;  %v637_v44 = vsel (!%p366_p2), %vm635_vm3, %v1065_v43, 0 }
  0x4a   : > { %975 = vmatprep.subr.bf16.mxu0 %v1061_v10  ;;  %v522_v30 = vld [vmem:[#allocation2 + $0x10] sm:$0xff]  ;;  %v520_v31 = vld [vmem:[#allocation2] sm:$0xff]  ;;  %981 = vmatprep.subr.bf16.mxu1 %v1064_v42  ;;  %s997_s12 = smul.u32 (%p1238_p11), 6, %s1140_s0 }
  0x4b   : > { %v521_v37 = vld [vmem:[#allocation2 + $0x8] sm:$0xff]  ;;  %982 = vmatpush3.bf16.msra.mxu1 %v1064_v42  ;;  %v572_v7 = vld [vmem:[#allocation3] sm:$0xff] }
  0x4c   : > { %989 = vmatprep.subr.msk.bf16.mxu1 %vm635_vm3, %v1065_v43  ;;  %s759_s13 = sadd.s32 (%p1238_p11), %s1136_s22, %s997_s12 }
  0x4d   : > { %s954_s14 = sshll.u32 (%p1238_p11), %s759_s13, 2 }
  0x4e   : > { %s761_s17 = scalar_lea.vmem (%p1238_p11), %s1351_s4, %s954_s14 }
  0x4f   : > { %984 = vmatpush3.bf16.msra.mxu1 %v637_v44 }
  0x51   : > { %976 = vmatpush3.bf16.xpose.msra.mxu0 %v1061_v10  ;;  %v574_v10 = vld [vmem:[#allocation3 + $0x10] sm:$0xff] }
  0x58   : > { %978 = vmatmul.mubr.bf16.vlgmr.msra.gmra.mrb[0].mxu0 %v1063_v12  ;;  %v573_v12 = vld [vmem:[#allocation3 + $0x8] sm:$0xff] }
 0x12b   : > { %v979_v18 = vpop.f32.mrb[0].mxu0 }
 0x12c   : > { %v519_v19 = vsel %vm1284_vm1, %v979_v18, -1e+30  ;;  %v496_v20 = vpop.f32.mrb[1].mxu0 }
 0x12d   : > { %v517_v21 = vsel %vm1284_vm1, %v496_v20, -1e+30  ;;  %v980_v22 = vpop.f32.mrb[2].mxu0  ;;  %v530_v23 = vsel %vm523_vm2, %v519_v19, -inf }
 0x12e   : > { %531 = vmax.xlane.f32.xlu1 %v530_v23  ;;  %v499_v24 = vpop.f32.mrb[3].mxu0  ;;  %v524_v25 = vsel %vm523_vm2, %v517_v21, -inf }
 0x12f   : > { %v518_v26 = vsel %vm1284_vm1, %v499_v24, -1e+30  ;;  %525 = vmax.xlane.f32.xlu0 %v524_v25 }
 0x130   : > { %v527_v27 = vsel %vm523_vm2, %v518_v26, -inf }
 0x133   : > { %528 = vmax.xlane.f32.xlu0 %v527_v27 }
 0x1bb   : > { %v532_v32 = vpop.xlane.xlu1 %531 }
 0x1bc   : > { %v535_v33 = vmax.f32 %v522_v30, %v532_v32  ;;  %v526_v34 = vpop.xlane.xlu0 %525 }
 0x1bd   : > { %v533_v35 = vmax.f32 %v520_v31, %v526_v34 }
 0x1be   : > { %v538_v36 = vsub.f32 %v522_v30, %v535_v33  ;;  %695 = vst.msk [vmem:[#allocation2 + $0x10] sm:$0xff] %vm425_vm0, %v535_v33 }
 0x1bf   : > { %v536_v38 = vsub.f32 %v520_v31, %v533_v35  ;;  %693 = vst.msk [vmem:[#allocation2] sm:$0xff] %vm425_vm0, %v533_v35  ;;  %547 = vperm.xlu1 %1058, %v533_v35  }
 0x1c0   : > { %v529_v39 = vpop.xlane.xlu0 %528  ;;  %v543_v3 = vmul.f32 1.442695, %v538_v36 }
 0x1c1   : > { %v534_v40 = vmax.f32 %v521_v37, %v529_v39  ;;  %v539_v1 = vmul.f32 1.442695, %v536_v38 }
 0x1c3   : > { %v537_v41 = vsub.f32 %v521_v37, %v534_v40  ;;  %694 = vst.msk [vmem:[#allocation2 + $0x8] sm:$0xff] %vm425_vm0, %v534_v40  ;;  %557 = vperm.xlu1 %1058, %v535_v33   ;;  %552 = vperm.xlu0 %1059, %v534_v40  }
 0x1c5   : > { %v541_v2 = vmul.f32 1.442695, %v537_v41 }
 0x23e   : > { %v548_v45 = vpop.permute.xlu1 %547 }
 0x23f   : > { %v560_v46 = vsub.f32 %v517_v21, %v548_v45 }
 0x241   : > { %v563_v47 = vmul.f32 1.442695, %v560_v46 }
 0x242   : > { %v558_v48 = vpop.permute.xlu1 %557  ;;  %v553_v49 = vpop.permute.xlu0 %552 }
 0x243   : > { %1066 = vpow2.f32 %v563_v47  ;;  %v562_v50 = vsub.f32 %v519_v19, %v558_v48  ;;  %v561_v51 = vsub.f32 %v518_v26, %v553_v49 }
 0x245   : > { %v567_v52 = vmul.f32 1.442695, %v562_v50  ;;  %v565_v53 = vmul.f32 1.442695, %v561_v51 }
 0x247   : > { %1068 = vpow2.f32 %v567_v52 }
 0x248   : > { %1070 = vpow2.f32 %v565_v53 }
 0x249   : > { %1072 = vpow2.f32 %v539_v1 }
 0x24a   : > { %1074 = vpow2.f32 %v541_v2 }
 0x24b   : > { %1076 = vpow2.f32 %v543_v3 }
 0x24d   : > { %v1067_v54 = vpop.eup %1066 }
 0x24e   : > { %v569_v55 = vsel %vm1284_vm1, %v1067_v54, 0.0 }
 0x24f   : > { %v578_v56 = vsel %vm523_vm2, %v569_v55, 0.0 }
 0x250   : > { %579 = vadd.xlane.f32.xlu1 %v578_v56 }
 0x251   : > { %v1069_v57 = vpop.eup %1068 }
 0x252   : > { %v1071_v58 = vpop.eup %1070  ;;  %v571_v59 = vsel %vm1284_vm1, %v1069_v57, 0.0 }
 0x253   : > { %v584_v60 = vsel %vm523_vm2, %v571_v59, 0.0  ;;  %v616_v61 = vpack.c.bf16 %v571_v59, %v571_v59  ;;  %v570_v62 = vsel %vm1284_vm1, %v1071_v58, 0.0  ;;  %v1073_v4 = vpop.eup %1072 }
 0x254   : > { %585 = vadd.xlane.f32.xlu1 %v584_v60  ;;  %v581_v63 = vsel %vm523_vm2, %v570_v62, 0.0  ;;  %v615_v0 = vpack.c.bf16 %v570_v62, %v569_v55  ;;  %v1075_v5 = vpop.eup %1074  ;;  %v575_v8 = vmul.f32 %v1073_v4, %v572_v7 }
 0x255   : > { %582 = vadd.xlane.f32.xlu0 %v581_v63  ;;  %v1077_v6 = vpop.eup %1076  ;;  %v576_v15 = vmul.f32 %v1075_v5, %v573_v12 }
 0x256   : > { %985 = vmatprep.mubr.msk.bf16.mxu1 %vm523_vm2, %v615_v0  ;;  %v577_v13 = vmul.f32 %v1077_v6, %v574_v10 }
 0x257   : > { %986 = vmatmul.mubr.msk.bf16.vlgmr.msra.gmra.mrb[0].mxu1 %vm523_vm2, %v616_v61 }
 0x265   : > { %599 = vperm.xlu1 %1058, %v1073_v4  }
 0x269   : > { %604 = vperm.xlu1 %1058, %v1075_v5  }
 0x26b   : > { %609 = vperm.xlu0 %1059, %v1077_v6  }
 0x2dd   : > { %v580_v9 = vpop.xlane.xlu1 %579 }
 0x2de   : > { %v587_v11 = vadd.f32 %v580_v9, %v575_v8 }
 0x2e0   : > { %591 = vst.msk [vmem:[#allocation3] sm:$0xff] %vm425_vm0, %v587_v11 }
 0x2e1   : > { %v586_v14 = vpop.xlane.xlu1 %585 }
 0x2e2   : > { %v589_v16 = vadd.f32 %v586_v14, %v577_v13  ;;  %v583_v17 = vpop.xlane.xlu0 %582 }
 0x2e3   : > { %v588_v18 = vadd.f32 %v583_v17, %v576_v15 }
 0x2e4   : > { %593 = vst.msk [vmem:[#allocation3 + $0x10] sm:$0xff] %vm425_vm0, %v589_v16 }
 0x2e5   : > { %592 = vst.msk [vmem:[#allocation3 + $0x8] sm:$0xff] %vm425_vm0, %v588_v18  ;;  %v600_v32 = vpop.permute.xlu1 %599 }
 0x2e6   : > { %v612_v35 = vmul.f32 0.0, %v600_v32 }
 0x2e7   : > { %v699_v19 = vld [vmem:[#allocation3] sm:$0xff] }
 0x2e8   : > { %vm702_vm4 = vcmp.eq.f32.partialorder %v699_v19, 0.0 }
 0x2e9   : > { %v705_v20 = vsel %vm702_vm4, 1.0, %v699_v19  ;;  %v605_v33 = vpop.permute.xlu1 %604 }
 0x2ea   : > { %1078 = vrcp.f32 %v705_v20  ;;  %v613_v36 = vmul.f32 0.0, %v605_v33  ;;  %v610_v37 = vpop.permute.xlu0 %609 }
 0x2eb   : > { %v701_v21 = vld [vmem:[#allocation3 + $0x10] sm:$0xff]  ;;  %v614_v41 = vmul.f32 0.0, %v610_v37 }
 0x2ec   : > { %v700_v22 = vld [vmem:[#allocation3 + $0x8] sm:$0xff]  ;;  %vm704_vm6 = vcmp.eq.f32.partialorder %v701_v21, 0.0 }
 0x2ed   : > { %vm703_vm5 = vcmp.eq.f32.partialorder %v700_v22, 0.0  ;;  %v707_v24 = vsel %vm704_vm6, 1.0, %v701_v21 }
 0x2ee   : > { %v706_v23 = vsel %vm703_vm5, 1.0, %v700_v22 }
 0x2ef   : > { %1080 = vrcp.f32 %v706_v23 }
 0x2f0   : > { %1082 = vrcp.f32 %v707_v24 }
 0x2f4   : > { %v1079_v25 = vpop.eup %1078 }
 0x2f5   : > { %716 = vperm.xlu1 %1058, %v1079_v25  }
 0x2f9   : > { %v1081_v26 = vpop.eup %1080 }
 0x2fa   : > { %721 = vperm.xlu1 %1058, %v1081_v26   ;;  %v1083_v27 = vpop.eup %1082 }
 0x2fe   : > { %726 = vperm.xlu1 %1058, %v1083_v27  }
 0x32a   : > { %v987_v28 = vpop.f32.mrb[0].mxu1 }
 0x32b   : > { %v673_v29 = vpop.f32.mrb[1].mxu1  ;;  %v689_v44 = vadd.f32 %v987_v28, %v614_v41 }
 0x32c   : > { %v988_v30 = vpop.f32.mrb[2].mxu1  ;;  %v687_v38 = vadd.f32 %v673_v29, %v612_v35 }
 0x32d   : > { %v676_v31 = vpop.f32.mrb[3].mxu1 }
 0x32e   : > { %v688_v39 = vadd.f32 %v676_v31, %v613_v36 }
 0x374   : > { %v717_v34 = vpop.permute.xlu1 %716 }
 0x375   : > { %v729_v42 = vmul.f32 %v717_v34, %v687_v38 }
 0x379   : > { %v722_v40 = vpop.permute.xlu1 %721 }
 0x37a   : > { %v730_v43 = vmul.f32 %v722_v40, %v688_v39 }
 0x37c   : > { %v963_v45 = vpack.c.bf16 %v730_v43, %v729_v42  ;;  %754 = sbr.rel (!%p1238_p11) target bundleno = 907 (0x38b), region = 167 }
 0x37d   : > { %v727_v46 = vpop.permute.xlu1 %726 }
 0x37e   : > { %964 = vst [vmem:[%s415_s11] sm:$0xff] %v963_v45   ;;  %v731_v47 = vmul.f32 %v727_v46, %v689_v44 }
 0x380   : > { %v959_v48 = vpack.c.bf16 %v731_v47, %v731_v47 }
 0x382   : > { %747 = vst [vmem:[%s415_s11 + $0x8] sm:$0xf] %v959_v48 }
 0x385   : > { %v777_v49 = vld [vmem:[%s415_s11] sm:$0xf]  ;;  %v779_v50 = vld [vmem:[%s415_s11 + $0x4] sm:$0xf] }
 0x386   : > { %778 = vst [vmem:[%s761_s17] sm:$0xf] %v777_v49  ;;  %780 = vst [vmem:[%s761_s17 + $0x8] sm:$0xf] %v779_v50 }
 0x389   : > { %v781_v51 = vld [vmem:[%s415_s11 + $0x8] sm:$0xf] }
 0x38a   : > { %782 = vst [vmem:[%s761_s17 + $0x10] sm:$0xf] %v781_v51 }
 0x38b PF: > { %s20_s25 = sadd.s32 1, %s1152_s25   ;;  %s1356_s20 = smov %s1132_s21 }
 0x38c   : > { %p17_p3 = scmp.ge.s32.totalorder %s20_s25, 6   ;;  %s1357_s21 = smov %s1246_s9 }
 0x38d   : > { %s1358_s22 = smov %s1144_s23  ;;  %s1359_s0 = smov %s1148_s24 }
 0x38e   : > { %s1360_s23 = smov %s1363_s26  ;;  %s1361_s24 = smov %s1367_s27 }
 0x38f   :  { %19 = sbr.rel (!%p17_p3) target bundleno = 19 (0x13), region = 255 }

// kernel: wan_block_forward.20
= control target key start
LH: loop header
LB: loop body
LE: loop exit
PB: predicated region body
PF: predicated region fallthrough
CT: control target
= control target key end

     0   :  { %s1216_s18 = smov 0   ;;  %s1218_s19 = smov 0   ;;  %s1374_s0 = inlined_call_operand.vmem [shape: bf16[2,24,256], index: 0, kind: input, shape index: {}]   ;;  %s1375_s1 = inlined_call_operand.vmem [shape: bf16[256,256], index: 1, kind: input, shape index: {}]   ;;  %s1376_s2 = inlined_call_operand.vmem [shape: f32[1,256], index: 2, kind: input, shape index: {}]   ;;  %s1377_s3 = inlined_call_operand.vmem [shape: f32[2,24,256], index: 3, kind: input, shape index: {}, may-alias: {3,5}]   ;;  %s1378_s4 = inlined_call_operand.vmem [shape: f32[2,1,256], index: 4, kind: input, shape index: {}]   ;;  %s1379_s5 = inlined_call_operand.vmem [shape: f32[2,24,256], index: 5, kind: output, shape index: {}, may-alias: {3,5}]  }
   0x1   :  { %s1220_s20 = smov 0  }
   0x2 LB: > { %s41_s21 = sadd.s32 1, %s1180_s19  ;;  %p1008_p0 = scmp.ge.s32.totalorder %s1184_s20, 1  ;;  %s1184_s20 = sphi %s1220_s20, %s15_s20   ;;  %s1180_s19 = sphi %s1218_s19, %s1381_s19   ;;  %s1176_s18 = sphi %s1216_s18, %s1380_s18  }
   0x3   : > { %p43_p1 = scmp.ge.s32.totalorder %s41_s21, 2  ;;  %p302_p2 = scmp.lt.s32.totalorder %s1184_s20, 3 }
   0x5   : > { %s1383_s21 = smov (%p43_p1, %s41_s21), 0  ;;  %p303_p3 = pnand %p1008_p0, %p302_p2 }
   0x6   : > { %v1109_v0 = vld [vmem:[%s1375_s1 + $0x4] ss:$8 sps:$4 sm:$0xff] (!%p303_p3)   ;;  %v1111_v1 = vld [vmem:[%s1375_s1] ss:$8 sps:$4 sm:$0xff] (!%p303_p3)   ;;  %v1112_v2 = vld [vmem:[%s1375_s1 + $0x14] ss:$8 sps:$4 sm:$0xff] (!%p303_p3)   ;;  %v760_v37 = vlaneseq (!%p303_p3) }
   0x7   : > { %306 = sbr.rel (%p303_p3) target bundleno = 293 (0x125), region = 40  ;;  %686 = vmatprep.subr.bf16.mxu0 (!%p303_p3), %v1109_v0  ;;  %1051 = vmatprep.subr.bf16.mxu1 (!%p303_p3), %v1109_v0  ;;  %v1114_v3 = vld [vmem:[%s1375_s1 + $0x10] ss:$8 sps:$4 sm:$0xff] (!%p303_p3)   ;;  %v1115_v4 = vld [vmem:[%s1375_s1 + $0x24] ss:$8 sps:$4 sm:$0xff] (!%p303_p3)   ;;  %p386_p4 = scmp.lt.s32.totalorder (!%p303_p3), %s1176_s18, 1 }
   0x8   : > { %687 = vmatpush1.bf16.msra.mxu0 (!%p303_p3), %v1111_v1  ;;  %1067 = vmatpush1.bf16.msra.mxu1 (!%p303_p3), %v1111_v1  ;;  %v1117_v5 = vld [vmem:[%s1375_s1 + $0x20] ss:$8 sps:$4 sm:$0xff] (!%p303_p3)   ;;  %v1118_v6 = vld [vmem:[%s1375_s1 + $0x34] ss:$8 sps:$4 sm:$0xff] (!%p303_p3)   ;;  %v1120_v7 = vld [vmem:[%s1375_s1 + $0x30] ss:$8 sps:$4 sm:$0xff] (!%p303_p3)  }
   0x9   : > { %688 = vmatprep.subr.bf16.mxu0 (!%p303_p3), %v1112_v2  ;;  %1052 = vmatprep.subr.bf16.mxu1 (!%p303_p3), %v1112_v2  ;;  %v1121_v8 = vld [vmem:[%s1375_s1 + $0x44] ss:$8 sps:$4 sm:$0xff] (!%p303_p3)   ;;  %v1123_v9 = vld [vmem:[%s1375_s1 + $0x40] ss:$8 sps:$4 sm:$0xff] (!%p303_p3)   ;;  %v1124_v10 = vld [vmem:[%s1375_s1 + $0x54] ss:$8 sps:$4 sm:$0xff] (!%p303_p3)  }
   0xa   : > { %v1126_v11 = vld [vmem:[%s1375_s1 + $0x50] ss:$8 sps:$4 sm:$0xff] (!%p303_p3)   ;;  %v1127_v12 = vld [vmem:[%s1375_s1 + $0x64] ss:$8 sps:$4 sm:$0xff] (!%p303_p3)   ;;  %v1129_v15 = vld [vmem:[%s1375_s1 + $0x60] ss:$8 sps:$4 sm:$0xff] (!%p303_p3)  }
   0xb   : > { %v1130_v17 = vld [vmem:[%s1375_s1 + $0x74] ss:$8 sps:$4 sm:$0xff] (!%p303_p3)   ;;  %v1132_v18 = vld [vmem:[%s1375_s1 + $0x70] ss:$8 sps:$4 sm:$0xff] (!%p303_p3)   ;;  %v1133_v19 = vld [vmem:[%s1375_s1 + $0x84] ss:$8 sps:$4 sm:$0xff] (!%p303_p3)  }
   0xc   : > { %689 = vmatpush1.bf16.msra.mxu0 (!%p303_p3), %v1114_v3  ;;  %1068 = vmatpush1.bf16.msra.mxu1 (!%p303_p3), %v1114_v3  ;;  %v1135_v20 = vld [vmem:[%s1375_s1 + $0x80] ss:$8 sps:$4 sm:$0xff] (!%p303_p3)   ;;  %v1136_v21 = vld [vmem:[%s1375_s1 + $0x94] ss:$8 sps:$4 sm:$0xff] (!%p303_p3)   ;;  %v1138_v22 = vld [vmem:[%s1375_s1 + $0x90] ss:$8 sps:$4 sm:$0xff] (!%p303_p3)  }
   0xd   : > { %690 = vmatprep.subr.bf16.mxu0 (!%p303_p3), %v1115_v4  ;;  %1053 = vmatprep.subr.bf16.mxu1 (!%p303_p3), %v1115_v4  ;;  %v1139_v23 = vld [vmem:[%s1375_s1 + $0xa4] ss:$8 sps:$4 sm:$0xff] (!%p303_p3)   ;;  %v1141_v24 = vld [vmem:[%s1375_s1 + $0xa0] ss:$8 sps:$4 sm:$0xff] (!%p303_p3)   ;;  %v1142_v25 = vld [vmem:[%s1375_s1 + $0xb4] ss:$8 sps:$4 sm:$0xff] (!%p303_p3)  }
   0xe   : > { %s1385_s18 = smov (!%p386_p4, %s1176_s18), 1  ;;  %v1144_v26 = vld [vmem:[%s1375_s1 + $0xb0] ss:$8 sps:$4 sm:$0xff]   ;;  %v1145_v27 = vld [vmem:[%s1375_s1 + $0xc4] ss:$8 sps:$4 sm:$0xff]   ;;  %v761_v38 = vshrl.u32 %v760_v37, 7 }
   0xf   : > { %s1083_s17 = smul.u32 24, %s1385_s18  ;;  %v1147_v28 = vld [vmem:[%s1375_s1 + $0xc0] ss:$8 sps:$4 sm:$0xff]   ;;  %v1148_v29 = vld [vmem:[%s1375_s1 + $0xd4] ss:$8 sps:$4 sm:$0xff]   ;;  %s1011_s29 = sshll.u32 %s1385_s18, 1 }
  0x10   : > { %691 = vmatpush1.bf16.msra.mxu0 %v1117_v5  ;;  %1069 = vmatpush1.bf16.msra.mxu1 %v1117_v5  ;;  %v1150_v30 = vld [vmem:[%s1375_s1 + $0xd0] ss:$8 sps:$4 sm:$0xff]   ;;  %v1151_v31 = vld [vmem:[%s1375_s1 + $0xe4] ss:$8 sps:$4 sm:$0xff]   ;;  %v1153_v32 = vld [vmem:[%s1375_s1 + $0xe0] ss:$8 sps:$4 sm:$0xff]   ;;  %s440_s7 = scalar_lea.vmem %s1378_s4, %s1011_s29 }
  0x11   : > { %692 = vmatprep.subr.bf16.mxu0 %v1118_v6  ;;  %1054 = vmatprep.subr.bf16.mxu1 %v1118_v6  ;;  %s1280_s28 = scalar_lea.vmem %s1374_s0, %s1083_s17  ;;  %v1154_v33 = vld [vmem:[%s1375_s1 + $0xf4] ss:$8 sps:$4 sm:$0xff]   ;;  %v1156_v34 = vld [vmem:[%s1375_s1 + $0xf0] ss:$8 sps:$4 sm:$0xff]   ;;  %v762_v39 = vsub.s32 0, %v761_v38  ;;  %v766_v41 = vsub.s32 1, %v761_v38 }
  0x12   : > { %v1159_v13 = vld [vmem:[%s1280_s28 + $0x4] ss:$8 sps:$4 sm:$0xff]   ;;  %v1287_v14 = vld [vmem:[%s1280_s28 + $0x10] sm:$0xff]  ;;  %v1157_v35 = vld [vmem:[%s1280_s28] ss:$8 sps:$4 sm:$0xff]   ;;  %s1084_s28 = smul.u32 48, %s1385_s18 }
  0x13   : > { %v1016_v16 = vcombine.high %v1287_v14, %v1287_v14  ;;  %718 = vmatprep.mubr.bf16.mxu0 %v1159_v13  ;;  %v1015_v36 = vcombine.low %v1287_v14, %v1287_v14  ;;  %v758_v40 = vld [vmem:[%s1376_s2] sm:$0x3] }
  0x14   : > { %693 = vmatpush1.bf16.msra.mxu0 %v1120_v7  ;;  %1070 = vmatpush1.bf16.msra.mxu1 %v1120_v7  ;;  %v782_v42 = vld [vmem:[%s440_s7] sm:$0x3]  ;;  %v763_v43 = vrot.slane %v758_v40, %v762_v39  ;;  %v767_v44 = vrot.slane %v758_v40, %v766_v41  ;;  %s430_s12 = scalar_lea.vmem %s1377_s3, %s1084_s28  ;;  %s455_s14 = scalar_lea.vmem %s1379_s5, %s1084_s28 }
  0x15   : > { %694 = vmatprep.subr.bf16.mxu0 %v1121_v8  ;;  %1055 = vmatprep.subr.bf16.mxu1 %v1121_v8  ;;  %v787_v45 = vrot.slane %v782_v42, %v762_v39  ;;  %v791_v48 = vrot.slane %v782_v42, %v766_v41  ;;  %v776_v53 = vld [vmem:[%s430_s12] sm:$0xff]  ;;  %v777_v61 = vld [vmem:[%s430_s12 + $0x8] sm:$0xff]  ;;  %v778_v4 = vld [vmem:[%s430_s12 + $0x10] sm:$0xff] }
  0x16   : > { %728 = vmatprep.mubr.bf16.mxu1 %v1016_v16  ;;  %v780_v54 = vld [vmem:[%s430_s12 + $0x20] sm:$0xff]  ;;  %v781_v62 = vld [vmem:[%s430_s12 + $0x28] sm:$0xff]  ;;  %v779_v6 = vld [vmem:[%s430_s12 + $0x18] sm:$0xff] }
  0x18   : > { %695 = vmatpush1.bf16.msra.mxu0 %v1123_v9  ;;  %1071 = vmatpush1.bf16.msra.mxu1 %v1123_v9 }
  0x19   : > { %696 = vmatprep.subr.bf16.mxu0 %v1124_v10  ;;  %1056 = vmatprep.subr.bf16.mxu1 %v1124_v10 }
  0x1c   : > { %697 = vmatpush1.bf16.msra.mxu0 %v1126_v11  ;;  %1072 = vmatpush1.bf16.msra.mxu1 %v1126_v11 }
  0x1d   : > { %698 = vmatprep.subr.bf16.mxu0 %v1127_v12  ;;  %1057 = vmatprep.subr.bf16.mxu1 %v1127_v12 }
  0x20   : > { %699 = vmatpush1.bf16.msra.mxu0 %v1129_v15  ;;  %1073 = vmatpush1.bf16.msra.mxu1 %v1129_v15 }
  0x21   : > { %700 = vmatprep.subr.bf16.mxu0 %v1130_v17  ;;  %1058 = vmatprep.subr.bf16.mxu1 %v1130_v17 }
  0x24   : > { %701 = vmatpush1.bf16.msra.mxu0 %v1132_v18  ;;  %1074 = vmatpush1.bf16.msra.mxu1 %v1132_v18 }
  0x25   : > { %702 = vmatprep.subr.bf16.mxu0 %v1133_v19  ;;  %1059 = vmatprep.subr.bf16.mxu1 %v1133_v19 }
  0x28   : > { %703 = vmatpush1.bf16.msra.mxu0 %v1135_v20  ;;  %1075 = vmatpush1.bf16.msra.mxu1 %v1135_v20 }
  0x29   : > { %704 = vmatprep.subr.bf16.mxu0 %v1136_v21  ;;  %1060 = vmatprep.subr.bf16.mxu1 %v1136_v21 }
  0x2c   : > { %705 = vmatpush1.bf16.msra.mxu0 %v1138_v22  ;;  %1076 = vmatpush1.bf16.msra.mxu1 %v1138_v22 }
  0x2d   : > { %706 = vmatprep.subr.bf16.mxu0 %v1139_v23  ;;  %1061 = vmatprep.subr.bf16.mxu1 %v1139_v23 }
  0x30   : > { %707 = vmatpush1.bf16.msra.mxu0 %v1141_v24  ;;  %1077 = vmatpush1.bf16.msra.mxu1 %v1141_v24 }
  0x31   : > { %708 = vmatprep.subr.bf16.mxu0 %v1142_v25  ;;  %1062 = vmatprep.subr.bf16.mxu1 %v1142_v25 }
  0x34   : > { %709 = vmatpush1.bf16.msra.mxu0 %v1144_v26  ;;  %1078 = vmatpush1.bf16.msra.mxu1 %v1144_v26 }
  0x35   : > { %710 = vmatprep.subr.bf16.mxu0 %v1145_v27  ;;  %1063 = vmatprep.subr.bf16.mxu1 %v1145_v27 }
  0x38   : > { %711 = vmatpush1.bf16.msra.mxu0 %v1147_v28  ;;  %1079 = vmatpush1.bf16.msra.mxu1 %v1147_v28 }
  0x39   : > { %712 = vmatprep.subr.bf16.mxu0 %v1148_v29  ;;  %1064 = vmatprep.subr.bf16.mxu1 %v1148_v29 }
  0x3c   : > { %713 = vmatpush1.bf16.msra.mxu0 %v1150_v30  ;;  %1080 = vmatpush1.bf16.msra.mxu1 %v1150_v30 }
  0x3d   : > { %714 = vmatprep.subr.bf16.mxu0 %v1151_v31  ;;  %1065 = vmatprep.subr.bf16.mxu1 %v1151_v31 }
  0x40   : > { %715 = vmatpush1.bf16.msra.mxu0 %v1153_v32  ;;  %1081 = vmatpush1.bf16.msra.mxu1 %v1153_v32 }
  0x41   : > { %716 = vmatprep.subr.bf16.mxu0 %v1154_v33  ;;  %1066 = vmatprep.subr.bf16.mxu1 %v1154_v33 }
  0x44   : > { %717 = vmatpush1.bf16.msra.mxu0 %v1156_v34  ;;  %1082 = vmatpush1.bf16.msra.mxu1 %v1156_v34 }
  0x47   : > { %719 = vmatmul.mubr.bf16.vlgmr.msra.gmra.mrb[0].mxu0 %v1157_v35  ;;  %729 = vmatmul.mubr.bf16.vlgmr.msra.gmra.mrb[0].mxu1 %v1015_v36 }
 0x11a   : > { %v720_v46 = vpop.f32.mrb[0].mxu0  ;;  %v730_v47 = vpop.f32.mrb[0].mxu1 }
 0x11b   : > { %v770_v49 = vadd.f32 %v763_v43, %v720_v46  ;;  %v774_v50 = vadd.f32 %v763_v43, %v730_v47  ;;  %v722_v51 = vpop.f32.mrb[1].mxu0  ;;  %v732_v52 = vpop.f32.mrb[1].mxu1 }
 0x11c   : > { %v771_v55 = vadd.f32 %v767_v44, %v722_v51  ;;  %v775_v56 = vadd.f32 %v767_v44, %v732_v52  ;;  %v724_v57 = vpop.f32.mrb[2].mxu0  ;;  %v734_v58 = vpop.f32.mrb[2].mxu1 }
 0x11d   : > { %v794_v59 = vmul.f32 %v787_v45, %v770_v49  ;;  %v798_v60 = vmul.f32 %v787_v45, %v774_v50  ;;  %v772_v63 = vadd.f32 %v763_v43, %v724_v57  ;;  %v726_v0 = vpop.f32.mrb[3].mxu0  ;;  %v735_v1 = vpop.f32.mrb[3].mxu1 }
 0x11e   : > { %v795_v2 = vmul.f32 %v791_v48, %v771_v55  ;;  %v799_v3 = vmul.f32 %v791_v48, %v775_v56  ;;  %v773_v5 = vadd.f32 %v767_v44, %v726_v0 }
 0x11f   : > { %v800_v7 = vadd.f32 %v794_v59, %v776_v53  ;;  %v804_v8 = vadd.f32 %v798_v60, %v780_v54  ;;  %v796_v9 = vmul.f32 %v787_v45, %v772_v63 }
 0x120   : > { %v801_v10 = vadd.f32 %v795_v2, %v777_v61  ;;  %v805_v11 = vadd.f32 %v799_v3, %v781_v62  ;;  %v797_v12 = vmul.f32 %v791_v48, %v773_v5 }
 0x121   : > { %v802_v13 = vadd.f32 %v796_v9, %v778_v4  ;;  %806 = vst [vmem:[%s455_s14] sm:$0xff] %v800_v7  ;;  %810 = vst [vmem:[%s455_s14 + $0x20] sm:$0xff] %v804_v8 }
 0x122   : > { %v803_v14 = vadd.f32 %v797_v12, %v779_v6  ;;  %807 = vst [vmem:[%s455_s14 + $0x8] sm:$0xff] %v801_v10  ;;  %811 = vst [vmem:[%s455_s14 + $0x28] sm:$0xff] %v805_v11 }
 0x123   : > { %808 = vst [vmem:[%s455_s14 + $0x10] sm:$0xff] %v802_v13 }
 0x124   : > { %809 = vst [vmem:[%s455_s14 + $0x18] sm:$0xff] %v803_v14 }
 0x125 PF: > { %s15_s20 = sadd.s32 1, %s1184_s20   ;;  %s1380_s18 = smov %s1180_s19 }
 0x126   : > { %p12_p5 = scmp.ge.s32.totalorder %s15_s20, 4   ;;  %s1381_s19 = smov %s1383_s21 }
 0x128   :  { %14 = sbr.rel (!%p12_p5) target bundleno = 2 (0x2), region = 90 }

// kernel: wan_block_forward.22
= control target key start
LH: loop header
LB: loop body
LE: loop exit
PB: predicated region body
PF: predicated region fallthrough
CT: control target
= control target key end

     0   :  { %s1014_s15 = smov 0   ;;  %s1016_s16 = smov 0   ;;  %s1171_s0 = inlined_call_operand.vmem [shape: bf16[2,24,256], index: 0, kind: input, shape index: {}]   ;;  %s1172_s1 = inlined_call_operand.vmem [shape: bf16[256,256], index: 1, kind: input, shape index: {}]   ;;  %s1173_s2 = inlined_call_operand.vmem [shape: f32[1,256], index: 2, kind: input, shape index: {}]   ;;  %s1174_s3 = inlined_call_operand.vmem [shape: f32[1,256], index: 3, kind: input, shape index: {}]   ;;  %s1175_s4 = inlined_call_operand.vmem [shape: bf16[2,24,256], index: 4, kind: output, shape index: {}]  }
   0x1   :  { %s1018_s17 = smov 0  }
   0x2 LB: > { %s33_s18 = sadd.s32 1, %s983_s16  ;;  %p802_p0 = scmp.ge.s32.totalorder %s987_s17, 1  ;;  %s987_s17 = sphi %s1018_s17, %s14_s17   ;;  %s983_s16 = sphi %s1016_s16, %s1177_s16   ;;  %s979_s15 = sphi %s1014_s15, %s1176_s15  }
   0x3   : > { %p35_p1 = scmp.ge.s32.totalorder %s33_s18, 2  ;;  %p210_p2 = scmp.lt.s32.totalorder %s987_s17, 3 }
   0x5   : > { %s1179_s18 = smov (%p35_p1, %s33_s18), 0  ;;  %p211_p3 = pnand %p802_p0, %p210_p2 }
   0x6   : > { %v906_v0 = vld [vmem:[%s1172_s1 + $0x4] ss:$8 sps:$4 sm:$0xff] (!%p211_p3)   ;;  %v908_v1 = vld [vmem:[%s1172_s1] ss:$8 sps:$4 sm:$0xff] (!%p211_p3)   ;;  %v909_v2 = vld [vmem:[%s1172_s1 + $0x14] ss:$8 sps:$4 sm:$0xff] (!%p211_p3)   ;;  %v592_v37 = vlaneseq (!%p211_p3) }
   0x7   : > { %214 = sbr.rel (%p211_p3) target bundleno = 458 (0x1ca), region = 36  ;;  %518 = vmatprep.subr.bf16.mxu0 (!%p211_p3), %v906_v0  ;;  %849 = vmatprep.subr.bf16.mxu1 (!%p211_p3), %v906_v0  ;;  %v911_v3 = vld [vmem:[%s1172_s1 + $0x10] ss:$8 sps:$4 sm:$0xff] (!%p211_p3)   ;;  %v912_v4 = vld [vmem:[%s1172_s1 + $0x24] ss:$8 sps:$4 sm:$0xff] (!%p211_p3)   ;;  %p258_p4 = scmp.lt.s32.totalorder (!%p211_p3), %s979_s15, 1 }
   0x8   : > { %519 = vmatpush1.bf16.msra.mxu0 (!%p211_p3), %v908_v1  ;;  %865 = vmatpush1.bf16.msra.mxu1 (!%p211_p3), %v908_v1  ;;  %v914_v5 = vld [vmem:[%s1172_s1 + $0x20] ss:$8 sps:$4 sm:$0xff] (!%p211_p3)   ;;  %v915_v6 = vld [vmem:[%s1172_s1 + $0x34] ss:$8 sps:$4 sm:$0xff] (!%p211_p3)   ;;  %v917_v7 = vld [vmem:[%s1172_s1 + $0x30] ss:$8 sps:$4 sm:$0xff] (!%p211_p3)  }
   0x9   : > { %520 = vmatprep.subr.bf16.mxu0 (!%p211_p3), %v909_v2  ;;  %850 = vmatprep.subr.bf16.mxu1 (!%p211_p3), %v909_v2  ;;  %v918_v8 = vld [vmem:[%s1172_s1 + $0x44] ss:$8 sps:$4 sm:$0xff] (!%p211_p3)   ;;  %v920_v9 = vld [vmem:[%s1172_s1 + $0x40] ss:$8 sps:$4 sm:$0xff] (!%p211_p3)   ;;  %v921_v10 = vld [vmem:[%s1172_s1 + $0x54] ss:$8 sps:$4 sm:$0xff] (!%p211_p3)  }
   0xa   : > { %v923_v11 = vld [vmem:[%s1172_s1 + $0x50] ss:$8 sps:$4 sm:$0xff] (!%p211_p3)   ;;  %v924_v12 = vld [vmem:[%s1172_s1 + $0x64] ss:$8 sps:$4 sm:$0xff] (!%p211_p3)   ;;  %v926_v15 = vld [vmem:[%s1172_s1 + $0x60] ss:$8 sps:$4 sm:$0xff] (!%p211_p3)  }
   0xb   : > { %v927_v17 = vld [vmem:[%s1172_s1 + $0x74] ss:$8 sps:$4 sm:$0xff] (!%p211_p3)   ;;  %v929_v18 = vld [vmem:[%s1172_s1 + $0x70] ss:$8 sps:$4 sm:$0xff] (!%p211_p3)   ;;  %v930_v19 = vld [vmem:[%s1172_s1 + $0x84] ss:$8 sps:$4 sm:$0xff] (!%p211_p3)  }
   0xc   : > { %521 = vmatpush1.bf16.msra.mxu0 (!%p211_p3), %v911_v3  ;;  %866 = vmatpush1.bf16.msra.mxu1 (!%p211_p3), %v911_v3  ;;  %v932_v20 = vld [vmem:[%s1172_s1 + $0x80] ss:$8 sps:$4 sm:$0xff] (!%p211_p3)   ;;  %v933_v21 = vld [vmem:[%s1172_s1 + $0x94] ss:$8 sps:$4 sm:$0xff] (!%p211_p3)   ;;  %v935_v22 = vld [vmem:[%s1172_s1 + $0x90] ss:$8 sps:$4 sm:$0xff] (!%p211_p3)  }
   0xd   : > { %522 = vmatprep.subr.bf16.mxu0 (!%p211_p3), %v912_v4  ;;  %851 = vmatprep.subr.bf16.mxu1 (!%p211_p3), %v912_v4  ;;  %v936_v23 = vld [vmem:[%s1172_s1 + $0xa4] ss:$8 sps:$4 sm:$0xff] (!%p211_p3)   ;;  %v938_v24 = vld [vmem:[%s1172_s1 + $0xa0] ss:$8 sps:$4 sm:$0xff] (!%p211_p3)   ;;  %v939_v25 = vld [vmem:[%s1172_s1 + $0xb4] ss:$8 sps:$4 sm:$0xff] (!%p211_p3)  }
   0xe   : > { %s1181_s15 = smov (!%p258_p4, %s979_s15), 1  ;;  %v941_v26 = vld [vmem:[%s1172_s1 + $0xb0] ss:$8 sps:$4 sm:$0xff]   ;;  %v942_v27 = vld [vmem:[%s1172_s1 + $0xc4] ss:$8 sps:$4 sm:$0xff]   ;;  %v593_v38 = vshrl.u32 %v592_v37, 7 }
   0xf   : > { %s881_s13 = smul.u32 24, %s1181_s15  ;;  %v944_v28 = vld [vmem:[%s1172_s1 + $0xc0] ss:$8 sps:$4 sm:$0xff]   ;;  %v945_v29 = vld [vmem:[%s1172_s1 + $0xd4] ss:$8 sps:$4 sm:$0xff]  }
  0x10   : > { %523 = vmatpush1.bf16.msra.mxu0 %v914_v5  ;;  %867 = vmatpush1.bf16.msra.mxu1 %v914_v5  ;;  %v947_v30 = vld [vmem:[%s1172_s1 + $0xd0] ss:$8 sps:$4 sm:$0xff]   ;;  %v948_v31 = vld [vmem:[%s1172_s1 + $0xe4] ss:$8 sps:$4 sm:$0xff]   ;;  %v950_v32 = vld [vmem:[%s1172_s1 + $0xe0] ss:$8 sps:$4 sm:$0xff]  }
  0x11   : > { %524 = vmatprep.subr.bf16.mxu0 %v915_v6  ;;  %852 = vmatprep.subr.bf16.mxu1 %v915_v6  ;;  %s1080_s24 = scalar_lea.vmem %s1171_s0, %s881_s13  ;;  %v951_v33 = vld [vmem:[%s1172_s1 + $0xf4] ss:$8 sps:$4 sm:$0xff]   ;;  %v953_v34 = vld [vmem:[%s1172_s1 + $0xf0] ss:$8 sps:$4 sm:$0xff]   ;;  %v594_v39 = vsub.s32 0, %v593_v38  ;;  %v598_v41 = vsub.s32 1, %v593_v38  ;;  %s288_s30 = scalar_lea.vmem %s1175_s4, %s881_s13 }
  0x12   : > { %v956_v13 = vld [vmem:[%s1080_s24 + $0x4] ss:$8 sps:$4 sm:$0xff]   ;;  %v1087_v14 = vld [vmem:[%s1080_s24 + $0x10] sm:$0xff]  ;;  %v954_v35 = vld [vmem:[%s1080_s24] ss:$8 sps:$4 sm:$0xff]  }
  0x13   : > { %v808_v16 = vcombine.high %v1087_v14, %v1087_v14  ;;  %550 = vmatprep.mubr.bf16.mxu0 %v956_v13  ;;  %v807_v36 = vcombine.low %v1087_v14, %v1087_v14  ;;  %v590_v40 = vld [vmem:[%s1173_s2] sm:$0x3] }
  0x14   : > { %525 = vmatpush1.bf16.msra.mxu0 %v917_v7  ;;  %868 = vmatpush1.bf16.msra.mxu1 %v917_v7  ;;  %v595_v42 = vrot.slane %v590_v40, %v594_v39  ;;  %v599_v43 = vrot.slane %v590_v40, %v598_v41 }
  0x15   : > { %526 = vmatprep.subr.bf16.mxu0 %v918_v8  ;;  %853 = vmatprep.subr.bf16.mxu1 %v918_v8 }
  0x16   : > { %560 = vmatprep.mubr.bf16.mxu1 %v808_v16 }
  0x18   : > { %527 = vmatpush1.bf16.msra.mxu0 %v920_v9  ;;  %869 = vmatpush1.bf16.msra.mxu1 %v920_v9 }
  0x19   : > { %528 = vmatprep.subr.bf16.mxu0 %v921_v10  ;;  %854 = vmatprep.subr.bf16.mxu1 %v921_v10 }
  0x1c   : > { %529 = vmatpush1.bf16.msra.mxu0 %v923_v11  ;;  %870 = vmatpush1.bf16.msra.mxu1 %v923_v11 }
  0x1d   : > { %530 = vmatprep.subr.bf16.mxu0 %v924_v12  ;;  %855 = vmatprep.subr.bf16.mxu1 %v924_v12  ;;  %v639_v12 = vld [vmem:[%s1174_s3] sm:$0x3] }
  0x1e   : > { %v644_v13 = vrot.slane %v639_v12, %v594_v39  ;;  %v648_v14 = vrot.slane %v639_v12, %v598_v41 }
  0x20   : > { %531 = vmatpush1.bf16.msra.mxu0 %v926_v15  ;;  %871 = vmatpush1.bf16.msra.mxu1 %v926_v15 }
  0x21   : > { %532 = vmatprep.subr.bf16.mxu0 %v927_v17  ;;  %856 = vmatprep.subr.bf16.mxu1 %v927_v17 }
  0x24   : > { %533 = vmatpush1.bf16.msra.mxu0 %v929_v18  ;;  %872 = vmatpush1.bf16.msra.mxu1 %v929_v18 }
  0x25   : > { %534 = vmatprep.subr.bf16.mxu0 %v930_v19  ;;  %857 = vmatprep.subr.bf16.mxu1 %v930_v19 }
  0x28   : > { %535 = vmatpush1.bf16.msra.mxu0 %v932_v20  ;;  %873 = vmatpush1.bf16.msra.mxu1 %v932_v20 }
  0x29   : > { %536 = vmatprep.subr.bf16.mxu0 %v933_v21  ;;  %858 = vmatprep.subr.bf16.mxu1 %v933_v21 }
  0x2c   : > { %537 = vmatpush1.bf16.msra.mxu0 %v935_v22  ;;  %874 = vmatpush1.bf16.msra.mxu1 %v935_v22 }
  0x2d   : > { %538 = vmatprep.subr.bf16.mxu0 %v936_v23  ;;  %859 = vmatprep.subr.bf16.mxu1 %v936_v23 }
  0x30   : > { %539 = vmatpush1.bf16.msra.mxu0 %v938_v24  ;;  %875 = vmatpush1.bf16.msra.mxu1 %v938_v24 }
  0x31   : > { %540 = vmatprep.subr.bf16.mxu0 %v939_v25  ;;  %860 = vmatprep.subr.bf16.mxu1 %v939_v25 }
  0x34   : > { %541 = vmatpush1.bf16.msra.mxu0 %v941_v26  ;;  %876 = vmatpush1.bf16.msra.mxu1 %v941_v26 }
  0x35   : > { %542 = vmatprep.subr.bf16.mxu0 %v942_v27  ;;  %861 = vmatprep.subr.bf16.mxu1 %v942_v27 }
  0x38   : > { %543 = vmatpush1.bf16.msra.mxu0 %v944_v28  ;;  %877 = vmatpush1.bf16.msra.mxu1 %v944_v28 }
  0x39   : > { %544 = vmatprep.subr.bf16.mxu0 %v945_v29  ;;  %862 = vmatprep.subr.bf16.mxu1 %v945_v29 }
  0x3c   : > { %545 = vmatpush1.bf16.msra.mxu0 %v947_v30  ;;  %878 = vmatpush1.bf16.msra.mxu1 %v947_v30 }
  0x3d   : > { %546 = vmatprep.subr.bf16.mxu0 %v948_v31  ;;  %863 = vmatprep.subr.bf16.mxu1 %v948_v31 }
  0x40   : > { %547 = vmatpush1.bf16.msra.mxu0 %v950_v32  ;;  %879 = vmatpush1.bf16.msra.mxu1 %v950_v32 }
  0x41   : > { %548 = vmatprep.subr.bf16.mxu0 %v951_v33  ;;  %864 = vmatprep.subr.bf16.mxu1 %v951_v33 }
  0x44   : > { %549 = vmatpush1.bf16.msra.mxu0 %v953_v34  ;;  %880 = vmatpush1.bf16.msra.mxu1 %v953_v34 }
  0x47   : > { %551 = vmatmul.mubr.bf16.vlgmr.msra.gmra.mrb[0].mxu0 %v954_v35  ;;  %561 = vmatmul.mubr.bf16.vlgmr.msra.gmra.mrb[0].mxu1 %v807_v36 }
 0x11a   : > { %v552_v44 = vpop.f32.mrb[0].mxu0  ;;  %v562_v45 = vpop.f32.mrb[0].mxu1 }
 0x11b   : > { %v602_v46 = vadd.f32 %v595_v42, %v552_v44  ;;  %v606_v47 = vadd.f32 %v595_v42, %v562_v45  ;;  %v554_v48 = vpop.f32.mrb[1].mxu0  ;;  %v564_v49 = vpop.f32.mrb[1].mxu1 }
 0x11c   : > { %v603_v50 = vadd.f32 %v599_v43, %v554_v48  ;;  %v607_v51 = vadd.f32 %v599_v43, %v564_v49  ;;  %v556_v52 = vpop.f32.mrb[2].mxu0  ;;  %v566_v53 = vpop.f32.mrb[2].mxu1 }
 0x11d   : > { %v604_v54 = vadd.f32 %v595_v42, %v556_v52  ;;  %v558_v55 = vpop.f32.mrb[3].mxu0  ;;  %v567_v56 = vpop.f32.mrb[3].mxu1  ;;  %v612_v57 = vmul.f32 %v606_v47, %v606_v47  ;;  %v608_v58 = vmul.f32 %v602_v46, %v602_v46 }
 0x11e   : > { %v605_v59 = vadd.f32 %v599_v43, %v558_v55  ;;  %v613_v60 = vmul.f32 %v607_v51, %v607_v51  ;;  %v609_v61 = vmul.f32 %v603_v50, %v603_v50 }
 0x11f   : > { %v610_v62 = vmul.f32 %v604_v54, %v604_v54 }
 0x120   : > { %v611_v63 = vmul.f32 %v605_v59, %v605_v59  ;;  %v620_v0 = vadd.f32 %v613_v60, %v612_v57  ;;  %v614_v1 = vadd.f32 %v609_v61, %v608_v58 }
 0x122   : > { %621 = vadd.xlane.f32.xlu1 %v620_v0  ;;  %615 = vadd.xlane.f32.xlu0 %v614_v1  ;;  %v617_v2 = vadd.f32 %v611_v63, %v610_v62 }
 0x126   : > { %618 = vadd.xlane.f32.xlu0 %v617_v2 }
 0x1af   : > { %v622_v3 = vpop.xlane.xlu1 %621  ;;  %v616_v4 = vpop.xlane.xlu0 %615 }
 0x1b0   : > { %v626_v5 = vmul.f32 0.00390625, %v622_v3  ;;  %v624_v6 = vmul.f32 0.00390625, %v616_v4 }
 0x1b2   : > { %v629_v7 = vadd.f32 1e-06, %v626_v5  ;;  %v627_v8 = vadd.f32 1e-06, %v624_v6 }
 0x1b3   : > { %v619_v9 = vpop.xlane.xlu0 %618 }
 0x1b4   : > { %959 = vrsqrt.f32 %v629_v7  ;;  %v625_v10 = vmul.f32 0.00390625, %v619_v9 }
 0x1b5   : > { %961 = vrsqrt.f32 %v627_v8 }
 0x1b6   : > { %v628_v11 = vadd.f32 1e-06, %v625_v10 }
 0x1b8   : > { %963 = vrsqrt.f32 %v628_v11 }
 0x1be   : > { %v960_v15 = vpop.eup %959 }
 0x1bf   : > { %v962_v16 = vpop.eup %961  ;;  %v637_v17 = vmul.f32 %v960_v15, %v606_v47  ;;  %v638_v18 = vmul.f32 %v960_v15, %v607_v51 }
 0x1c0   : > { %v633_v19 = vmul.f32 %v962_v16, %v602_v46  ;;  %v634_v20 = vmul.f32 %v962_v16, %v603_v50 }
 0x1c1   : > { %v655_v21 = vmul.f32 %v644_v13, %v637_v17  ;;  %v656_v22 = vmul.f32 %v648_v14, %v638_v18 }
 0x1c2   : > { %v964_v23 = vpop.eup %963  ;;  %v651_v24 = vmul.f32 %v644_v13, %v633_v19  ;;  %v652_v25 = vmul.f32 %v648_v14, %v634_v20 }
 0x1c3   : > { %v848_v26 = vpack.c.bf16 %v656_v22, %v655_v21  ;;  %v635_v27 = vmul.f32 %v964_v23, %v604_v54  ;;  %v636_v28 = vmul.f32 %v964_v23, %v605_v59 }
 0x1c4   : > { %v846_v29 = vpack.c.bf16 %v652_v25, %v651_v24 }
 0x1c5   : > { %679 = vst [vmem:[%s288_s30 + $0x10] sm:$0xff] %v848_v26  ;;  %v653_v30 = vmul.f32 %v644_v13, %v635_v27  ;;  %v654_v31 = vmul.f32 %v648_v14, %v636_v28 }
 0x1c6   : > { %677 = vst [vmem:[%s288_s30] sm:$0xff] %v846_v29 }
 0x1c7   : > { %v847_v32 = vpack.c.bf16 %v654_v31, %v653_v30 }
 0x1c9   : > { %678 = vst [vmem:[%s288_s30 + $0x8] sm:$0xff] %v847_v32 }
 0x1ca PF: > { %s14_s17 = sadd.s32 1, %s987_s17   ;;  %s1176_s15 = smov %s983_s16 }
 0x1cb   : > { %p11_p5 = scmp.ge.s32.totalorder %s14_s17, 4   ;;  %s1177_s16 = smov %s1179_s18 }
 0x1cd   :  { %13 = sbr.rel (!%p11_p5) target bundleno = 2 (0x2), region = 77 }

// kernel: wan_block_forward.24
= control target key start
LH: loop header
LB: loop body
LE: loop exit
PB: predicated region body
PF: predicated region fallthrough
CT: control target
= control target key end

     0   :  { %s855_s12 = smov 0   ;;  %s857_s13 = smov 0   ;;  %s998_s0 = inlined_call_operand.vmem [shape: bf16[2,16,256], index: 0, kind: input, shape index: {}]   ;;  %s999_s1 = inlined_call_operand.vmem [shape: bf16[256,256], index: 1, kind: input, shape index: {}]   ;;  %s1000_s2 = inlined_call_operand.vmem [shape: f32[1,256], index: 2, kind: input, shape index: {}]   ;;  %s1001_s3 = inlined_call_operand.vmem [shape: bf16[2,16,256], index: 3, kind: output, shape index: {}]  }
   0x1   :  { %s859_s14 = smov 0  }
   0x2 LB: > { %s32_s15 = sadd.s32 1, %s829_s13  ;;  %p689_p0 = scmp.ge.s32.totalorder %s833_s14, 1  ;;  %s833_s14 = sphi %s859_s14, %s13_s14   ;;  %s829_s13 = sphi %s857_s13, %s1003_s13   ;;  %s825_s12 = sphi %s855_s12, %s1002_s12  }
   0x3   : > { %p34_p1 = scmp.ge.s32.totalorder %s32_s15, 2  ;;  %p185_p2 = scmp.lt.s32.totalorder %s833_s14, 3 }
   0x5   : > { %s1005_s15 = smov (%p34_p1, %s32_s15), 0  ;;  %p186_p3 = pnand %p689_p0, %p185_p2 }
   0x6   : > { %v760_v0 = vld [vmem:[%s999_s1 + $0x4] ss:$8 sps:$4 sm:$0xff] (!%p186_p3)   ;;  %v762_v1 = vld [vmem:[%s999_s1] ss:$8 sps:$4 sm:$0xff] (!%p186_p3)   ;;  %v763_v2 = vld [vmem:[%s999_s1 + $0x14] ss:$8 sps:$4 sm:$0xff] (!%p186_p3)   ;;  %v539_v34 = vlaneseq (!%p186_p3) }
   0x7   : > { %189 = sbr.rel (%p186_p3) target bundleno = 291 (0x123), region = 32  ;;  %479 = vmatprep.subr.bf16.mxu0 (!%p186_p3), %v760_v0  ;;  %v765_v3 = vld [vmem:[%s999_s1 + $0x10] ss:$8 sps:$4 sm:$0xff] (!%p186_p3)   ;;  %v766_v4 = vld [vmem:[%s999_s1 + $0x24] ss:$8 sps:$4 sm:$0xff] (!%p186_p3)   ;;  %p231_p4 = scmp.lt.s32.totalorder (!%p186_p3), %s825_s12, 1 }
   0x8   : > { %480 = vmatpush1.bf16.msra.mxu0 (!%p186_p3), %v762_v1  ;;  %v768_v5 = vld [vmem:[%s999_s1 + $0x20] ss:$8 sps:$4 sm:$0xff] (!%p186_p3)   ;;  %v769_v6 = vld [vmem:[%s999_s1 + $0x34] ss:$8 sps:$4 sm:$0xff] (!%p186_p3)   ;;  %v771_v7 = vld [vmem:[%s999_s1 + $0x30] ss:$8 sps:$4 sm:$0xff] (!%p186_p3)  }
   0x9   : > { %481 = vmatprep.subr.bf16.mxu0 (!%p186_p3), %v763_v2  ;;  %v772_v8 = vld [vmem:[%s999_s1 + $0x44] ss:$8 sps:$4 sm:$0xff] (!%p186_p3)   ;;  %v774_v9 = vld [vmem:[%s999_s1 + $0x40] ss:$8 sps:$4 sm:$0xff] (!%p186_p3)   ;;  %v775_v10 = vld [vmem:[%s999_s1 + $0x54] ss:$8 sps:$4 sm:$0xff] (!%p186_p3)  }
   0xa   : > { %v777_v11 = vld [vmem:[%s999_s1 + $0x50] ss:$8 sps:$4 sm:$0xff] (!%p186_p3)   ;;  %v778_v12 = vld [vmem:[%s999_s1 + $0x64] ss:$8 sps:$4 sm:$0xff] (!%p186_p3)   ;;  %v780_v14 = vld [vmem:[%s999_s1 + $0x60] ss:$8 sps:$4 sm:$0xff] (!%p186_p3)  }
   0xb   : > { %v781_v15 = vld [vmem:[%s999_s1 + $0x74] ss:$8 sps:$4 sm:$0xff] (!%p186_p3)   ;;  %v783_v16 = vld [vmem:[%s999_s1 + $0x70] ss:$8 sps:$4 sm:$0xff] (!%p186_p3)   ;;  %v784_v17 = vld [vmem:[%s999_s1 + $0x84] ss:$8 sps:$4 sm:$0xff] (!%p186_p3)  }
   0xc   : > { %482 = vmatpush1.bf16.msra.mxu0 (!%p186_p3), %v765_v3  ;;  %v786_v18 = vld [vmem:[%s999_s1 + $0x80] ss:$8 sps:$4 sm:$0xff] (!%p186_p3)   ;;  %v787_v19 = vld [vmem:[%s999_s1 + $0x94] ss:$8 sps:$4 sm:$0xff] (!%p186_p3)   ;;  %v789_v20 = vld [vmem:[%s999_s1 + $0x90] ss:$8 sps:$4 sm:$0xff] (!%p186_p3)  }
   0xd   : > { %483 = vmatprep.subr.bf16.mxu0 (!%p186_p3), %v766_v4  ;;  %v790_v21 = vld [vmem:[%s999_s1 + $0xa4] ss:$8 sps:$4 sm:$0xff] (!%p186_p3)   ;;  %v792_v22 = vld [vmem:[%s999_s1 + $0xa0] ss:$8 sps:$4 sm:$0xff] (!%p186_p3)   ;;  %v793_v23 = vld [vmem:[%s999_s1 + $0xb4] ss:$8 sps:$4 sm:$0xff] (!%p186_p3)  }
   0xe   : > { %s1007_s12 = smov (!%p231_p4, %s825_s12), 1  ;;  %v795_v24 = vld [vmem:[%s999_s1 + $0xb0] ss:$8 sps:$4 sm:$0xff]   ;;  %v796_v25 = vld [vmem:[%s999_s1 + $0xc4] ss:$8 sps:$4 sm:$0xff]   ;;  %v540_v35 = vshrl.u32 %v539_v34, 7 }
   0xf   : > { %s732_s11 = sshll.u32 %s1007_s12, 4  ;;  %v798_v26 = vld [vmem:[%s999_s1 + $0xc0] ss:$8 sps:$4 sm:$0xff]   ;;  %v799_v27 = vld [vmem:[%s999_s1 + $0xd4] ss:$8 sps:$4 sm:$0xff]  }
  0x10   : > { %484 = vmatpush1.bf16.msra.mxu0 %v768_v5  ;;  %s917_s20 = scalar_lea.vmem %s998_s0, %s732_s11  ;;  %v801_v28 = vld [vmem:[%s999_s1 + $0xd0] ss:$8 sps:$4 sm:$0xff]   ;;  %v802_v29 = vld [vmem:[%s999_s1 + $0xe4] ss:$8 sps:$4 sm:$0xff]   ;;  %v804_v30 = vld [vmem:[%s999_s1 + $0xe0] ss:$8 sps:$4 sm:$0xff]   ;;  %s261_s22 = scalar_lea.vmem %s1001_s3, %s732_s11 }
  0x11   : > { %485 = vmatprep.subr.bf16.mxu0 %v769_v6  ;;  %v810_v13 = vld [vmem:[%s917_s20 + $0x4] ss:$8 sps:$4 sm:$0xff]   ;;  %v805_v31 = vld [vmem:[%s999_s1 + $0xf4] ss:$8 sps:$4 sm:$0xff]   ;;  %v807_v32 = vld [vmem:[%s999_s1 + $0xf0] ss:$8 sps:$4 sm:$0xff]  }
  0x12   : > { %511 = vmatprep.mubr.bf16.mxu0 %v810_v13  ;;  %v808_v33 = vld [vmem:[%s917_s20] ss:$8 sps:$4 sm:$0xff]   ;;  %v541_v36 = vsub.s32 0, %v540_v35  ;;  %v545_v38 = vsub.s32 1, %v540_v35 }
  0x13   : > { %v537_v37 = vld [vmem:[%s1000_s2] sm:$0x3] }
  0x14   : > { %486 = vmatpush1.bf16.msra.mxu0 %v771_v7  ;;  %v542_v39 = vrot.slane %v537_v37, %v541_v36  ;;  %v546_v40 = vrot.slane %v537_v37, %v545_v38 }
  0x15   : > { %487 = vmatprep.subr.bf16.mxu0 %v772_v8 }
  0x18   : > { %488 = vmatpush1.bf16.msra.mxu0 %v774_v9 }
  0x19   : > { %489 = vmatprep.subr.bf16.mxu0 %v775_v10 }
  0x1c   : > { %490 = vmatpush1.bf16.msra.mxu0 %v777_v11 }
  0x1d   : > { %491 = vmatprep.subr.bf16.mxu0 %v778_v12 }
  0x20   : > { %492 = vmatpush1.bf16.msra.mxu0 %v780_v14 }
  0x21   : > { %493 = vmatprep.subr.bf16.mxu0 %v781_v15 }
  0x24   : > { %494 = vmatpush1.bf16.msra.mxu0 %v783_v16 }
  0x25   : > { %495 = vmatprep.subr.bf16.mxu0 %v784_v17 }
  0x28   : > { %496 = vmatpush1.bf16.msra.mxu0 %v786_v18 }
  0x29   : > { %497 = vmatprep.subr.bf16.mxu0 %v787_v19 }
  0x2c   : > { %498 = vmatpush1.bf16.msra.mxu0 %v789_v20 }
  0x2d   : > { %499 = vmatprep.subr.bf16.mxu0 %v790_v21 }
  0x30   : > { %500 = vmatpush1.bf16.msra.mxu0 %v792_v22 }
  0x31   : > { %501 = vmatprep.subr.bf16.mxu0 %v793_v23 }
  0x34   : > { %502 = vmatpush1.bf16.msra.mxu0 %v795_v24 }
  0x35   : > { %503 = vmatprep.subr.bf16.mxu0 %v796_v25 }
  0x38   : > { %504 = vmatpush1.bf16.msra.mxu0 %v798_v26 }
  0x39   : > { %505 = vmatprep.subr.bf16.mxu0 %v799_v27 }
  0x3c   : > { %506 = vmatpush1.bf16.msra.mxu0 %v801_v28 }
  0x3d   : > { %507 = vmatprep.subr.bf16.mxu0 %v802_v29 }
  0x40   : > { %508 = vmatpush1.bf16.msra.mxu0 %v804_v30 }
  0x41   : > { %509 = vmatprep.subr.bf16.mxu0 %v805_v31 }
  0x44   : > { %510 = vmatpush1.bf16.msra.mxu0 %v807_v32 }
  0x47   : > { %512 = vmatmul.mubr.bf16.vlgmr.msra.gmra.mrb[0].mxu0 %v808_v33 }
 0x11a   : > { %v513_v41 = vpop.f32.mrb[0].mxu0 }
 0x11b   : > { %v549_v42 = vadd.f32 %v542_v39, %v513_v41  ;;  %v515_v43 = vpop.f32.mrb[1].mxu0 }
 0x11c   : > { %v550_v44 = vadd.f32 %v546_v40, %v515_v43  ;;  %v517_v45 = vpop.f32.mrb[2].mxu0 }
 0x11d   : > { %v551_v46 = vadd.f32 %v542_v39, %v517_v45  ;;  %v519_v47 = vpop.f32.mrb[3].mxu0 }
 0x11e   : > { %v734_v48 = vpack.c.bf16 %v550_v44, %v549_v42  ;;  %v552_v49 = vadd.f32 %v546_v40, %v519_v47 }
 0x120   : > { %565 = vst [vmem:[%s261_s22] sm:$0xff] %v734_v48  ;;  %v735_v50 = vpack.c.bf16 %v552_v49, %v551_v46 }
 0x122   : > { %566 = vst [vmem:[%s261_s22 + $0x8] sm:$0xff] %v735_v50 }
 0x123 PF: > { %s13_s14 = sadd.s32 1, %s833_s14   ;;  %s1002_s12 = smov %s829_s13 }
 0x124   : > { %p10_p5 = scmp.ge.s32.totalorder %s13_s14, 4   ;;  %s1003_s13 = smov %s1005_s15 }
 0x126   :  { %12 = sbr.rel (!%p10_p5) target bundleno = 2 (0x2), region = 73 }

// kernel: wan_block_forward.23
= control target key start
LH: loop header
LB: loop body
LE: loop exit
PB: predicated region body
PF: predicated region fallthrough
CT: control target
= control target key end

     0   :  { %s928_s15 = smov 0   ;;  %s930_s16 = smov 0   ;;  %s1074_s0 = inlined_call_operand.vmem [shape: bf16[2,16,256], index: 0, kind: input, shape index: {}]   ;;  %s1075_s1 = inlined_call_operand.vmem [shape: bf16[256,256], index: 1, kind: input, shape index: {}]   ;;  %s1076_s2 = inlined_call_operand.vmem [shape: f32[1,256], index: 2, kind: input, shape index: {}]   ;;  %s1077_s3 = inlined_call_operand.vmem [shape: f32[1,256], index: 3, kind: input, shape index: {}]   ;;  %s1078_s4 = inlined_call_operand.vmem [shape: bf16[2,16,256], index: 4, kind: output, shape index: {}]  }
   0x1   :  { %s932_s17 = smov 0  }
   0x2 LB: > { %s33_s18 = sadd.s32 1, %s897_s16  ;;  %p753_p0 = scmp.ge.s32.totalorder %s901_s17, 1  ;;  %s901_s17 = sphi %s932_s17, %s14_s17   ;;  %s897_s16 = sphi %s930_s16, %s1080_s16   ;;  %s893_s15 = sphi %s928_s15, %s1079_s15  }
   0x3   : > { %p35_p1 = scmp.ge.s32.totalorder %s33_s18, 2  ;;  %p210_p2 = scmp.lt.s32.totalorder %s901_s17, 3 }
   0x5   : > { %s1082_s18 = smov (%p35_p1, %s33_s18), 0  ;;  %p211_p3 = pnand %p753_p0, %p210_p2 }
   0x6   : > { %v824_v0 = vld [vmem:[%s1075_s1 + $0x4] ss:$8 sps:$4 sm:$0xff] (!%p211_p3)   ;;  %v826_v1 = vld [vmem:[%s1075_s1] ss:$8 sps:$4 sm:$0xff] (!%p211_p3)   ;;  %v827_v2 = vld [vmem:[%s1075_s1 + $0x14] ss:$8 sps:$4 sm:$0xff] (!%p211_p3)   ;;  %v566_v34 = vlaneseq (!%p211_p3) }
   0x7   : > { %214 = sbr.rel (%p211_p3) target bundleno = 458 (0x1ca), region = 36  ;;  %506 = vmatprep.subr.bf16.mxu0 (!%p211_p3), %v824_v0  ;;  %v829_v3 = vld [vmem:[%s1075_s1 + $0x10] ss:$8 sps:$4 sm:$0xff] (!%p211_p3)   ;;  %v830_v4 = vld [vmem:[%s1075_s1 + $0x24] ss:$8 sps:$4 sm:$0xff] (!%p211_p3)   ;;  %p258_p4 = scmp.lt.s32.totalorder (!%p211_p3), %s893_s15, 1 }
   0x8   : > { %507 = vmatpush1.bf16.msra.mxu0 (!%p211_p3), %v826_v1  ;;  %v832_v5 = vld [vmem:[%s1075_s1 + $0x20] ss:$8 sps:$4 sm:$0xff] (!%p211_p3)   ;;  %v833_v6 = vld [vmem:[%s1075_s1 + $0x34] ss:$8 sps:$4 sm:$0xff] (!%p211_p3)   ;;  %v835_v7 = vld [vmem:[%s1075_s1 + $0x30] ss:$8 sps:$4 sm:$0xff] (!%p211_p3)  }
   0x9   : > { %508 = vmatprep.subr.bf16.mxu0 (!%p211_p3), %v827_v2  ;;  %v836_v8 = vld [vmem:[%s1075_s1 + $0x44] ss:$8 sps:$4 sm:$0xff] (!%p211_p3)   ;;  %v838_v9 = vld [vmem:[%s1075_s1 + $0x40] ss:$8 sps:$4 sm:$0xff] (!%p211_p3)   ;;  %v839_v10 = vld [vmem:[%s1075_s1 + $0x54] ss:$8 sps:$4 sm:$0xff] (!%p211_p3)  }
   0xa   : > { %v841_v11 = vld [vmem:[%s1075_s1 + $0x50] ss:$8 sps:$4 sm:$0xff] (!%p211_p3)   ;;  %v842_v12 = vld [vmem:[%s1075_s1 + $0x64] ss:$8 sps:$4 sm:$0xff] (!%p211_p3)   ;;  %v844_v14 = vld [vmem:[%s1075_s1 + $0x60] ss:$8 sps:$4 sm:$0xff] (!%p211_p3)  }
   0xb   : > { %v845_v15 = vld [vmem:[%s1075_s1 + $0x74] ss:$8 sps:$4 sm:$0xff] (!%p211_p3)   ;;  %v847_v16 = vld [vmem:[%s1075_s1 + $0x70] ss:$8 sps:$4 sm:$0xff] (!%p211_p3)   ;;  %v848_v17 = vld [vmem:[%s1075_s1 + $0x84] ss:$8 sps:$4 sm:$0xff] (!%p211_p3)  }
   0xc   : > { %509 = vmatpush1.bf16.msra.mxu0 (!%p211_p3), %v829_v3  ;;  %v850_v18 = vld [vmem:[%s1075_s1 + $0x80] ss:$8 sps:$4 sm:$0xff] (!%p211_p3)   ;;  %v851_v19 = vld [vmem:[%s1075_s1 + $0x94] ss:$8 sps:$4 sm:$0xff] (!%p211_p3)   ;;  %v853_v20 = vld [vmem:[%s1075_s1 + $0x90] ss:$8 sps:$4 sm:$0xff] (!%p211_p3)  }
   0xd   : > { %510 = vmatprep.subr.bf16.mxu0 (!%p211_p3), %v830_v4  ;;  %v854_v21 = vld [vmem:[%s1075_s1 + $0xa4] ss:$8 sps:$4 sm:$0xff] (!%p211_p3)   ;;  %v856_v22 = vld [vmem:[%s1075_s1 + $0xa0] ss:$8 sps:$4 sm:$0xff] (!%p211_p3)   ;;  %v857_v23 = vld [vmem:[%s1075_s1 + $0xb4] ss:$8 sps:$4 sm:$0xff] (!%p211_p3)  }
   0xe   : > { %s1084_s15 = smov (!%p258_p4, %s893_s15), 1  ;;  %v859_v24 = vld [vmem:[%s1075_s1 + $0xb0] ss:$8 sps:$4 sm:$0xff]   ;;  %v860_v25 = vld [vmem:[%s1075_s1 + $0xc4] ss:$8 sps:$4 sm:$0xff]   ;;  %v567_v35 = vshrl.u32 %v566_v34, 7 }
   0xf   : > { %s796_s19 = sshll.u32 %s1084_s15, 4  ;;  %v862_v26 = vld [vmem:[%s1075_s1 + $0xc0] ss:$8 sps:$4 sm:$0xff]   ;;  %v863_v27 = vld [vmem:[%s1075_s1 + $0xd4] ss:$8 sps:$4 sm:$0xff]  }
  0x10   : > { %511 = vmatpush1.bf16.msra.mxu0 %v832_v5  ;;  %s990_s24 = scalar_lea.vmem %s1074_s0, %s796_s19  ;;  %v865_v28 = vld [vmem:[%s1075_s1 + $0xd0] ss:$8 sps:$4 sm:$0xff]   ;;  %v866_v29 = vld [vmem:[%s1075_s1 + $0xe4] ss:$8 sps:$4 sm:$0xff]   ;;  %v868_v30 = vld [vmem:[%s1075_s1 + $0xe0] ss:$8 sps:$4 sm:$0xff]   ;;  %s288_s30 = scalar_lea.vmem %s1078_s4, %s796_s19 }
  0x11   : > { %512 = vmatprep.subr.bf16.mxu0 %v833_v6  ;;  %v874_v13 = vld [vmem:[%s990_s24 + $0x4] ss:$8 sps:$4 sm:$0xff]   ;;  %v869_v31 = vld [vmem:[%s1075_s1 + $0xf4] ss:$8 sps:$4 sm:$0xff]   ;;  %v871_v32 = vld [vmem:[%s1075_s1 + $0xf0] ss:$8 sps:$4 sm:$0xff]  }
  0x12   : > { %538 = vmatprep.mubr.bf16.mxu0 %v874_v13  ;;  %v872_v33 = vld [vmem:[%s990_s24] ss:$8 sps:$4 sm:$0xff]   ;;  %v568_v36 = vsub.s32 0, %v567_v35  ;;  %v572_v38 = vsub.s32 1, %v567_v35 }
  0x13   : > { %v564_v37 = vld [vmem:[%s1076_s2] sm:$0x3] }
  0x14   : > { %513 = vmatpush1.bf16.msra.mxu0 %v835_v7  ;;  %v569_v39 = vrot.slane %v564_v37, %v568_v36  ;;  %v573_v40 = vrot.slane %v564_v37, %v572_v38  ;;  %v601_v61 = vld [vmem:[%s1077_s3] sm:$0x3] }
  0x15   : > { %514 = vmatprep.subr.bf16.mxu0 %v836_v8  ;;  %v606_v62 = vrot.slane %v601_v61, %v568_v36  ;;  %v610_v63 = vrot.slane %v601_v61, %v572_v38 }
  0x18   : > { %515 = vmatpush1.bf16.msra.mxu0 %v838_v9 }
  0x19   : > { %516 = vmatprep.subr.bf16.mxu0 %v839_v10 }
  0x1c   : > { %517 = vmatpush1.bf16.msra.mxu0 %v841_v11 }
  0x1d   : > { %518 = vmatprep.subr.bf16.mxu0 %v842_v12 }
  0x20   : > { %519 = vmatpush1.bf16.msra.mxu0 %v844_v14 }
  0x21   : > { %520 = vmatprep.subr.bf16.mxu0 %v845_v15 }
  0x24   : > { %521 = vmatpush1.bf16.msra.mxu0 %v847_v16 }
  0x25   : > { %522 = vmatprep.subr.bf16.mxu0 %v848_v17 }
  0x28   : > { %523 = vmatpush1.bf16.msra.mxu0 %v850_v18 }
  0x29   : > { %524 = vmatprep.subr.bf16.mxu0 %v851_v19 }
  0x2c   : > { %525 = vmatpush1.bf16.msra.mxu0 %v853_v20 }
  0x2d   : > { %526 = vmatprep.subr.bf16.mxu0 %v854_v21 }
  0x30   : > { %527 = vmatpush1.bf16.msra.mxu0 %v856_v22 }
  0x31   : > { %528 = vmatprep.subr.bf16.mxu0 %v857_v23 }
  0x34   : > { %529 = vmatpush1.bf16.msra.mxu0 %v859_v24 }
  0x35   : > { %530 = vmatprep.subr.bf16.mxu0 %v860_v25 }
  0x38   : > { %531 = vmatpush1.bf16.msra.mxu0 %v862_v26 }
  0x39   : > { %532 = vmatprep.subr.bf16.mxu0 %v863_v27 }
  0x3c   : > { %533 = vmatpush1.bf16.msra.mxu0 %v865_v28 }
  0x3d   : > { %534 = vmatprep.subr.bf16.mxu0 %v866_v29 }
  0x40   : > { %535 = vmatpush1.bf16.msra.mxu0 %v868_v30 }
  0x41   : > { %536 = vmatprep.subr.bf16.mxu0 %v869_v31 }
  0x44   : > { %537 = vmatpush1.bf16.msra.mxu0 %v871_v32 }
  0x47   : > { %539 = vmatmul.mubr.bf16.vlgmr.msra.gmra.mrb[0].mxu0 %v872_v33 }
 0x11a   : > { %v540_v41 = vpop.f32.mrb[0].mxu0 }
 0x11b   : > { %v576_v42 = vadd.f32 %v569_v39, %v540_v41  ;;  %v542_v43 = vpop.f32.mrb[1].mxu0 }
 0x11c   : > { %v577_v44 = vadd.f32 %v573_v40, %v542_v43  ;;  %v544_v45 = vpop.f32.mrb[2].mxu0 }
 0x11d   : > { %v578_v46 = vadd.f32 %v569_v39, %v544_v45  ;;  %v546_v47 = vpop.f32.mrb[3].mxu0  ;;  %v580_v48 = vmul.f32 %v576_v42, %v576_v42 }
 0x11e   : > { %v579_v49 = vadd.f32 %v573_v40, %v546_v47  ;;  %v581_v50 = vmul.f32 %v577_v44, %v577_v44 }
 0x11f   : > { %v582_v51 = vmul.f32 %v578_v46, %v578_v46 }
 0x120   : > { %v583_v52 = vmul.f32 %v579_v49, %v579_v49  ;;  %v584_v53 = vadd.f32 %v581_v50, %v580_v48 }
 0x122   : > { %585 = vadd.xlane.f32.xlu0 %v584_v53  ;;  %v587_v54 = vadd.f32 %v583_v52, %v582_v51 }
 0x126   : > { %588 = vadd.xlane.f32.xlu0 %v587_v54 }
 0x1af   : > { %v586_v55 = vpop.xlane.xlu0 %585 }
 0x1b0   : > { %v591_v56 = vmul.f32 0.00390625, %v586_v55 }
 0x1b2   : > { %v593_v57 = vadd.f32 1e-06, %v591_v56 }
 0x1b3   : > { %v589_v58 = vpop.xlane.xlu0 %588 }
 0x1b4   : > { %875 = vrsqrt.f32 %v593_v57  ;;  %v592_v59 = vmul.f32 0.00390625, %v589_v58 }
 0x1b6   : > { %v594_v60 = vadd.f32 1e-06, %v592_v59 }
 0x1b8   : > { %877 = vrsqrt.f32 %v594_v60 }
 0x1be   : > { %v876_v0 = vpop.eup %875 }
 0x1bf   : > { %v597_v1 = vmul.f32 %v876_v0, %v576_v42  ;;  %v598_v2 = vmul.f32 %v876_v0, %v577_v44 }
 0x1c1   : > { %v613_v3 = vmul.f32 %v606_v62, %v597_v1  ;;  %v614_v4 = vmul.f32 %v610_v63, %v598_v2 }
 0x1c2   : > { %v878_v5 = vpop.eup %877 }
 0x1c3   : > { %v798_v6 = vpack.c.bf16 %v614_v4, %v613_v3  ;;  %v599_v7 = vmul.f32 %v878_v5, %v578_v46  ;;  %v600_v8 = vmul.f32 %v878_v5, %v579_v49 }
 0x1c5   : > { %629 = vst [vmem:[%s288_s30] sm:$0xff] %v798_v6  ;;  %v615_v9 = vmul.f32 %v606_v62, %v599_v7  ;;  %v616_v10 = vmul.f32 %v610_v63, %v600_v8 }
 0x1c7   : > { %v799_v11 = vpack.c.bf16 %v616_v10, %v615_v9 }
 0x1c9   : > { %630 = vst [vmem:[%s288_s30 + $0x8] sm:$0xff] %v799_v11 }
 0x1ca PF: > { %s14_s17 = sadd.s32 1, %s901_s17   ;;  %s1079_s15 = smov %s897_s16 }
 0x1cb   : > { %p11_p5 = scmp.ge.s32.totalorder %s14_s17, 4   ;;  %s1080_s16 = smov %s1082_s18 }
 0x1cd   :  { %13 = sbr.rel (!%p11_p5) target bundleno = 2 (0x2), region = 77 }

// kernel: wan_block_forward.25
= control target key start
LH: loop header
LB: loop body
LE: loop exit
PB: predicated region body
PF: predicated region fallthrough
CT: control target
= control target key end

     0   :  { %s1319_s0 = inlined_call_operand.vmem [shape: s32[2], index: 0, kind: input, shape index: {}]   ;;  %s1320_s1 = inlined_call_operand.vmem [shape: bf16[2,24,256], index: 1, kind: input, shape index: {}]   ;;  %s1321_s2 = inlined_call_operand.vmem [shape: bf16[2,16,256], index: 2, kind: input, shape index: {}]   ;;  %s1322_s3 = inlined_call_operand.vmem [shape: bf16[2,16,256], index: 3, kind: input, shape index: {}]   ;;  %s1323_s4 = inlined_call_operand.vmem [shape: bf16[2,24,256], index: 4, kind: output, shape index: {}]  }
   0x1   :  { %s9_s17 = sshll.u32 %s1319_s0, 4  ;;  %s10_s17 = int_to_ptr.vmem [resolvable:$true] %s9_s17 }
   0x2   :  { %s1054_s18 = scalar_lea.vmem %s10_s17, 16  ;;  %p1059_p1 = scmp.lt.s32.totalorder %s10_s17, %s10_s17 }
   0x3   :  { %p1055_p0 = scmp.ne.s32.totalorder %s10_s17, %s1054_s18  ;;  %p1060_p2 = scmp.lt.s32.totalorder %s1054_s18, %s1054_s18 }
   0x5   :  { %p1061_p3 = por %p1060_p2, %p1059_p1 }
   0x7   :  { %p1062_p4 = pnand %p1061_p3, %p1055_p0 }
   0x9   :  { %1065 = shalt.err (!%p1062_p4)  }
   0xa   :  { %s1124_s19 = smov [#allocation6]  }
   0xb   :  { %12 = dma.vmem_to_smem %s10_s17, 16, %s1124_s19, [#allocation5] }
   0xc   :  { %1094 = dma.done.wait [#allocation5], 16 }
   0xd   :  { %1095 = vsyncadd [#allocation5], 4294967280 }
   0xe   :  { %14 = sfence }
   0xf   :  { %s1156_s20 = smov 0   ;;  %s1158_s21 = smov 0  }
  0x10   :  { %s1160_s22 = smov 0   ;;  %s1162_s0 = smov 0  }
  0x11   :  { %s1164_s23 = smov 0   ;;  %s1166_s24 = smov 0  }
  0x12   :  { %s1168_s25 = smov 0  }
  0x13 LB: > { %s42_s26 = sadd.s32 1, %s1114_s23  ;;  %s46_s27 = sadd.s32 1, %s1118_s24  ;;  %s1122_s25 = sphi %s1168_s25, %s20_s25   ;;  %s1118_s24 = sphi %s1166_s24, %s1333_s24   ;;  %s1114_s23 = sphi %s1164_s23, %s1332_s23   ;;  %s1110_s0 = sphi %s1162_s0, %s1331_s0   ;;  %s1106_s22 = sphi %s1160_s22, %s1330_s22   ;;  %s1102_s21 = sphi %s1158_s21, %s1329_s21   ;;  %s1098_s20 = sphi %s1156_s20, %s1328_s20  }
  0x14   : > { %p44_p5 = scmp.ge.s32.totalorder %s42_s26, 2  ;;  %s914_s28 = sadd.s32 4294967295, %s1122_s25  }
  0x15   : > { %p64_p6 = scmp.ne.s32.totalorder %s1102_s21, %s1098_s20  ;;  %p65_p7 = scmp.eq.s32.totalorder %s1122_s25, 0 }
  0x16   : > { %s1335_s26 = smov (%p44_p5, %s42_s26), 0  ;;  %s1337_s27 = smov (!%p44_p5, %s46_s27), %s1118_s24 }
  0x17   : > { %p48_p8 = scmp.ge.s32.totalorder %s1337_s27, 2  ;;  %p158_p9 = scmp.eq.s32.totalorder %s914_s28, 3 }
  0x18   : > { %s53_s29 = ssub.s32 %s1114_s23, %s1335_s26  ;;  %p1202_p10 = por %p65_p7, %p64_p6 }
  0x19   : > { %s1339_s27 = smov (%p48_p8, %s1337_s27), 0  ;;  %p1208_p11 = por %p158_p9, %p64_p6 }
  0x1a   : > { %s50_s6 = ssub.s32 %s1118_s24, %s1339_s27  ;;  %s57_s8 = sadd.s32 1, %s1102_s21 }
  0x1b   : > { %s54_s7 = sor.u32 %s53_s29, %s50_s6  ;;  %p917_p13 = scmp.ge.s32.totalorder %s1122_s25, 4 }
  0x1c   : > { %p55_p12 = scmp.eq.s32.totalorder %s54_s7, 0 }
  0x1d   : > { %180 = sbr.rel (%p917_p13) target bundleno = 59 (0x3b), region = 16 }
  0x1e   : > { %s1216_s9 = scalar_select %p55_p12, %s1102_s21, %s57_s8  }
  0x24   : > { %183 = sbr.rel (!%p1202_p10) target bundleno = 45 (0x2d), region = 20  ;;  %s185_s10 = sand.u32 (%p1202_p10), 1, %s1102_s21  }
  0x25   : > { %s967_s11 = smul.u32 (%p1202_p10), 6, %s1118_s24 }
  0x26   : > { %s966_s12 = smul.u32 (%p1202_p10), 12, %s185_s10 }
  0x27   : > { %s192_s13 = sadd.s32 (%p1202_p10), %s1114_s23, %s967_s11 }
  0x28   : > { %s918_s14 = sshll.u32 (%p1202_p10), %s192_s13, 2  ;;  %s187_s18 = scalar_lea.vmem (%p1202_p10), [#allocation7], %s966_s12 }
  0x29   : > { %s194_s17 = scalar_lea.vmem (%p1202_p10), %s1320_s1, %s918_s14 }
  0x2a   : > { %v210_v0 = vld [vmem:[%s194_s17] sm:$0xf] (%p1202_p10)  ;;  %v212_v1 = vld [vmem:[%s194_s17 + $0x8] sm:$0xf] (%p1202_p10)  ;;  %v214_v2 = vld [vmem:[%s194_s17 + $0x10] sm:$0xf] (%p1202_p10) }
  0x2b   : > { %211 = vst [vmem:[%s187_s18] sm:$0xf] %v210_v0  ;;  %213 = vst [vmem:[%s187_s18 + $0x4] sm:$0xf] %v212_v1 }
  0x2c   : > { %215 = vst [vmem:[%s187_s18 + $0x8] sm:$0xf] %v214_v2 }
  0x2d PF: > { %244 = sbr.rel (!%p1202_p10) target bundleno = 52 (0x34), region = 61  ;;  %s246_s19 = sand.u32 (%p1202_p10), 1, %s1102_s21  }
  0x2e   : > { %s920_s28 = sshll.u32 (%p1202_p10), %s1118_s24, 2  ;;  %s919_s29 = sshll.u32 (%p1202_p10), %s246_s19, 3 }
  0x2f   : > { %s253_s6 = sadd.s32 (%p1202_p10), %s1114_s23, %s920_s28  ;;  %s248_s12 = scalar_lea.vmem (%p1202_p10), [#allocation8], %s919_s29 }
  0x30   : > { %s921_s7 = sshll.u32 (%p1202_p10), %s253_s6, 2 }
  0x31   : > { %s255_s11 = scalar_lea.vmem (%p1202_p10), %s1321_s2, %s921_s7 }
  0x32   : > { %v271_v3 = vld [vmem:[%s255_s11] sm:$0xf] (%p1202_p10)  ;;  %v273_v4 = vld [vmem:[%s255_s11 + $0x8] sm:$0xf] (%p1202_p10) }
  0x33   : > { %272 = vst [vmem:[%s248_s12] sm:$0xf] (%p1202_p10), %v271_v3  ;;  %274 = vst [vmem:[%s248_s12 + $0x4] sm:$0xf] (%p1202_p10), %v273_v4 }
  0x34 PF: > { %301 = sbr.rel (!%p1202_p10) target bundleno = 59 (0x3b), region = 102  ;;  %s303_s13 = sand.u32 (%p1202_p10), 1, %s1102_s21  }
  0x35   : > { %s923_s14 = sshll.u32 (%p1202_p10), %s1118_s24, 2  ;;  %s922_s15 = sshll.u32 (%p1202_p10), %s303_s13, 3 }
  0x36   : > { %s310_s16 = sadd.s32 (%p1202_p10), %s1114_s23, %s923_s14  ;;  %s305_s29 = scalar_lea.vmem (%p1202_p10), [#allocation9], %s922_s15 }
  0x37   : > { %s924_s17 = sshll.u32 (%p1202_p10), %s310_s16, 2 }
  0x38   : > { %s312_s28 = scalar_lea.vmem (%p1202_p10), %s1322_s3, %s924_s17 }
  0x39   : > { %v328_v5 = vld [vmem:[%s312_s28] sm:$0xf] (%p1202_p10)  ;;  %v330_v6 = vld [vmem:[%s312_s28 + $0x8] sm:$0xf] (%p1202_p10) }
  0x3a   : > { %329 = vst [vmem:[%s305_s29] sm:$0xf] (%p1202_p10), %v328_v5  ;;  %331 = vst [vmem:[%s305_s29 + $0x4] sm:$0xf] (%p1202_p10), %v330_v6 }
  0x3b PF: > { %p925_p0 = scmp.ge.s32.totalorder %s1122_s25, 1  ;;  %p357_p1 = scmp.lt.s32.totalorder %s1122_s25, 5 }
  0x3d   : > { %p358_p2 = pnand %p925_p0, %p357_p1 }
  0x3e   : > { %s364_s30 = sand.u32 (!%p358_p2), 1, %s1098_s20   ;;  %vm417_vm0 = vcmask (!%p358_p2), 7168   ;;  %v1125_v10 = vmov (!%p358_p2), -1e+30   ;;  %s427_s20 = sld [smem:[#allocation6 + %s1110_s0]] (!%p358_p2)  ;;  %v498_v11 = vlaneseq (!%p358_p2)  ;;  %vm510_vm2 = vcmask (!%p358_p2), 130048  }
  0x3f   : > { %361 = sbr.rel (%p358_p2) target bundleno = 893 (0x37d), region = 143  ;;  %s1246_s6 = sshll.u32 (!%p358_p2), %s364_s30, 3  ;;  %420 = vst.msk [vmem:[#allocation2 + $0x10] sm:$0xff] (!%p358_p2), %vm417_vm0, %v1125_v10  ;;  %418 = vst.msk [vmem:[#allocation2] sm:$0xff] (!%p358_p2), %vm417_vm0, %v1125_v10  ;;  %v1126_v25 = vmov (!%p358_p2), 0   ;;  %v1127_v26 = vmov (!%p358_p2), 0.0  }
  0x40   : > { %s1248_s7 = smul.u32 (!%p358_p2), 12, %s364_s30  ;;  %s373_s8 = scalar_lea.vmem (!%p358_p2), [#allocation8], %s1246_s6  ;;  %419 = vst.msk [vmem:[#allocation2 + $0x8] sm:$0xff] (!%p358_p2), %vm417_vm0, %v1125_v10  ;;  %v499_v12 = vand.u32 (!%p358_p2), 127, %v498_v11  ;;  %1030 = vset.pattern.permute.xlu1 (!%p358_p2), %v1126_v25  ;;  %1031 = vset.pattern.permute.xlu0 (!%p358_p2), %v1126_v25  ;;  %421 = vst.msk [vmem:[#allocation3] sm:$0xff] (!%p358_p2), %vm417_vm0, %v1127_v26 }
  0x41   : > { %v1032_v7 = vld [vmem:[%s373_s8] sm:$0xff] (!%p358_p2)   ;;  %422 = vst.msk [vmem:[#allocation3 + $0x8] sm:$0xff] (!%p358_p2), %vm417_vm0, %v1127_v26  ;;  %423 = vst.msk [vmem:[#allocation3 + $0x10] sm:$0xff] (!%p358_p2), %vm417_vm0, %v1127_v26  ;;  %s380_s11 = scalar_lea.vmem (!%p358_p2), [#allocation9], %s1246_s6 }
  0x42   : > { %s366_s10 = scalar_lea.vmem (!%p358_p2), [#allocation7], %s1248_s7  ;;  %954 = vmatprep.subr.bf16.mxu0 (!%p358_p2), %v1032_v7  ;;  %v1035_v39 = vld [vmem:[%s380_s11] sm:$0xff] (!%p358_p2)   ;;  %s407_s12 = scalar_lea.vmem (!%p358_p2), [#allocation10], %s1248_s7 }
  0x43   : > { %v1033_v8 = vld [vmem:[%s366_s10] sm:$0xff] (!%p358_p2)   ;;  %955 = vmatpush3.bf16.xpose.msra.mxu0 (!%p358_p2), %v1032_v7  ;;  %v1034_v9 = vld [vmem:[%s366_s10 + $0x8] ss:$0 sps:$4 sm:$0xff] (!%p358_p2)   ;;  %960 = vmatprep.subr.bf16.mxu1 (!%p358_p2), %v1035_v39 }
  0x44   : > { %956 = vmatprep.mubr.bf16.mxu0 (!%p358_p2), %v1033_v8  ;;  %v502_v13 = vstv (!%p358_p2), %s427_s20  ;;  %961 = vmatpush3.bf16.msra.mxu1 (!%p358_p2), %v1035_v39 }
  0x45   : > { %vm1256_vm1 = vcmp.lt.s32.totalorder (!%p358_p2), %v499_v12, %v502_v13 }
  0x46   : > { %v509_v27 = vld [vmem:[#allocation2 + $0x10] sm:$0xff]  ;;  %v507_v28 = vld [vmem:[#allocation2] sm:$0xff]  ;;  %s969_s13 = smul.u32 (%p1208_p11), 6, %s1110_s0 }
  0x47   : > { %v508_v34 = vld [vmem:[#allocation2 + $0x8] sm:$0xff]  ;;  %v559_v2 = vld [vmem:[#allocation3] sm:$0xff] }
  0x48   : > { %v561_v5 = vld [vmem:[#allocation3 + $0x10] sm:$0xff]  ;;  %v560_v7 = vld [vmem:[#allocation3 + $0x8] sm:$0xff]  ;;  %s738_s14 = sadd.s32 (%p1208_p11), %s1106_s22, %s969_s13 }
  0x49   : > { %s937_s15 = sshll.u32 (%p1208_p11), %s738_s14, 2 }
  0x4a   : > { %957 = vmatmul.mubr.bf16.vlgmr.msra.gmra.mrb[0].mxu0 %v1034_v9  ;;  %s740_s18 = scalar_lea.vmem (%p1208_p11), %s1323_s4, %s937_s15 }
 0x11d   : > { %v958_v15 = vpop.f32.mrb[0].mxu0 }
 0x11e   : > { %v506_v16 = vsel %vm1256_vm1, %v958_v15, -1e+30  ;;  %v483_v17 = vpop.f32.mrb[1].mxu0 }
 0x11f   : > { %v504_v18 = vsel %vm1256_vm1, %v483_v17, -1e+30  ;;  %v959_v19 = vpop.f32.mrb[2].mxu0  ;;  %v517_v20 = vsel %vm510_vm2, %v506_v16, -inf }
 0x120   : > { %518 = vmax.xlane.f32.xlu1 %v517_v20  ;;  %v486_v21 = vpop.f32.mrb[3].mxu0  ;;  %v511_v22 = vsel %vm510_vm2, %v504_v18, -inf }
 0x121   : > { %v505_v23 = vsel %vm1256_vm1, %v486_v21, -1e+30  ;;  %512 = vmax.xlane.f32.xlu0 %v511_v22 }
 0x122   : > { %v514_v24 = vsel %vm510_vm2, %v505_v23, -inf }
 0x125   : > { %515 = vmax.xlane.f32.xlu0 %v514_v24 }
 0x1ad   : > { %v519_v29 = vpop.xlane.xlu1 %518 }
 0x1ae   : > { %v522_v30 = vmax.f32 %v509_v27, %v519_v29  ;;  %v513_v31 = vpop.xlane.xlu0 %512 }
 0x1af   : > { %v520_v32 = vmax.f32 %v507_v28, %v513_v31 }
 0x1b0   : > { %v525_v33 = vsub.f32 %v509_v27, %v522_v30  ;;  %674 = vst.msk [vmem:[#allocation2 + $0x10] sm:$0xff] %vm417_vm0, %v522_v30 }
 0x1b1   : > { %v523_v35 = vsub.f32 %v507_v28, %v520_v32  ;;  %672 = vst.msk [vmem:[#allocation2] sm:$0xff] %vm417_vm0, %v520_v32  ;;  %534 = vperm.xlu1 %1030, %v520_v32  }
 0x1b2   : > { %v516_v36 = vpop.xlane.xlu0 %515  ;;  %v530_v62 = vmul.f32 1.442695, %v525_v33 }
 0x1b3   : > { %v521_v37 = vmax.f32 %v508_v34, %v516_v36  ;;  %v526_v60 = vmul.f32 1.442695, %v523_v35 }
 0x1b5   : > { %v524_v38 = vsub.f32 %v508_v34, %v521_v37  ;;  %673 = vst.msk [vmem:[#allocation2 + $0x8] sm:$0xff] %vm417_vm0, %v521_v37  ;;  %544 = vperm.xlu1 %1030, %v522_v30   ;;  %539 = vperm.xlu0 %1031, %v521_v37  }
 0x1b7   : > { %v528_v61 = vmul.f32 1.442695, %v524_v38 }
 0x230   : > { %v535_v40 = vpop.permute.xlu1 %534 }
 0x231   : > { %v547_v41 = vsub.f32 %v504_v18, %v535_v40 }
 0x233   : > { %v550_v42 = vmul.f32 1.442695, %v547_v41 }
 0x234   : > { %v545_v43 = vpop.permute.xlu1 %544  ;;  %v540_v44 = vpop.permute.xlu0 %539 }
 0x235   : > { %1036 = vpow2.f32 %v550_v42  ;;  %v549_v45 = vsub.f32 %v506_v16, %v545_v43  ;;  %v548_v46 = vsub.f32 %v505_v23, %v540_v44 }
 0x237   : > { %v554_v47 = vmul.f32 1.442695, %v549_v45  ;;  %v552_v48 = vmul.f32 1.442695, %v548_v46 }
 0x239   : > { %1038 = vpow2.f32 %v554_v47 }
 0x23a   : > { %1040 = vpow2.f32 %v552_v48 }
 0x23b   : > { %1042 = vpow2.f32 %v526_v60 }
 0x23c   : > { %1044 = vpow2.f32 %v528_v61 }
 0x23d   : > { %1046 = vpow2.f32 %v530_v62 }
 0x23f   : > { %v1037_v49 = vpop.eup %1036 }
 0x240   : > { %v556_v50 = vsel %vm1256_vm1, %v1037_v49, 0.0 }
 0x241   : > { %v565_v51 = vsel %vm510_vm2, %v556_v50, 0.0 }
 0x242   : > { %566 = vadd.xlane.f32.xlu1 %v565_v51 }
 0x243   : > { %v1039_v52 = vpop.eup %1038 }
 0x244   : > { %v1041_v53 = vpop.eup %1040  ;;  %v558_v54 = vsel %vm1256_vm1, %v1039_v52, 0.0 }
 0x245   : > { %v571_v55 = vsel %vm510_vm2, %v558_v54, 0.0  ;;  %v603_v56 = vpack.c.bf16 %v558_v54, %v558_v54  ;;  %v557_v57 = vsel %vm1256_vm1, %v1041_v53, 0.0  ;;  %v1043_v63 = vpop.eup %1042 }
 0x246   : > { %572 = vadd.xlane.f32.xlu1 %v571_v55  ;;  %v568_v58 = vsel %vm510_vm2, %v557_v57, 0.0  ;;  %v602_v59 = vpack.c.bf16 %v557_v57, %v556_v50  ;;  %v1045_v0 = vpop.eup %1044  ;;  %v562_v3 = vmul.f32 %v1043_v63, %v559_v2 }
 0x247   : > { %569 = vadd.xlane.f32.xlu0 %v568_v58  ;;  %v1047_v1 = vpop.eup %1046  ;;  %v563_v10 = vmul.f32 %v1045_v0, %v560_v7 }
 0x248   : > { %962 = vmatprep.mubr.msk.bf16.mxu1 %vm510_vm2, %v602_v59  ;;  %v564_v8 = vmul.f32 %v1047_v1, %v561_v5 }
 0x249   : > { %963 = vmatmul.mubr.msk.bf16.vlgmr.msra.gmra.mrb[0].mxu1 %vm510_vm2, %v603_v56 }
 0x257   : > { %586 = vperm.xlu1 %1030, %v1043_v63  }
 0x25b   : > { %591 = vperm.xlu1 %1030, %v1045_v0  }
 0x25d   : > { %596 = vperm.xlu0 %1031, %v1047_v1  }
 0x2cf   : > { %v567_v4 = vpop.xlane.xlu1 %566 }
 0x2d0   : > { %v574_v6 = vadd.f32 %v567_v4, %v562_v3 }
 0x2d2   : > { %578 = vst.msk [vmem:[#allocation3] sm:$0xff] %vm417_vm0, %v574_v6 }
 0x2d3   : > { %v573_v9 = vpop.xlane.xlu1 %572 }
 0x2d4   : > { %v576_v11 = vadd.f32 %v573_v9, %v564_v8  ;;  %v570_v12 = vpop.xlane.xlu0 %569 }
 0x2d5   : > { %v575_v13 = vadd.f32 %v570_v12, %v563_v10 }
 0x2d6   : > { %580 = vst.msk [vmem:[#allocation3 + $0x10] sm:$0xff] %vm417_vm0, %v576_v11 }
 0x2d7   : > { %579 = vst.msk [vmem:[#allocation3 + $0x8] sm:$0xff] %vm417_vm0, %v575_v13  ;;  %v587_v27 = vpop.permute.xlu1 %586 }
 0x2d8   : > { %v599_v30 = vmul.f32 0.0, %v587_v27 }
 0x2d9   : > { %v678_v14 = vld [vmem:[#allocation3] sm:$0xff] }
 0x2da   : > { %vm681_vm3 = vcmp.eq.f32.partialorder %v678_v14, 0.0 }
 0x2db   : > { %v684_v15 = vsel %vm681_vm3, 1.0, %v678_v14  ;;  %v592_v28 = vpop.permute.xlu1 %591 }
 0x2dc   : > { %1048 = vrcp.f32 %v684_v15  ;;  %v600_v31 = vmul.f32 0.0, %v592_v28  ;;  %v597_v32 = vpop.permute.xlu0 %596 }
 0x2dd   : > { %v680_v16 = vld [vmem:[#allocation3 + $0x10] sm:$0xff]  ;;  %v601_v36 = vmul.f32 0.0, %v597_v32 }
 0x2de   : > { %v679_v17 = vld [vmem:[#allocation3 + $0x8] sm:$0xff]  ;;  %vm683_vm5 = vcmp.eq.f32.partialorder %v680_v16, 0.0 }
 0x2df   : > { %vm682_vm4 = vcmp.eq.f32.partialorder %v679_v17, 0.0  ;;  %v686_v19 = vsel %vm683_vm5, 1.0, %v680_v16 }
 0x2e0   : > { %v685_v18 = vsel %vm682_vm4, 1.0, %v679_v17 }
 0x2e1   : > { %1050 = vrcp.f32 %v685_v18 }
 0x2e2   : > { %1052 = vrcp.f32 %v686_v19 }
 0x2e6   : > { %v1049_v20 = vpop.eup %1048 }
 0x2e7   : > { %695 = vperm.xlu1 %1030, %v1049_v20  }
 0x2eb   : > { %v1051_v21 = vpop.eup %1050 }
 0x2ec   : > { %700 = vperm.xlu1 %1030, %v1051_v21   ;;  %v1053_v22 = vpop.eup %1052 }
 0x2f0   : > { %705 = vperm.xlu1 %1030, %v1053_v22  }
 0x31c   : > { %v964_v23 = vpop.f32.mrb[0].mxu1 }
 0x31d   : > { %v652_v24 = vpop.f32.mrb[1].mxu1  ;;  %v668_v39 = vadd.f32 %v964_v23, %v601_v36 }
 0x31e   : > { %v965_v25 = vpop.f32.mrb[2].mxu1  ;;  %v666_v33 = vadd.f32 %v652_v24, %v599_v30 }
 0x31f   : > { %v655_v26 = vpop.f32.mrb[3].mxu1 }
 0x320   : > { %v667_v34 = vadd.f32 %v655_v26, %v600_v31 }
 0x366   : > { %v696_v29 = vpop.permute.xlu1 %695 }
 0x367   : > { %v708_v37 = vmul.f32 %v696_v29, %v666_v33 }
 0x36b   : > { %v701_v35 = vpop.permute.xlu1 %700 }
 0x36c   : > { %v709_v38 = vmul.f32 %v701_v35, %v667_v34 }
 0x36e   : > { %v946_v40 = vpack.c.bf16 %v709_v38, %v708_v37  ;;  %733 = sbr.rel (!%p1208_p11) target bundleno = 893 (0x37d), region = 167 }
 0x36f   : > { %v706_v41 = vpop.permute.xlu1 %705 }
 0x370   : > { %947 = vst [vmem:[%s407_s12] sm:$0xff] %v946_v40   ;;  %v710_v42 = vmul.f32 %v706_v41, %v668_v39 }
 0x372   : > { %v942_v43 = vpack.c.bf16 %v710_v42, %v710_v42 }
 0x374   : > { %726 = vst [vmem:[%s407_s12 + $0x8] sm:$0xf] %v942_v43 }
 0x377   : > { %v756_v44 = vld [vmem:[%s407_s12] sm:$0xf]  ;;  %v758_v45 = vld [vmem:[%s407_s12 + $0x4] sm:$0xf] }
 0x378   : > { %757 = vst [vmem:[%s740_s18] sm:$0xf] %v756_v44  ;;  %759 = vst [vmem:[%s740_s18 + $0x8] sm:$0xf] %v758_v45 }
 0x37b   : > { %v760_v46 = vld [vmem:[%s407_s12 + $0x8] sm:$0xf] }
 0x37c   : > { %761 = vst [vmem:[%s740_s18 + $0x10] sm:$0xf] %v760_v46 }
 0x37d PF: > { %s20_s25 = sadd.s32 1, %s1122_s25   ;;  %s1328_s20 = smov %s1102_s21 }
 0x37e   : > { %p17_p3 = scmp.ge.s32.totalorder %s20_s25, 6   ;;  %s1329_s21 = smov %s1216_s9 }
 0x37f   : > { %s1330_s22 = smov %s1114_s23  ;;  %s1331_s0 = smov %s1118_s24 }
 0x380   : > { %s1332_s23 = smov %s1335_s26  ;;  %s1333_s24 = smov %s1339_s27 }
 0x381   :  { %19 = sbr.rel (!%p17_p3) target bundleno = 19 (0x13), region = 255 }

// kernel: wan_block_forward.26
= control target key start
LH: loop header
LB: loop body
LE: loop exit
PB: predicated region body
PF: predicated region fallthrough
CT: control target
= control target key end

     0   :  { %s1117_s15 = smov 0   ;;  %s1119_s16 = smov 0   ;;  %s1271_s0 = inlined_call_operand.vmem [shape: bf16[2,24,256], index: 0, kind: input, shape index: {}]   ;;  %s1272_s1 = inlined_call_operand.vmem [shape: bf16[256,256], index: 1, kind: input, shape index: {}]   ;;  %s1273_s2 = inlined_call_operand.vmem [shape: f32[1,256], index: 2, kind: input, shape index: {}]   ;;  %s1274_s3 = inlined_call_operand.vmem [shape: f32[2,24,256], index: 3, kind: input, shape index: {}, may-alias: {3,4}]   ;;  %s1275_s4 = inlined_call_operand.vmem [shape: f32[2,24,256], index: 4, kind: output, shape index: {}, may-alias: {3,4}]  }
   0x1   :  { %s1121_s17 = smov 0  }
   0x2 LB: > { %s40_s18 = sadd.s32 1, %s1086_s16  ;;  %p915_p0 = scmp.ge.s32.totalorder %s1090_s17, 1  ;;  %s1090_s17 = sphi %s1121_s17, %s14_s17   ;;  %s1086_s16 = sphi %s1119_s16, %s1277_s16   ;;  %s1082_s15 = sphi %s1117_s15, %s1276_s15  }
   0x3   : > { %p42_p1 = scmp.ge.s32.totalorder %s40_s18, 2  ;;  %p261_p2 = scmp.lt.s32.totalorder %s1090_s17, 3 }
   0x5   : > { %s1279_s18 = smov (%p42_p1, %s40_s18), 0  ;;  %p262_p3 = pnand %p915_p0, %p261_p2 }
   0x6   : > { %v1015_v0 = vld [vmem:[%s1272_s1 + $0x4] ss:$8 sps:$4 sm:$0xff] (!%p262_p3)   ;;  %v1017_v1 = vld [vmem:[%s1272_s1] ss:$8 sps:$4 sm:$0xff] (!%p262_p3)   ;;  %v1018_v2 = vld [vmem:[%s1272_s1 + $0x14] ss:$8 sps:$4 sm:$0xff] (!%p262_p3)   ;;  %v700_v37 = vlaneseq (!%p262_p3) }
   0x7   : > { %265 = sbr.rel (%p262_p3) target bundleno = 291 (0x123), region = 36  ;;  %626 = vmatprep.subr.bf16.mxu0 (!%p262_p3), %v1015_v0  ;;  %957 = vmatprep.subr.bf16.mxu1 (!%p262_p3), %v1015_v0  ;;  %v1020_v3 = vld [vmem:[%s1272_s1 + $0x10] ss:$8 sps:$4 sm:$0xff] (!%p262_p3)   ;;  %v1021_v4 = vld [vmem:[%s1272_s1 + $0x24] ss:$8 sps:$4 sm:$0xff] (!%p262_p3)   ;;  %p335_p4 = scmp.lt.s32.totalorder (!%p262_p3), %s1082_s15, 1 }
   0x8   : > { %627 = vmatpush1.bf16.msra.mxu0 (!%p262_p3), %v1017_v1  ;;  %973 = vmatpush1.bf16.msra.mxu1 (!%p262_p3), %v1017_v1  ;;  %v1023_v5 = vld [vmem:[%s1272_s1 + $0x20] ss:$8 sps:$4 sm:$0xff] (!%p262_p3)   ;;  %v1024_v6 = vld [vmem:[%s1272_s1 + $0x34] ss:$8 sps:$4 sm:$0xff] (!%p262_p3)   ;;  %v1026_v7 = vld [vmem:[%s1272_s1 + $0x30] ss:$8 sps:$4 sm:$0xff] (!%p262_p3)  }
   0x9   : > { %628 = vmatprep.subr.bf16.mxu0 (!%p262_p3), %v1018_v2  ;;  %958 = vmatprep.subr.bf16.mxu1 (!%p262_p3), %v1018_v2  ;;  %v1027_v8 = vld [vmem:[%s1272_s1 + $0x44] ss:$8 sps:$4 sm:$0xff] (!%p262_p3)   ;;  %v1029_v9 = vld [vmem:[%s1272_s1 + $0x40] ss:$8 sps:$4 sm:$0xff] (!%p262_p3)   ;;  %v1030_v10 = vld [vmem:[%s1272_s1 + $0x54] ss:$8 sps:$4 sm:$0xff] (!%p262_p3)  }
   0xa   : > { %v1032_v11 = vld [vmem:[%s1272_s1 + $0x50] ss:$8 sps:$4 sm:$0xff] (!%p262_p3)   ;;  %v1033_v12 = vld [vmem:[%s1272_s1 + $0x64] ss:$8 sps:$4 sm:$0xff] (!%p262_p3)   ;;  %v1035_v15 = vld [vmem:[%s1272_s1 + $0x60] ss:$8 sps:$4 sm:$0xff] (!%p262_p3)  }
   0xb   : > { %v1036_v17 = vld [vmem:[%s1272_s1 + $0x74] ss:$8 sps:$4 sm:$0xff] (!%p262_p3)   ;;  %v1038_v18 = vld [vmem:[%s1272_s1 + $0x70] ss:$8 sps:$4 sm:$0xff] (!%p262_p3)   ;;  %v1039_v19 = vld [vmem:[%s1272_s1 + $0x84] ss:$8 sps:$4 sm:$0xff] (!%p262_p3)  }
   0xc   : > { %629 = vmatpush1.bf16.msra.mxu0 (!%p262_p3), %v1020_v3  ;;  %974 = vmatpush1.bf16.msra.mxu1 (!%p262_p3), %v1020_v3  ;;  %v1041_v20 = vld [vmem:[%s1272_s1 + $0x80] ss:$8 sps:$4 sm:$0xff] (!%p262_p3)   ;;  %v1042_v21 = vld [vmem:[%s1272_s1 + $0x94] ss:$8 sps:$4 sm:$0xff] (!%p262_p3)   ;;  %v1044_v22 = vld [vmem:[%s1272_s1 + $0x90] ss:$8 sps:$4 sm:$0xff] (!%p262_p3)  }
   0xd   : > { %630 = vmatprep.subr.bf16.mxu0 (!%p262_p3), %v1021_v4  ;;  %959 = vmatprep.subr.bf16.mxu1 (!%p262_p3), %v1021_v4  ;;  %v1045_v23 = vld [vmem:[%s1272_s1 + $0xa4] ss:$8 sps:$4 sm:$0xff] (!%p262_p3)   ;;  %v1047_v24 = vld [vmem:[%s1272_s1 + $0xa0] ss:$8 sps:$4 sm:$0xff] (!%p262_p3)   ;;  %v1048_v25 = vld [vmem:[%s1272_s1 + $0xb4] ss:$8 sps:$4 sm:$0xff] (!%p262_p3)  }
   0xe   : > { %s1281_s15 = smov (!%p335_p4, %s1082_s15), 1  ;;  %v1050_v26 = vld [vmem:[%s1272_s1 + $0xb0] ss:$8 sps:$4 sm:$0xff]   ;;  %v1051_v27 = vld [vmem:[%s1272_s1 + $0xc4] ss:$8 sps:$4 sm:$0xff]   ;;  %v701_v38 = vshrl.u32 %v700_v37, 7 }
   0xf   : > { %s989_s13 = smul.u32 24, %s1281_s15  ;;  %v1053_v28 = vld [vmem:[%s1272_s1 + $0xc0] ss:$8 sps:$4 sm:$0xff]   ;;  %v1054_v29 = vld [vmem:[%s1272_s1 + $0xd4] ss:$8 sps:$4 sm:$0xff]  }
  0x10   : > { %631 = vmatpush1.bf16.msra.mxu0 %v1023_v5  ;;  %975 = vmatpush1.bf16.msra.mxu1 %v1023_v5  ;;  %v1056_v30 = vld [vmem:[%s1272_s1 + $0xd0] ss:$8 sps:$4 sm:$0xff]   ;;  %v1057_v31 = vld [vmem:[%s1272_s1 + $0xe4] ss:$8 sps:$4 sm:$0xff]   ;;  %v1059_v32 = vld [vmem:[%s1272_s1 + $0xe0] ss:$8 sps:$4 sm:$0xff]  }
  0x11   : > { %632 = vmatprep.subr.bf16.mxu0 %v1024_v6  ;;  %960 = vmatprep.subr.bf16.mxu1 %v1024_v6  ;;  %s1181_s24 = scalar_lea.vmem %s1271_s0, %s989_s13  ;;  %v1060_v33 = vld [vmem:[%s1272_s1 + $0xf4] ss:$8 sps:$4 sm:$0xff]   ;;  %v1062_v34 = vld [vmem:[%s1272_s1 + $0xf0] ss:$8 sps:$4 sm:$0xff]   ;;  %s990_s22 = smul.u32 48, %s1281_s15  ;;  %v702_v39 = vsub.s32 0, %v701_v38 }
  0x12   : > { %v1065_v13 = vld [vmem:[%s1181_s24 + $0x4] ss:$8 sps:$4 sm:$0xff]   ;;  %v1188_v14 = vld [vmem:[%s1181_s24 + $0x10] sm:$0xff]  ;;  %v1063_v35 = vld [vmem:[%s1181_s24] ss:$8 sps:$4 sm:$0xff]   ;;  %v706_v41 = vsub.s32 1, %v701_v38 }
  0x13   : > { %v922_v16 = vcombine.high %v1188_v14, %v1188_v14  ;;  %658 = vmatprep.mubr.bf16.mxu0 %v1065_v13  ;;  %v921_v36 = vcombine.low %v1188_v14, %v1188_v14  ;;  %v698_v40 = vld [vmem:[%s1273_s2] sm:$0x3]  ;;  %s379_s24 = scalar_lea.vmem %s1274_s3, %s990_s22  ;;  %s395_s29 = scalar_lea.vmem %s1275_s4, %s990_s22 }
  0x14   : > { %633 = vmatpush1.bf16.msra.mxu0 %v1026_v7  ;;  %976 = vmatpush1.bf16.msra.mxu1 %v1026_v7  ;;  %v703_v42 = vrot.slane %v698_v40, %v702_v39  ;;  %v707_v43 = vrot.slane %v698_v40, %v706_v41  ;;  %v716_v45 = vld [vmem:[%s379_s24] sm:$0xff]  ;;  %v717_v51 = vld [vmem:[%s379_s24 + $0x8] sm:$0xff]  ;;  %v718_v57 = vld [vmem:[%s379_s24 + $0x10] sm:$0xff] }
  0x15   : > { %634 = vmatprep.subr.bf16.mxu0 %v1027_v8  ;;  %961 = vmatprep.subr.bf16.mxu1 %v1027_v8  ;;  %v720_v47 = vld [vmem:[%s379_s24 + $0x20] sm:$0xff]  ;;  %v721_v53 = vld [vmem:[%s379_s24 + $0x28] sm:$0xff]  ;;  %v719_v59 = vld [vmem:[%s379_s24 + $0x18] sm:$0xff] }
  0x16   : > { %668 = vmatprep.mubr.bf16.mxu1 %v922_v16 }
  0x18   : > { %635 = vmatpush1.bf16.msra.mxu0 %v1029_v9  ;;  %977 = vmatpush1.bf16.msra.mxu1 %v1029_v9 }
  0x19   : > { %636 = vmatprep.subr.bf16.mxu0 %v1030_v10  ;;  %962 = vmatprep.subr.bf16.mxu1 %v1030_v10 }
  0x1c   : > { %637 = vmatpush1.bf16.msra.mxu0 %v1032_v11  ;;  %978 = vmatpush1.bf16.msra.mxu1 %v1032_v11 }
  0x1d   : > { %638 = vmatprep.subr.bf16.mxu0 %v1033_v12  ;;  %963 = vmatprep.subr.bf16.mxu1 %v1033_v12 }
  0x20   : > { %639 = vmatpush1.bf16.msra.mxu0 %v1035_v15  ;;  %979 = vmatpush1.bf16.msra.mxu1 %v1035_v15 }
  0x21   : > { %640 = vmatprep.subr.bf16.mxu0 %v1036_v17  ;;  %964 = vmatprep.subr.bf16.mxu1 %v1036_v17 }
  0x24   : > { %641 = vmatpush1.bf16.msra.mxu0 %v1038_v18  ;;  %980 = vmatpush1.bf16.msra.mxu1 %v1038_v18 }
  0x25   : > { %642 = vmatprep.subr.bf16.mxu0 %v1039_v19  ;;  %965 = vmatprep.subr.bf16.mxu1 %v1039_v19 }
  0x28   : > { %643 = vmatpush1.bf16.msra.mxu0 %v1041_v20  ;;  %981 = vmatpush1.bf16.msra.mxu1 %v1041_v20 }
  0x29   : > { %644 = vmatprep.subr.bf16.mxu0 %v1042_v21  ;;  %966 = vmatprep.subr.bf16.mxu1 %v1042_v21 }
  0x2c   : > { %645 = vmatpush1.bf16.msra.mxu0 %v1044_v22  ;;  %982 = vmatpush1.bf16.msra.mxu1 %v1044_v22 }
  0x2d   : > { %646 = vmatprep.subr.bf16.mxu0 %v1045_v23  ;;  %967 = vmatprep.subr.bf16.mxu1 %v1045_v23 }
  0x30   : > { %647 = vmatpush1.bf16.msra.mxu0 %v1047_v24  ;;  %983 = vmatpush1.bf16.msra.mxu1 %v1047_v24 }
  0x31   : > { %648 = vmatprep.subr.bf16.mxu0 %v1048_v25  ;;  %968 = vmatprep.subr.bf16.mxu1 %v1048_v25 }
  0x34   : > { %649 = vmatpush1.bf16.msra.mxu0 %v1050_v26  ;;  %984 = vmatpush1.bf16.msra.mxu1 %v1050_v26 }
  0x35   : > { %650 = vmatprep.subr.bf16.mxu0 %v1051_v27  ;;  %969 = vmatprep.subr.bf16.mxu1 %v1051_v27 }
  0x38   : > { %651 = vmatpush1.bf16.msra.mxu0 %v1053_v28  ;;  %985 = vmatpush1.bf16.msra.mxu1 %v1053_v28 }
  0x39   : > { %652 = vmatprep.subr.bf16.mxu0 %v1054_v29  ;;  %970 = vmatprep.subr.bf16.mxu1 %v1054_v29 }
  0x3c   : > { %653 = vmatpush1.bf16.msra.mxu0 %v1056_v30  ;;  %986 = vmatpush1.bf16.msra.mxu1 %v1056_v30 }
  0x3d   : > { %654 = vmatprep.subr.bf16.mxu0 %v1057_v31  ;;  %971 = vmatprep.subr.bf16.mxu1 %v1057_v31 }
  0x40   : > { %655 = vmatpush1.bf16.msra.mxu0 %v1059_v32  ;;  %987 = vmatpush1.bf16.msra.mxu1 %v1059_v32 }
  0x41   : > { %656 = vmatprep.subr.bf16.mxu0 %v1060_v33  ;;  %972 = vmatprep.subr.bf16.mxu1 %v1060_v33 }
  0x44   : > { %657 = vmatpush1.bf16.msra.mxu0 %v1062_v34  ;;  %988 = vmatpush1.bf16.msra.mxu1 %v1062_v34 }
  0x47   : > { %659 = vmatmul.mubr.bf16.vlgmr.msra.gmra.mrb[0].mxu0 %v1063_v35  ;;  %669 = vmatmul.mubr.bf16.vlgmr.msra.gmra.mrb[0].mxu1 %v921_v36 }
 0x11a   : > { %v660_v44 = vpop.f32.mrb[0].mxu0  ;;  %v670_v46 = vpop.f32.mrb[0].mxu1 }
 0x11b   : > { %v710_v48 = vadd.f32 %v703_v42, %v660_v44  ;;  %v714_v49 = vadd.f32 %v703_v42, %v670_v46  ;;  %v662_v50 = vpop.f32.mrb[1].mxu0  ;;  %v672_v52 = vpop.f32.mrb[1].mxu1 }
 0x11c   : > { %v711_v54 = vadd.f32 %v707_v43, %v662_v50  ;;  %v715_v55 = vadd.f32 %v707_v43, %v672_v52  ;;  %v664_v56 = vpop.f32.mrb[2].mxu0  ;;  %v674_v58 = vpop.f32.mrb[2].mxu1 }
 0x11d   : > { %v722_v60 = vadd.f32 %v716_v45, %v710_v48  ;;  %v726_v61 = vadd.f32 %v720_v47, %v714_v49  ;;  %v712_v62 = vadd.f32 %v703_v42, %v664_v56  ;;  %v666_v63 = vpop.f32.mrb[3].mxu0  ;;  %v675_v0 = vpop.f32.mrb[3].mxu1 }
 0x11e   : > { %v723_v1 = vadd.f32 %v717_v51, %v711_v54  ;;  %v727_v2 = vadd.f32 %v721_v53, %v715_v55  ;;  %v713_v3 = vadd.f32 %v707_v43, %v666_v63 }
 0x11f   : > { %v724_v4 = vadd.f32 %v718_v57, %v712_v62  ;;  %728 = vst [vmem:[%s395_s29] sm:$0xff] %v722_v60  ;;  %732 = vst [vmem:[%s395_s29 + $0x20] sm:$0xff] %v726_v61 }
 0x120   : > { %v725_v5 = vadd.f32 %v719_v59, %v713_v3  ;;  %729 = vst [vmem:[%s395_s29 + $0x8] sm:$0xff] %v723_v1  ;;  %733 = vst [vmem:[%s395_s29 + $0x28] sm:$0xff] %v727_v2 }
 0x121   : > { %730 = vst [vmem:[%s395_s29 + $0x10] sm:$0xff] %v724_v4 }
 0x122   : > { %731 = vst [vmem:[%s395_s29 + $0x18] sm:$0xff] %v725_v5 }
 0x123 PF: > { %s14_s17 = sadd.s32 1, %s1090_s17   ;;  %s1276_s15 = smov %s1086_s16 }
 0x124   : > { %p11_p5 = scmp.ge.s32.totalorder %s14_s17, 4   ;;  %s1277_s16 = smov %s1279_s18 }
 0x126   :  { %13 = sbr.rel (!%p11_p5) target bundleno = 2 (0x2), region = 83 }

// kernel: wan_block_forward.28
= control target key start
LH: loop header
LB: loop body
LE: loop exit
PB: predicated region body
PF: predicated region fallthrough
CT: control target
= control target key end

     0   :  { %s1324_s12 = smov 0   ;;  %s1326_s13 = smov 0   ;;  %s1568_s0 = inlined_call_operand.vmem [shape: bf16[2,24,256], index: 0, kind: input, shape index: {}]   ;;  %s1569_s1 = inlined_call_operand.vmem [shape: bf16[256,512], index: 1, kind: input, shape index: {}]   ;;  %s1570_s2 = inlined_call_operand.vmem [shape: f32[1,512], index: 2, kind: input, shape index: {}]   ;;  %s1571_s3 = inlined_call_operand.vmem [shape: bf16[2,24,512], index: 3, kind: output, shape index: {}]  }
   0x1   :  { %s1328_s14 = smov 0   ;;  %s1330_s15 = smov 0  }
   0x2   :  { %s1332_s16 = smov 0   ;;  %s1334_s17 = smov 0  }
   0x3   :  { %s1336_s18 = smov 0   ;;  %s1338_s19 = smov 0  }
   0x4   :  { %s1340_s20 = smov 0  }
   0x5 LB: > { %s1002_s21 = sadd.s32 4294967295, %s1302_s20   ;;  %s31_s22 = sadd.s32 1, %s1294_s18  ;;  %s1302_s20 = sphi %s1340_s20, %s13_s20   ;;  %s1298_s19 = sphi %s1338_s19, %s1580_s19   ;;  %s1294_s18 = sphi %s1336_s18, %s1579_s18   ;;  %s1290_s17 = sphi %s1334_s17, %s1578_s17   ;;  %s1286_s16 = sphi %s1332_s16, %s1577_s16   ;;  %s1282_s15 = sphi %s1330_s15, %s1576_s15   ;;  %s1278_s14 = sphi %s1328_s14, %s1575_s14   ;;  %s1274_s13 = sphi %s1326_s13, %s1574_s13   ;;  %s1270_s12 = sphi %s1324_s12, %s1573_s12  }
   0x6   : > { %p33_p0 = scmp.ge.s32.totalorder %s31_s22, 2  ;;  %s39_s23 = sadd.s32 1, %s1298_s19 }
   0x7   : > { %s78_s24 = sadd.s32 1, %s1282_s15  ;;  %p85_p1 = scmp.ne.s32.totalorder %s1282_s15, %s1278_s14 }
   0x8   : > { %s1582_s22 = smov (%p33_p0, %s31_s22), 0  ;;  %s1584_s23 = smov (!%p33_p0, %s39_s23), %s1298_s19 }
   0x9   : > { %s74_s25 = ssub.s32 %s1294_s18, %s1582_s22  ;;  %p86_p2 = scmp.eq.s32.totalorder %s1302_s20, 0 }
   0xa   : > { %p41_p3 = scmp.ge.s32.totalorder %s1584_s23, 2  ;;  %p76_p4 = scmp.eq.s32.totalorder %s74_s25, 0 }
   0xb   : > { %p87_p5 = por %p86_p2, %p85_p1  ;;  %s134_s26 = sadd.s32 1, %s1274_s13 }
   0xc   : > { %s1586_s23 = smov (%p41_p3, %s1584_s23), 0  ;;  %p144_p6 = scmp.ne.s32.totalorder %s1274_s13, %s1270_s12 }
   0xd   : > { %s1385_s27 = scalar_select %p76_p4, %s1282_s15, %s78_s24  }
   0xe   : > { %s127_s28 = ssub.s32 %s1298_s19, %s1586_s23  ;;  %p145_p7 = scmp.eq.s32.totalorder %s1002_s21, 3 }
   0xf   : > { %s131_s29 = sor.u32 %s127_s28, %s74_s25  ;;  %p1005_p10 = scmp.ge.s32.totalorder %s1302_s20, 4 }
  0x10   : > { %p132_p8 = scmp.eq.s32.totalorder %s131_s29, 0  ;;  %p1391_p9 = por %p145_p7, %p144_p6 }
  0x11   : > { %167 = sbr.rel (%p1005_p10) target bundleno = 44 (0x2c), region = 16 }
  0x12   : > { %s1396_s4 = scalar_select %p132_p8, %s1274_s13, %s134_s26  }
  0x18   : > { %189 = sbr.rel (!%p87_p5) target bundleno = 44 (0x2c), region = 24  ;;  %s191_s5 = sand.u32 (%p87_p5), 1, %s1282_s15  }
  0x19   : > { %s1056_s6 = sshll.u32 (%p87_p5), %s1294_s18, 3  ;;  %s1006_s7 = sshll.u32 (%p87_p5), %s191_s5, 8 }
  0x1a   : > { %s1404_s10 = scalar_lea.vmem (%p87_p5), %s1569_s1, %s1056_s6  ;;  %s1409_s11 = scalar_lea.vmem (%p87_p5), [#allocation3], %s1006_s7 }
  0x1b   : > { %v289_v0 = vld [vmem:[%s1404_s10] sm:$0xff] (%p87_p5)  ;;  %v291_v1 = vld [vmem:[%s1404_s10 + $0x10] sm:$0xff] (%p87_p5) }
  0x1c   : > { %v293_v2 = vld [vmem:[%s1404_s10 + $0x20] sm:$0xff] (%p87_p5)  ;;  %290 = vst [vmem:[%s1409_s11] sm:$0xff] (%p87_p5), %v289_v0  ;;  %292 = vst [vmem:[%s1409_s11 + $0x8] sm:$0xff] (%p87_p5), %v291_v1  ;;  %v295_v3 = vld [vmem:[%s1404_s10 + $0x30] sm:$0xff] (%p87_p5) }
  0x1d   : > { %294 = vst [vmem:[%s1409_s11 + $0x10] sm:$0xff] (%p87_p5), %v293_v2  ;;  %v297_v4 = vld [vmem:[%s1404_s10 + $0x40] sm:$0xff] (%p87_p5)  ;;  %v299_v5 = vld [vmem:[%s1404_s10 + $0x50] sm:$0xff] (%p87_p5)  ;;  %296 = vst [vmem:[%s1409_s11 + $0x18] sm:$0xff] (%p87_p5), %v295_v3 }
  0x1e   : > { %298 = vst [vmem:[%s1409_s11 + $0x20] sm:$0xff] (%p87_p5), %v297_v4  ;;  %300 = vst [vmem:[%s1409_s11 + $0x28] sm:$0xff] (%p87_p5), %v299_v5  ;;  %v301_v6 = vld [vmem:[%s1404_s10 + $0x60] sm:$0xff] (%p87_p5)  ;;  %v303_v7 = vld [vmem:[%s1404_s10 + $0x70] sm:$0xff] (%p87_p5) }
  0x1f   : > { %v305_v8 = vld [vmem:[%s1404_s10 + $0x80] sm:$0xff]  ;;  %302 = vst [vmem:[%s1409_s11 + $0x30] sm:$0xff] %v301_v6  ;;  %304 = vst [vmem:[%s1409_s11 + $0x38] sm:$0xff] %v303_v7  ;;  %v307_v9 = vld [vmem:[%s1404_s10 + $0x90] sm:$0xff] }
  0x20   : > { %306 = vst [vmem:[%s1409_s11 + $0x40] sm:$0xff] %v305_v8  ;;  %v309_v10 = vld [vmem:[%s1404_s10 + $0xa0] sm:$0xff]  ;;  %v311_v11 = vld [vmem:[%s1404_s10 + $0xb0] sm:$0xff]  ;;  %308 = vst [vmem:[%s1409_s11 + $0x48] sm:$0xff] %v307_v9 }
  0x21   : > { %310 = vst [vmem:[%s1409_s11 + $0x50] sm:$0xff] %v309_v10  ;;  %312 = vst [vmem:[%s1409_s11 + $0x58] sm:$0xff] %v311_v11  ;;  %v313_v12 = vld [vmem:[%s1404_s10 + $0xc0] sm:$0xff]  ;;  %v315_v13 = vld [vmem:[%s1404_s10 + $0xd0] sm:$0xff] }
  0x22   : > { %v317_v14 = vld [vmem:[%s1404_s10 + $0xe0] sm:$0xff]  ;;  %314 = vst [vmem:[%s1409_s11 + $0x60] sm:$0xff] %v313_v12  ;;  %316 = vst [vmem:[%s1409_s11 + $0x68] sm:$0xff] %v315_v13  ;;  %v319_v15 = vld [vmem:[%s1404_s10 + $0xf0] sm:$0xff] }
  0x23   : > { %318 = vst [vmem:[%s1409_s11 + $0x70] sm:$0xff] %v317_v14  ;;  %v321_v16 = vld [vmem:[%s1404_s10 + $0x100] sm:$0xff]  ;;  %v323_v17 = vld [vmem:[%s1404_s10 + $0x110] sm:$0xff]  ;;  %320 = vst [vmem:[%s1409_s11 + $0x78] sm:$0xff] %v319_v15 }
  0x24   : > { %322 = vst [vmem:[%s1409_s11 + $0x80] sm:$0xff] %v321_v16  ;;  %324 = vst [vmem:[%s1409_s11 + $0x88] sm:$0xff] %v323_v17  ;;  %v325_v18 = vld [vmem:[%s1404_s10 + $0x120] sm:$0xff]  ;;  %v327_v19 = vld [vmem:[%s1404_s10 + $0x130] sm:$0xff] }
  0x25   : > { %v329_v20 = vld [vmem:[%s1404_s10 + $0x140] sm:$0xff]  ;;  %326 = vst [vmem:[%s1409_s11 + $0x90] sm:$0xff] %v325_v18  ;;  %328 = vst [vmem:[%s1409_s11 + $0x98] sm:$0xff] %v327_v19  ;;  %v331_v21 = vld [vmem:[%s1404_s10 + $0x150] sm:$0xff] }
  0x26   : > { %330 = vst [vmem:[%s1409_s11 + $0xa0] sm:$0xff] %v329_v20  ;;  %v333_v22 = vld [vmem:[%s1404_s10 + $0x160] sm:$0xff]  ;;  %v335_v23 = vld [vmem:[%s1404_s10 + $0x170] sm:$0xff]  ;;  %332 = vst [vmem:[%s1409_s11 + $0xa8] sm:$0xff] %v331_v21 }
  0x27   : > { %334 = vst [vmem:[%s1409_s11 + $0xb0] sm:$0xff] %v333_v22  ;;  %336 = vst [vmem:[%s1409_s11 + $0xb8] sm:$0xff] %v335_v23  ;;  %v337_v24 = vld [vmem:[%s1404_s10 + $0x180] sm:$0xff]  ;;  %v339_v25 = vld [vmem:[%s1404_s10 + $0x190] sm:$0xff] }
  0x28   : > { %v341_v26 = vld [vmem:[%s1404_s10 + $0x1a0] sm:$0xff]  ;;  %338 = vst [vmem:[%s1409_s11 + $0xc0] sm:$0xff] %v337_v24  ;;  %340 = vst [vmem:[%s1409_s11 + $0xc8] sm:$0xff] %v339_v25  ;;  %v343_v27 = vld [vmem:[%s1404_s10 + $0x1b0] sm:$0xff] }
  0x29   : > { %342 = vst [vmem:[%s1409_s11 + $0xd0] sm:$0xff] %v341_v26  ;;  %v345_v28 = vld [vmem:[%s1404_s10 + $0x1c0] sm:$0xff]  ;;  %v347_v29 = vld [vmem:[%s1404_s10 + $0x1d0] sm:$0xff]  ;;  %344 = vst [vmem:[%s1409_s11 + $0xd8] sm:$0xff] %v343_v27 }
  0x2a   : > { %346 = vst [vmem:[%s1409_s11 + $0xe0] sm:$0xff] %v345_v28  ;;  %348 = vst [vmem:[%s1409_s11 + $0xe8] sm:$0xff] %v347_v29  ;;  %v349_v30 = vld [vmem:[%s1404_s10 + $0x1e0] sm:$0xff]  ;;  %v351_v31 = vld [vmem:[%s1404_s10 + $0x1f0] sm:$0xff] }
  0x2b   : > { %350 = vst [vmem:[%s1409_s11 + $0xf0] sm:$0xff] %v349_v30  ;;  %352 = vst [vmem:[%s1409_s11 + $0xf8] sm:$0xff] %v351_v31 }
  0x2c PF: > { %p1009_p11 = scmp.ge.s32.totalorder %s1302_s20, 1  ;;  %p365_p12 = scmp.lt.s32.totalorder %s1302_s20, 5 }
  0x2e   : > { %p366_p13 = pnand %p1009_p11, %p365_p12 }
  0x2f   : > { %s372_s21 = sand.u32 (!%p366_p13), 1, %s1278_s14   ;;  %p414_p0 = scmp.lt.s32.totalorder (!%p366_p13), %s1290_s17, 1  ;;  %v739_v5 = vlaneseq (!%p366_p13) }
  0x30   : > { %369 = sbr.rel (%p366_p13) target bundleno = 370 (0x172), region = 66  ;;  %s1010_s24 = sshll.u32 (!%p366_p13), %s372_s21, 8 }
  0x31   : > { %s1475_s25 = scalar_lea.vmem (!%p366_p13), [#allocation3], %s1010_s24  ;;  %s1526_s6 = sshll.u32 (!%p366_p13), %s1286_s16, 1  ;;  %v740_v6 = vshrl.u32 (!%p366_p13), %v739_v5, 7 }
  0x32   : > { %v1167_v32 = vld [vmem:[%s1475_s25 + $0x4] ss:$8 sps:$4 sm:$0xff] (!%p366_p13)   ;;  %v1169_v33 = vld [vmem:[%s1475_s25] ss:$8 sps:$4 sm:$0xff] (!%p366_p13)   ;;  %v1170_v34 = vld [vmem:[%s1475_s25 + $0x14] ss:$8 sps:$4 sm:$0xff] (!%p366_p13)  }
  0x33   : > { %665 = vmatprep.subr.bf16.mxu0 (!%p366_p13), %v1167_v32  ;;  %1060 = vmatprep.subr.bf16.mxu1 (!%p366_p13), %v1167_v32  ;;  %v1172_v35 = vld [vmem:[%s1475_s25 + $0x10] ss:$8 sps:$4 sm:$0xff] (!%p366_p13)   ;;  %v1173_v36 = vld [vmem:[%s1475_s25 + $0x24] ss:$8 sps:$4 sm:$0xff] (!%p366_p13)   ;;  %v1175_v37 = vld [vmem:[%s1475_s25 + $0x20] ss:$8 sps:$4 sm:$0xff] (!%p366_p13)  }
  0x34   : > { %666 = vmatpush1.bf16.msra.mxu0 (!%p366_p13), %v1169_v33  ;;  %1076 = vmatpush1.bf16.msra.mxu1 (!%p366_p13), %v1169_v33  ;;  %v1176_v38 = vld [vmem:[%s1475_s25 + $0x34] ss:$8 sps:$4 sm:$0xff] (!%p366_p13)   ;;  %v1178_v39 = vld [vmem:[%s1475_s25 + $0x30] ss:$8 sps:$4 sm:$0xff] (!%p366_p13)   ;;  %v1179_v40 = vld [vmem:[%s1475_s25 + $0x44] ss:$8 sps:$4 sm:$0xff] (!%p366_p13)  }
  0x35   : > { %667 = vmatprep.subr.bf16.mxu0 (!%p366_p13), %v1170_v34  ;;  %1061 = vmatprep.subr.bf16.mxu1 (!%p366_p13), %v1170_v34  ;;  %v1181_v41 = vld [vmem:[%s1475_s25 + $0x40] ss:$8 sps:$4 sm:$0xff] (!%p366_p13)   ;;  %v1182_v42 = vld [vmem:[%s1475_s25 + $0x54] ss:$8 sps:$4 sm:$0xff] (!%p366_p13)   ;;  %v1184_v43 = vld [vmem:[%s1475_s25 + $0x50] ss:$8 sps:$4 sm:$0xff] (!%p366_p13)  }
  0x36   : > { %v1185_v44 = vld [vmem:[%s1475_s25 + $0x64] ss:$8 sps:$4 sm:$0xff] (!%p366_p13)   ;;  %v1187_v47 = vld [vmem:[%s1475_s25 + $0x60] ss:$8 sps:$4 sm:$0xff] (!%p366_p13)   ;;  %v1188_v49 = vld [vmem:[%s1475_s25 + $0x74] ss:$8 sps:$4 sm:$0xff] (!%p366_p13)  }
  0x37   : > { %s415_s14 = scalar_select %p414_p0, %s1290_s17, 1  ;;  %v1190_v50 = vld [vmem:[%s1475_s25 + $0x70] ss:$8 sps:$4 sm:$0xff]   ;;  %v1191_v51 = vld [vmem:[%s1475_s25 + $0x84] ss:$8 sps:$4 sm:$0xff]   ;;  %v741_v7 = vsub.s32 0, %v740_v6 }
  0x38   : > { %668 = vmatpush1.bf16.msra.mxu0 %v1172_v35  ;;  %1077 = vmatpush1.bf16.msra.mxu1 %v1172_v35  ;;  %v1193_v52 = vld [vmem:[%s1475_s25 + $0x80] ss:$8 sps:$4 sm:$0xff]   ;;  %v1194_v53 = vld [vmem:[%s1475_s25 + $0x94] ss:$8 sps:$4 sm:$0xff]   ;;  %v1196_v54 = vld [vmem:[%s1475_s25 + $0x90] ss:$8 sps:$4 sm:$0xff]  }
  0x39   : > { %669 = vmatprep.subr.bf16.mxu0 %v1173_v36  ;;  %1062 = vmatprep.subr.bf16.mxu1 %v1173_v36  ;;  %s1093_s26 = smul.u32 24, %s415_s14  ;;  %v1197_v55 = vld [vmem:[%s1475_s25 + $0xa4] ss:$8 sps:$4 sm:$0xff]   ;;  %v1199_v56 = vld [vmem:[%s1475_s25 + $0xa0] ss:$8 sps:$4 sm:$0xff]   ;;  %p431_p1 = scmp.lt.s32.totalorder %s1526_s6, 3 }
  0x3a   : > { %v1200_v57 = vld [vmem:[%s1475_s25 + $0xb4] ss:$8 sps:$4 sm:$0xff]   ;;  %v1202_v58 = vld [vmem:[%s1475_s25 + $0xb0] ss:$8 sps:$4 sm:$0xff]   ;;  %v1203_v59 = vld [vmem:[%s1475_s25 + $0xc4] ss:$8 sps:$4 sm:$0xff]  }
  0x3b   : > { %s1494_s5 = scalar_lea.vmem %s1568_s0, %s1093_s26  ;;  %v1205_v60 = vld [vmem:[%s1475_s25 + $0xc0] ss:$8 sps:$4 sm:$0xff]   ;;  %v1206_v61 = vld [vmem:[%s1475_s25 + $0xd4] ss:$8 sps:$4 sm:$0xff]   ;;  %v1208_v62 = vld [vmem:[%s1475_s25 + $0xd0] ss:$8 sps:$4 sm:$0xff]  }
  0x3c   : > { %670 = vmatpush1.bf16.msra.mxu0 %v1175_v37  ;;  %1078 = vmatpush1.bf16.msra.mxu1 %v1175_v37  ;;  %v1217_v45 = vld [vmem:[%s1494_s5 + $0x4] ss:$8 sps:$4 sm:$0xff]   ;;  %v1499_v46 = vld [vmem:[%s1494_s5 + $0x10] sm:$0xff]  ;;  %v1211_v0 = vld [vmem:[%s1475_s25 + $0xe0] ss:$8 sps:$4 sm:$0xff]   ;;  %s432_s7 = scalar_select %p431_p1, %s1526_s6, 3 }
  0x3d   : > { %671 = vmatprep.subr.bf16.mxu0 %v1176_v38  ;;  %1063 = vmatprep.subr.bf16.mxu1 %v1176_v38  ;;  %v1016_v48 = vcombine.high %v1499_v46, %v1499_v46  ;;  %v1209_v63 = vld [vmem:[%s1475_s25 + $0xe4] ss:$8 sps:$4 sm:$0xff]   ;;  %v1212_v1 = vld [vmem:[%s1475_s25 + $0xf4] ss:$8 sps:$4 sm:$0xff]   ;;  %v1214_v2 = vld [vmem:[%s1475_s25 + $0xf0] ss:$8 sps:$4 sm:$0xff]   ;;  %v1015_v4 = vcombine.low %v1499_v46, %v1499_v46 }
  0x3e   : > { %697 = vmatprep.mubr.bf16.mxu0 %v1217_v45  ;;  %v1215_v3 = vld [vmem:[%s1494_s5] ss:$8 sps:$4 sm:$0xff]   ;;  %s433_s10 = scalar_lea.vmem %s1570_s2, %s432_s7  ;;  %v745_v9 = vsub.s32 1, %v740_v6  ;;  %s409_s16 = sand.u32 1, %s1270_s12  }
  0x3f   : > { %707 = vmatprep.mubr.bf16.mxu1 %v1016_v48  ;;  %v737_v8 = vld [vmem:[%s433_s10] sm:$0x3]  ;;  %s1092_s11 = smul.u32 24, %s409_s16 }
  0x40   : > { %672 = vmatpush1.bf16.msra.mxu0 %v1178_v39  ;;  %1079 = vmatpush1.bf16.msra.mxu1 %v1178_v39  ;;  %v742_v10 = vrot.slane %v737_v8, %v741_v7  ;;  %v746_v11 = vrot.slane %v737_v8, %v745_v9  ;;  %s1094_s21 = smul.u32 (%p1391_p9), 12, %s1290_s17 }
  0x41   : > { %673 = vmatprep.subr.bf16.mxu0 %v1179_v40  ;;  %1064 = vmatprep.subr.bf16.mxu1 %v1179_v40  ;;  %s411_s12 = scalar_lea.vmem [#allocation4], %s1092_s11 }
  0x42   : > { %s844_s24 = sadd.s32 (%p1391_p9), %s1094_s21, %s1526_s6 }
  0x43   : > { %s1053_s25 = sshll.u32 (%p1391_p9), %s844_s24, 2 }
  0x44   : > { %674 = vmatpush1.bf16.msra.mxu0 %v1181_v41  ;;  %1080 = vmatpush1.bf16.msra.mxu1 %v1181_v41  ;;  %s846_s28 = scalar_lea.vmem (%p1391_p9), %s1571_s3, %s1053_s25 }
  0x45   : > { %675 = vmatprep.subr.bf16.mxu0 %v1182_v42  ;;  %1065 = vmatprep.subr.bf16.mxu1 %v1182_v42 }
  0x48   : > { %676 = vmatpush1.bf16.msra.mxu0 %v1184_v43  ;;  %1081 = vmatpush1.bf16.msra.mxu1 %v1184_v43 }
  0x49   : > { %677 = vmatprep.subr.bf16.mxu0 %v1185_v44  ;;  %1066 = vmatprep.subr.bf16.mxu1 %v1185_v44 }
  0x4c   : > { %678 = vmatpush1.bf16.msra.mxu0 %v1187_v47  ;;  %1082 = vmatpush1.bf16.msra.mxu1 %v1187_v47 }
  0x4d   : > { %679 = vmatprep.subr.bf16.mxu0 %v1188_v49  ;;  %1067 = vmatprep.subr.bf16.mxu1 %v1188_v49 }
  0x50   : > { %680 = vmatpush1.bf16.msra.mxu0 %v1190_v50  ;;  %1083 = vmatpush1.bf16.msra.mxu1 %v1190_v50 }
  0x51   : > { %681 = vmatprep.subr.bf16.mxu0 %v1191_v51  ;;  %1068 = vmatprep.subr.bf16.mxu1 %v1191_v51 }
  0x54   : > { %682 = vmatpush1.bf16.msra.mxu0 %v1193_v52  ;;  %1084 = vmatpush1.bf16.msra.mxu1 %v1193_v52 }
  0x55   : > { %683 = vmatprep.subr.bf16.mxu0 %v1194_v53  ;;  %1069 = vmatprep.subr.bf16.mxu1 %v1194_v53 }
  0x58   : > { %684 = vmatpush1.bf16.msra.mxu0 %v1196_v54  ;;  %1085 = vmatpush1.bf16.msra.mxu1 %v1196_v54 }
  0x59   : > { %685 = vmatprep.subr.bf16.mxu0 %v1197_v55  ;;  %1070 = vmatprep.subr.bf16.mxu1 %v1197_v55 }
  0x5c   : > { %686 = vmatpush1.bf16.msra.mxu0 %v1199_v56  ;;  %1086 = vmatpush1.bf16.msra.mxu1 %v1199_v56 }
  0x5d   : > { %687 = vmatprep.subr.bf16.mxu0 %v1200_v57  ;;  %1071 = vmatprep.subr.bf16.mxu1 %v1200_v57 }
  0x60   : > { %688 = vmatpush1.bf16.msra.mxu0 %v1202_v58  ;;  %1087 = vmatpush1.bf16.msra.mxu1 %v1202_v58 }
  0x61   : > { %689 = vmatprep.subr.bf16.mxu0 %v1203_v59  ;;  %1072 = vmatprep.subr.bf16.mxu1 %v1203_v59 }
  0x64   : > { %690 = vmatpush1.bf16.msra.mxu0 %v1205_v60  ;;  %1088 = vmatpush1.bf16.msra.mxu1 %v1205_v60 }
  0x65   : > { %691 = vmatprep.subr.bf16.mxu0 %v1206_v61  ;;  %1073 = vmatprep.subr.bf16.mxu1 %v1206_v61 }
  0x68   : > { %692 = vmatpush1.bf16.msra.mxu0 %v1208_v62  ;;  %1089 = vmatpush1.bf16.msra.mxu1 %v1208_v62 }
  0x69   : > { %693 = vmatprep.subr.bf16.mxu0 %v1209_v63  ;;  %1074 = vmatprep.subr.bf16.mxu1 %v1209_v63 }
  0x6c   : > { %694 = vmatpush1.bf16.msra.mxu0 %v1211_v0  ;;  %1090 = vmatpush1.bf16.msra.mxu1 %v1211_v0 }
  0x6d   : > { %695 = vmatprep.subr.bf16.mxu0 %v1212_v1  ;;  %1075 = vmatprep.subr.bf16.mxu1 %v1212_v1 }
  0x70   : > { %696 = vmatpush1.bf16.msra.mxu0 %v1214_v2  ;;  %1091 = vmatpush1.bf16.msra.mxu1 %v1214_v2 }
  0x73   : > { %698 = vmatmul.mubr.bf16.vlgmr.msra.gmra.mrb[0].mxu0 %v1215_v3  ;;  %708 = vmatmul.mubr.bf16.vlgmr.msra.gmra.mrb[0].mxu1 %v1015_v4 }
 0x146   : > { %v699_v12 = vpop.f32.mrb[0].mxu0  ;;  %v709_v13 = vpop.f32.mrb[0].mxu1 }
 0x147   : > { %v749_v14 = vadd.f32 %v742_v10, %v699_v12  ;;  %v753_v15 = vadd.f32 %v742_v10, %v709_v13  ;;  %v701_v16 = vpop.f32.mrb[1].mxu0  ;;  %v711_v17 = vpop.f32.mrb[1].mxu1 }
 0x148   : > { %v750_v18 = vadd.f32 %v746_v11, %v701_v16  ;;  %v754_v19 = vadd.f32 %v746_v11, %v711_v17  ;;  %v703_v20 = vpop.f32.mrb[2].mxu0  ;;  %v713_v21 = vpop.f32.mrb[2].mxu1 }
 0x149   : > { %v761_v22 = vmul.f32 0.044715, %v749_v14  ;;  %v765_v23 = vmul.f32 0.044715, %v753_v15  ;;  %v751_v28 = vadd.f32 %v742_v10, %v703_v20  ;;  %v705_v29 = vpop.f32.mrb[3].mxu0  ;;  %v714_v30 = vpop.f32.mrb[3].mxu1 }
 0x14a   : > { %v762_v24 = vmul.f32 0.044715, %v750_v18  ;;  %v766_v25 = vmul.f32 0.044715, %v754_v19  ;;  %v752_v33 = vadd.f32 %v746_v11, %v705_v29  ;;  %v755_v58 = vmul.f32 0.5, %v749_v14 }
 0x14b   : > { %v767_v26 = vmul.f32 %v761_v22, %v749_v14  ;;  %v771_v27 = vmul.f32 %v765_v23, %v753_v15  ;;  %v763_v36 = vmul.f32 0.044715, %v751_v28  ;;  %v759_v61 = vmul.f32 0.5, %v753_v15 }
 0x14c   : > { %v768_v31 = vmul.f32 %v762_v24, %v750_v18  ;;  %v772_v32 = vmul.f32 %v766_v25, %v754_v19  ;;  %v764_v39 = vmul.f32 0.044715, %v752_v33  ;;  %v756_v1 = vmul.f32 0.5, %v750_v18 }
 0x14d   : > { %v773_v34 = vmul.f32 %v767_v26, %v749_v14  ;;  %v777_v35 = vmul.f32 %v771_v27, %v753_v15  ;;  %v769_v42 = vmul.f32 %v763_v36, %v751_v28  ;;  %v760_v5 = vmul.f32 0.5, %v754_v19 }
 0x14e   : > { %v774_v37 = vmul.f32 %v768_v31, %v750_v18  ;;  %v778_v38 = vmul.f32 %v772_v32, %v754_v19  ;;  %v770_v45 = vmul.f32 %v764_v39, %v752_v33  ;;  %v757_v9 = vmul.f32 0.5, %v751_v28 }
 0x14f   : > { %v779_v40 = vadd.f32 %v773_v34, %v749_v14  ;;  %v783_v41 = vadd.f32 %v777_v35, %v753_v15  ;;  %v775_v48 = vmul.f32 %v769_v42, %v751_v28  ;;  %v758_v12 = vmul.f32 0.5, %v752_v33 }
 0x150   : > { %v780_v43 = vadd.f32 %v774_v37, %v750_v18  ;;  %v784_v44 = vadd.f32 %v778_v38, %v754_v19  ;;  %v776_v51 = vmul.f32 %v770_v45, %v752_v33 }
 0x151   : > { %v785_v46 = vmul.f32 0.7978846, %v779_v40  ;;  %v789_v47 = vmul.f32 0.7978846, %v783_v41  ;;  %v781_v52 = vadd.f32 %v775_v48, %v751_v28 }
 0x152   : > { %v786_v49 = vmul.f32 0.7978846, %v780_v43  ;;  %v790_v50 = vmul.f32 0.7978846, %v784_v44  ;;  %v782_v53 = vadd.f32 %v776_v51, %v752_v33 }
 0x153   : > { %1220 = vtanh.f32 %v785_v46  ;;  %v787_v54 = vmul.f32 0.7978846, %v781_v52 }
 0x154   : > { %1222 = vtanh.f32 %v789_v47  ;;  %v788_v55 = vmul.f32 0.7978846, %v782_v53 }
 0x155   : > { %1224 = vtanh.f32 %v786_v49 }
 0x156   : > { %1226 = vtanh.f32 %v790_v50 }
 0x157   : > { %1228 = vtanh.f32 %v787_v54 }
 0x158   : > { %1230 = vtanh.f32 %v788_v55 }
 0x15d   : > { %v1221_v56 = vpop.eup %1220 }
 0x15e   : > { %v1223_v57 = vpop.eup %1222  ;;  %v797_v59 = vadd.f32 1.0, %v1221_v56 }
 0x15f   : > { %v1225_v60 = vpop.eup %1224  ;;  %v801_v62 = vadd.f32 1.0, %v1223_v57 }
 0x160   : > { %v1227_v63 = vpop.eup %1226  ;;  %v803_v0 = vmul.f32 %v797_v59, %v755_v58  ;;  %v798_v2 = vadd.f32 1.0, %v1225_v60 }
 0x161   : > { %v1229_v3 = vpop.eup %1228  ;;  %v807_v4 = vmul.f32 %v801_v62, %v759_v61  ;;  %v802_v6 = vadd.f32 1.0, %v1227_v63 }
 0x162   : > { %v1231_v7 = vpop.eup %1230  ;;  %v804_v8 = vmul.f32 %v798_v2, %v756_v1  ;;  %v799_v10 = vadd.f32 1.0, %v1229_v3 }
 0x163   : > { %v808_v11 = vmul.f32 %v802_v6, %v760_v5  ;;  %v800_v13 = vadd.f32 1.0, %v1231_v7  ;;  %838 = sbr.rel (!%p1391_p9) target bundleno = 370 (0x172), region = 82 }
 0x164   : > { %v1057_v14 = vpack.c.bf16 %v804_v8, %v803_v0  ;;  %v805_v16 = vmul.f32 %v799_v10, %v757_v9 }
 0x165   : > { %v1059_v15 = vpack.c.bf16 %v808_v11, %v807_v4  ;;  %v806_v17 = vmul.f32 %v800_v13, %v758_v12 }
 0x166   : > { %829 = vst [vmem:[%s411_s12] sm:$0xff] %v1057_v14 }
 0x167   : > { %831 = vst [vmem:[%s411_s12 + $0x10] sm:$0xff] %v1059_v15  ;;  %v1058_v18 = vpack.c.bf16 %v806_v17, %v805_v16 }
 0x169   : > { %830 = vst [vmem:[%s411_s12 + $0x8] sm:$0xff] %v1058_v18 }
 0x16d   : > { %v878_v19 = vld [vmem:[%s411_s12] sm:$0xff] }
 0x16e   : > { %v882_v21 = vld [vmem:[%s411_s12 + $0x10] sm:$0xff]  ;;  %879 = vst [vmem:[%s846_s28] sm:$0xff] %v878_v19 }
 0x16f   : > { %883 = vst [vmem:[%s846_s28 + $0x20] sm:$0xff] %v882_v21 }
 0x170   : > { %v880_v20 = vld [vmem:[%s411_s12 + $0x8] sm:$0xff] }
 0x171   : > { %881 = vst [vmem:[%s846_s28 + $0x10] sm:$0xff] %v880_v20 }
 0x172 PF: > { %s13_s20 = sadd.s32 1, %s1302_s20   ;;  %s1573_s12 = smov %s1274_s13 }
 0x173   : > { %p10_p2 = scmp.ge.s32.totalorder %s13_s20, 6   ;;  %s1574_s13 = smov %s1396_s4 }
 0x174   : > { %s1575_s14 = smov %s1282_s15  ;;  %s1576_s15 = smov %s1385_s27 }
 0x175   : > { %s1577_s16 = smov %s1294_s18  ;;  %s1578_s17 = smov %s1298_s19 }
 0x176   : > { %s1579_s18 = smov %s1582_s22  ;;  %s1580_s19 = smov %s1586_s23 }
 0x177   :  { %12 = sbr.rel (!%p10_p2) target bundleno = 5 (0x5), region = 157 }

// kernel: wan_block_forward.29
= control target key start
LH: loop header
LB: loop body
LE: loop exit
PB: predicated region body
PF: predicated region fallthrough
CT: control target
= control target key end

     0   :  { %10 = vsyncpa [#allocation4], 0  ;;  %s2057_s0 = inlined_call_operand.vmem [shape: bf16[2,24,512], index: 0, kind: input, shape index: {}]   ;;  %s2058_s1 = inlined_call_operand.vmem [shape: bf16[512,256], index: 1, kind: input, shape index: {}]   ;;  %s2059_s2 = inlined_call_operand.vmem [shape: f32[1,256], index: 2, kind: input, shape index: {}]   ;;  %s2060_s3 = inlined_call_operand.hbm [shape: f32[2,24,256], index: 3, kind: input, shape index: {}, may-alias: {3,5}]   ;;  %s2061_s4 = inlined_call_operand.vmem [shape: f32[2,1,256], index: 4, kind: input, shape index: {}]   ;;  %s2062_s5 = inlined_call_operand.hbm [shape: f32[2,24,256], index: 5, kind: output, shape index: {}, may-alias: {3,5}]  }
   0x1   :  { %12 = vsyncpa [#allocation4 + $0x1], 0 }
   0x2   :  { %13 = vsyncpa [#allocation5], 0 }
   0x3   :  { %15 = vsyncpa [#allocation5 + $0x1], 0  ;;  %s1655_s18 = smov 0   ;;  %s1657_s19 = smov 0  }
   0x4   :  { %s1659_s20 = smov 0   ;;  %s1661_s21 = smov 0  }
   0x5   :  { %s1663_s22 = smov 0   ;;  %s1665_s23 = smov 0  }
   0x6 LB: > { %s1239_s24 = sadd.s32 4294967295, %s1617_s23   ;;  %s1240_s25 = sadd.s32 4294967294, %s1617_s23   ;;  %s1617_s23 = sphi %s1665_s23, %s21_s23   ;;  %s1613_s22 = sphi %s1663_s22, %s2079_s22   ;;  %s1609_s21 = sphi %s1661_s21, %s2078_s21   ;;  %s1605_s20 = sphi %s1659_s20, %s2077_s20   ;;  %s1601_s19 = sphi %s1657_s19, %s2076_s19   ;;  %s1597_s18 = sphi %s1655_s18, %s2075_s18  }
   0x7   : > { %s47_s26 = sadd.s32 1, %s1613_s22  ;;  %s142_s27 = sadd.s32 1, %s1605_s20 }
   0x8   : > { %p49_p0 = scmp.ge.s32.totalorder %s47_s26, 2  ;;  %p149_p1 = scmp.ne.s32.totalorder %s1605_s20, %s1601_s19 }
   0x9   : > { %p150_p2 = scmp.eq.s32.totalorder %s1617_s23, 0  ;;  %p155_p3 = scmp.ne.s32.totalorder %s1601_s19, %s1597_s18 }
   0xa   : > { %s2081_s26 = smov (%p49_p0, %s47_s26), 0  ;;  %p156_p5 = scmp.eq.s32.totalorder %s1239_s24, 0 }
   0xb   : > { %p1696_p4 = por %p150_p2, %p149_p1  ;;  %s135_s29 = ssub.s32 %s1613_s22, %s2081_s26 }
   0xc   : > { %p211_p6 = scmp.eq.s32.totalorder %s1239_s24, 1  ;;  %p140_p7 = scmp.eq.s32.totalorder %s135_s29, 0 }
   0xd   : > { %p1702_p8 = por %p156_p5, %p155_p3  ;;  %p217_p10 = scmp.eq.s32.totalorder %s1240_s25, 1 }
   0xe   : > { %p1706_p9 = por %p211_p6, %p149_p1  ;;  %p1345_p13 = scmp.lt.s32.totalorder %s1617_s23, 2 }
   0xf   : > { %s1711_s7 = scalar_select %p140_p7, %s1605_s20, %s142_s27  }
  0x10   : > { %s2067_s6 = scalar_select %p1706_p9, 1, 0 }
  0x11   : > { %p1713_p11 = por %p217_p10, %p155_p3  ;;  %s279_s9 = sand.u32 1, %s1605_s20  }
  0x12   : > { %s1328_s10 = smul.u32 48, %s279_s9  ;;  %p1723_p0 = pnand %p1345_p13, %p1696_p4 }
  0x13   : > { %s2068_s8 = scalar_select %p1713_p11, 1, 0 }
  0x14   : > { %s1329_s11 = smul.u32 768, %s1613_s22  ;;  %s283_s16 = scalar_lea.vmem [#allocation3], %s1328_s10 }
  0x15   : > { %s295_s17 = sshll.u32 %s283_s16, 4  ;;  %s1735_s24 = scalar_lea.sflag [#allocation4], %s279_s9  ;;  %s1732_s17 = int_to_ptr.vmem [resolvable:$true] %s295_s17 }
  0x16   : > { %s1730_s15 = scalar_lea.hbm %s2060_s3, %s1329_s11  ;;  %p1507_p3 = pneg %p1723_p0 }
  0x17   : > { %s1505_s25 = scalar_lea.hbm %s1730_s15, 768  ;;  %s1510_s29 = scalar_lea.hbm %s2060_s3, 1536 }
  0x18   : > { %p1506_p2 = scmp.ne.s32.totalorder %s1730_s15, %s1505_s25  ;;  %p1511_p6 = scmp.lt.u32.totalorder %s1730_s15, %s2060_s3 }
  0x19   : > { %p1512_p7 = scmp.lt.u32.totalorder %s1510_s29, %s1505_s25  ;;  %p1514_p13 = scmp.lt.u32.totalorder %s1505_s25, %s1730_s15 }
  0x1a   : > { %p1508_p4 = pnand %p1507_p3, %p1506_p2 }
  0x1b   : > { %p1513_p10 = por %p1512_p7, %p1511_p6 }
  0x1c   : > { %p1509_p5 = pneg %p1508_p4 }
  0x1d   : > { %p1515_p12 = por %p1514_p13, %p1513_p10 }
  0x1f   : > { %p1516_p1 = pnand %p1515_p12, %p1509_p5 }
  0x21   : > { %1519 = shalt.err (!%p1516_p1)
}
  0x22   : > { %s1520_s9 = scalar_lea.vmem %s1732_s17, 768  ;;  %s1619_s13 = smov [#allocation3]  }
  0x23   : > { %p1521_p2 = scmp.ne.s32.totalorder %s1732_s17, %s1520_s9  ;;  %s1525_s14 = sshll.u32 %s1619_s13, 4  ;;  %s1526_s14 = int_to_ptr.vmem [resolvable:$false] %s1525_s14 }
  0x24   : > { %s1527_s16 = scalar_lea.vmem %s1526_s14, 1536  ;;  %p1528_p9 = scmp.lt.s32.totalorder %s1732_s17, %s1526_s14 }
  0x25   : > { %p1523_p4 = pnand %p1521_p2, %p1507_p3  ;;  %p1529_p6 = scmp.lt.s32.totalorder %s1527_s16, %s1520_s9 }
  0x27   : > { %p1524_p11 = pneg %p1523_p4  ;;  %p1530_p7 = por %p1529_p6, %p1528_p9 }
  0x29   : > { %p1531_p10 = pnand %p1530_p7, %p1524_p11 }
  0x2b   : > { %1534 = shalt.err (!%p1531_p10)
}
  0x2c   : > { %s1620_s25 = smov 256   ;;  %s1621_s27 = smov 16  }
  0x2d   : > { %1340 = dma.hbm_to_vmem [thread:$0]  (!%p1723_p0), %s1730_s15, 768, %s1732_s17, %s1735_s24, %s1620_s25, %s1620_s25, %s1621_s27  }
  0x2e   : > { %p315_p12 = scmp.lt.s32.totalorder %s1617_s23, 3  ;;  %p2070_p1 = scmp.ge.s32.totalorder %s1617_s23, 1 }
  0x30   : > { %p316_p3 = pnand %p2070_p1, %p315_p12 }
  0x31   : > { %s1767_s28 = sand.u32 (!%p316_p3), 1, %s1601_s19  }
  0x32   : > { %319 = sbr.rel (%p316_p3) target bundleno = 368 (0x170), region = 40  ;;  %s322_s11 = scalar_lea.sflag (!%p316_p3), [#allocation4], %s1767_s28 }
  0x33   : > { %s2064_s29 = smul.u32 (!%p316_p3), 48, %s1767_s28 }
  0x35   : > { %s1773_s10 = scalar_lea.vmem (!%p316_p3), [#allocation3], %s2064_s29 }
  0x39   : > { %1588 = dma.done.wait (%p1702_p8), %s322_s11, 768  }
  0x3a   : > { %1590 = vsyncadd (%p1702_p8), %s322_s11, 4294966528  ;;  %v1399_v0 = vld [vmem:[%s2058_s1 + $0x4] ss:$8 sps:$4 sm:$0xff]   ;;  %v1403_v2 = vld [vmem:[%s2058_s1] ss:$8 sps:$4 sm:$0xff]   ;;  %p390_p8 = scmp.lt.s32.totalorder %s1609_s21, 1 }
  0x3b   : > { %v1401_v1 = vld [vmem:[%s2058_s1 + $0x104] ss:$8 sps:$4 sm:$0xff]   ;;  %874 = vmatprep.subr.bf16.mxu1 %v1399_v0  ;;  %v1404_v3 = vld [vmem:[%s2058_s1 + $0x100] ss:$8 sps:$4 sm:$0xff]   ;;  %v1405_v4 = vld [vmem:[%s2058_s1 + $0x14] ss:$8 sps:$4 sm:$0xff]  }
  0x3c   : > { %925 = vmatprep.subr.bf16.mxu0 %v1401_v1  ;;  %875 = vmatpush1.bf16.msra.mxu1 %v1403_v2  ;;  %v1407_v5 = vld [vmem:[%s2058_s1 + $0x114] ss:$8 sps:$4 sm:$0xff]   ;;  %v1409_v6 = vld [vmem:[%s2058_s1 + $0x10] ss:$8 sps:$4 sm:$0xff]   ;;  %v1411_v8 = vld [vmem:[%s2058_s1 + $0x24] ss:$8 sps:$4 sm:$0xff]  }
  0x3d   : > { %926 = vmatpush1.bf16.msra.mxu0 %v1404_v3  ;;  %876 = vmatprep.subr.bf16.mxu1 %v1405_v4  ;;  %v1410_v7 = vld [vmem:[%s2058_s1 + $0x110] ss:$8 sps:$4 sm:$0xff]   ;;  %v1413_v9 = vld [vmem:[%s2058_s1 + $0x124] ss:$8 sps:$4 sm:$0xff]   ;;  %v1415_v10 = vld [vmem:[%s2058_s1 + $0x20] ss:$8 sps:$4 sm:$0xff]  }
  0x3e   : > { %927 = vmatprep.subr.bf16.mxu0 %v1407_v5  ;;  %v1416_v11 = vld [vmem:[%s2058_s1 + $0x120] ss:$8 sps:$4 sm:$0xff]   ;;  %v1417_v12 = vld [vmem:[%s2058_s1 + $0x34] ss:$8 sps:$4 sm:$0xff]   ;;  %v1421_v14 = vld [vmem:[%s2058_s1 + $0x30] ss:$8 sps:$4 sm:$0xff]  }
  0x3f   : > { %v1419_v13 = vld [vmem:[%s2058_s1 + $0x134] ss:$8 sps:$4 sm:$0xff]   ;;  %v1422_v15 = vld [vmem:[%s2058_s1 + $0x130] ss:$8 sps:$4 sm:$0xff]   ;;  %v1423_v16 = vld [vmem:[%s2058_s1 + $0x44] ss:$8 sps:$4 sm:$0xff]  }
  0x40   : > { %877 = vmatpush1.bf16.msra.mxu1 %v1409_v6  ;;  %v1425_v17 = vld [vmem:[%s2058_s1 + $0x144] ss:$8 sps:$4 sm:$0xff]   ;;  %v1427_v18 = vld [vmem:[%s2058_s1 + $0x40] ss:$8 sps:$4 sm:$0xff]   ;;  %v1429_v20 = vld [vmem:[%s2058_s1 + $0x54] ss:$8 sps:$4 sm:$0xff]  }
  0x41   : > { %928 = vmatpush1.bf16.msra.mxu0 %v1410_v7  ;;  %878 = vmatprep.subr.bf16.mxu1 %v1411_v8  ;;  %v1428_v19 = vld [vmem:[%s2058_s1 + $0x140] ss:$8 sps:$4 sm:$0xff]   ;;  %v1431_v21 = vld [vmem:[%s2058_s1 + $0x154] ss:$8 sps:$4 sm:$0xff]   ;;  %v1433_v22 = vld [vmem:[%s2058_s1 + $0x50] ss:$8 sps:$4 sm:$0xff]  }
  0x42   : > { %929 = vmatprep.subr.bf16.mxu0 %v1413_v9  ;;  %v1434_v23 = vld [vmem:[%s2058_s1 + $0x150] ss:$8 sps:$4 sm:$0xff]   ;;  %v1435_v24 = vld [vmem:[%s2058_s1 + $0x64] ss:$8 sps:$4 sm:$0xff]   ;;  %v1439_v26 = vld [vmem:[%s2058_s1 + $0x60] ss:$8 sps:$4 sm:$0xff]  }
  0x43   : > { %v1437_v25 = vld [vmem:[%s2058_s1 + $0x164] ss:$8 sps:$4 sm:$0xff]   ;;  %v1440_v27 = vld [vmem:[%s2058_s1 + $0x160] ss:$8 sps:$4 sm:$0xff]   ;;  %v1441_v28 = vld [vmem:[%s2058_s1 + $0x74] ss:$8 sps:$4 sm:$0xff]  }
  0x44   : > { %879 = vmatpush1.bf16.msra.mxu1 %v1415_v10  ;;  %v1443_v29 = vld [vmem:[%s2058_s1 + $0x174] ss:$8 sps:$4 sm:$0xff]   ;;  %v1445_v30 = vld [vmem:[%s2058_s1 + $0x70] ss:$8 sps:$4 sm:$0xff]   ;;  %v1447_v32 = vld [vmem:[%s2058_s1 + $0x84] ss:$8 sps:$4 sm:$0xff]   ;;  %v999_v10 = vlaneseq }
  0x45   : > { %930 = vmatpush1.bf16.msra.mxu0 %v1416_v11  ;;  %880 = vmatprep.subr.bf16.mxu1 %v1417_v12  ;;  %v1446_v31 = vld [vmem:[%s2058_s1 + $0x170] ss:$8 sps:$4 sm:$0xff]   ;;  %v1449_v33 = vld [vmem:[%s2058_s1 + $0x184] ss:$8 sps:$4 sm:$0xff]   ;;  %v1451_v34 = vld [vmem:[%s2058_s1 + $0x80] ss:$8 sps:$4 sm:$0xff]  }
  0x46   : > { %931 = vmatprep.subr.bf16.mxu0 %v1419_v13  ;;  %v1452_v35 = vld [vmem:[%s2058_s1 + $0x180] ss:$8 sps:$4 sm:$0xff]   ;;  %v1453_v36 = vld [vmem:[%s2058_s1 + $0x94] ss:$8 sps:$4 sm:$0xff]   ;;  %s1892_s17 = scalar_select %p390_p8, %s1609_s21, 1  ;;  %v1000_v11 = vshrl.u32 %v999_v10, 7 }
  0x47   : > { %v1455_v37 = vld [vmem:[%s2058_s1 + $0x194] ss:$8 sps:$4 sm:$0xff]   ;;  %v1457_v38 = vld [vmem:[%s2058_s1 + $0x90] ss:$8 sps:$4 sm:$0xff]   ;;  %v1459_v40 = vld [vmem:[%s2058_s1 + $0xa4] ss:$8 sps:$4 sm:$0xff]  }
  0x48   : > { %881 = vmatpush1.bf16.msra.mxu1 %v1421_v14  ;;  %v1458_v39 = vld [vmem:[%s2058_s1 + $0x190] ss:$8 sps:$4 sm:$0xff]   ;;  %s1331_s11 = smul.u32 48, %s1892_s17  ;;  %v1461_v41 = vld [vmem:[%s2058_s1 + $0x1a4] ss:$8 sps:$4 sm:$0xff]   ;;  %s1248_s14 = sshll.u32 %s1892_s17, 1 }
  0x49   : > { %932 = vmatpush1.bf16.msra.mxu0 %v1422_v15  ;;  %882 = vmatprep.subr.bf16.mxu1 %v1423_v16  ;;  %v1463_v42 = vld [vmem:[%s2058_s1 + $0xa0] ss:$8 sps:$4 sm:$0xff]   ;;  %v1465_v44 = vld [vmem:[%s2058_s1 + $0xb4] ss:$8 sps:$4 sm:$0xff]   ;;  %v1469_v46 = vld [vmem:[%s2058_s1 + $0xb0] ss:$8 sps:$4 sm:$0xff]   ;;  %s430_s30 = scalar_lea.vmem %s2061_s4, %s1248_s14 }
  0x4a   : > { %933 = vmatprep.subr.bf16.mxu0 %v1425_v17  ;;  %v1464_v43 = vld [vmem:[%s2058_s1 + $0x1a0] ss:$8 sps:$4 sm:$0xff]   ;;  %s1922_s29 = scalar_lea.vmem %s2057_s0, %s1331_s11  ;;  %v1467_v45 = vld [vmem:[%s2058_s1 + $0x1b4] ss:$8 sps:$4 sm:$0xff]   ;;  %v1470_v48 = vld [vmem:[%s2058_s1 + $0x1b0] ss:$8 sps:$4 sm:$0xff]  }
  0x4b   : > { %v1497_v47 = vld [vmem:[%s1922_s29 + $0x4] ss:$16 sps:$4 sm:$0xff]   ;;  %v1500_v51 = vld [vmem:[%s1922_s29 + $0xc] ss:$16 sps:$4 sm:$0xff]   ;;  %v1475_v52 = vld [vmem:[%s2058_s1 + $0xc0] ss:$8 sps:$4 sm:$0xff]  }
  0x4c   : > { %883 = vmatpush1.bf16.msra.mxu1 %v1427_v18  ;;  %v1471_v49 = vld [vmem:[%s2058_s1 + $0xc4] ss:$8 sps:$4 sm:$0xff]   ;;  %906 = vmatprep.mubr.bf16.mxu1 %v1497_v47  ;;  %v1476_v53 = vld [vmem:[%s2058_s1 + $0x1c0] ss:$8 sps:$4 sm:$0xff]   ;;  %v1477_v54 = vld [vmem:[%s2058_s1 + $0xd4] ss:$8 sps:$4 sm:$0xff]  }
  0x4d   : > { %934 = vmatpush1.bf16.msra.mxu0 %v1428_v19  ;;  %884 = vmatprep.subr.bf16.mxu1 %v1429_v20  ;;  %v1473_v50 = vld [vmem:[%s2058_s1 + $0x1c4] ss:$8 sps:$4 sm:$0xff]   ;;  %v1479_v55 = vld [vmem:[%s2058_s1 + $0x1d4] ss:$8 sps:$4 sm:$0xff]   ;;  %v1481_v56 = vld [vmem:[%s2058_s1 + $0xd0] ss:$8 sps:$4 sm:$0xff]  }
  0x4e   : > { %935 = vmatprep.subr.bf16.mxu0 %v1431_v21  ;;  %957 = vmatprep.mubr.bf16.mxu0 %v1500_v51  ;;  %v1482_v57 = vld [vmem:[%s2058_s1 + $0x1d0] ss:$8 sps:$4 sm:$0xff]   ;;  %v1483_v58 = vld [vmem:[%s2058_s1 + $0xe4] ss:$8 sps:$4 sm:$0xff]   ;;  %v1487_v60 = vld [vmem:[%s2058_s1 + $0xe0] ss:$8 sps:$4 sm:$0xff]  }
  0x4f   : > { %v1485_v59 = vld [vmem:[%s2058_s1 + $0x1e4] ss:$8 sps:$4 sm:$0xff]   ;;  %v1488_v61 = vld [vmem:[%s2058_s1 + $0x1e0] ss:$8 sps:$4 sm:$0xff]   ;;  %v1489_v62 = vld [vmem:[%s2058_s1 + $0xf4] ss:$8 sps:$4 sm:$0xff]  }
  0x50   : > { %885 = vmatpush1.bf16.msra.mxu1 %v1433_v22  ;;  %v1491_v63 = vld [vmem:[%s2058_s1 + $0x1f4] ss:$8 sps:$4 sm:$0xff]   ;;  %v1493_v0 = vld [vmem:[%s2058_s1 + $0xf0] ss:$8 sps:$4 sm:$0xff]   ;;  %v454_v2 = vld [vmem:[%s1922_s29 + $0x20] sm:$0xff]  ;;  %v1001_v12 = vsub.s32 0, %v1000_v11 }
  0x51   : > { %936 = vmatpush1.bf16.msra.mxu0 %v1434_v23  ;;  %886 = vmatprep.subr.bf16.mxu1 %v1435_v24  ;;  %v1494_v1 = vld [vmem:[%s2058_s1 + $0x1f0] ss:$8 sps:$4 sm:$0xff]   ;;  %v455_v3 = vld [vmem:[%s1922_s29 + $0x28] sm:$0xff]  ;;  %v1254_v6 = vcombine.high %v454_v2, %v454_v2  ;;  %v1253_v8 = vcombine.low %v454_v2, %v454_v2  ;;  %v997_v13 = vld [vmem:[%s2059_s2] sm:$0x3]  ;;  %v1005_v14 = vsub.s32 1, %v1000_v11 }
  0x52   : > { %937 = vmatprep.subr.bf16.mxu0 %v1437_v25  ;;  %v1495_v4 = vld [vmem:[%s1922_s29] ss:$16 sps:$4 sm:$0xff]   ;;  %v1498_v5 = vld [vmem:[%s1922_s29 + $0x8] ss:$16 sps:$4 sm:$0xff]   ;;  %v1256_v7 = vcombine.high %v455_v3, %v455_v3  ;;  %v1255_v9 = vcombine.low %v455_v3, %v455_v3  ;;  %v1002_v16 = vrot.slane %v997_v13, %v1001_v12  ;;  %s2071_s17 = smul.u32 48, %s1767_s28  ;;  %p2072_p11 = scmp.ne.s32.totalorder %s2067_s6, 0 }
  0x53   : > { %v1021_v15 = vld [vmem:[%s430_s30] sm:$0x3]  ;;  %v1006_v19 = vrot.slane %v997_v13, %v1005_v14  ;;  %s1332_s12 = smul.u32 768, %s1609_s21  ;;  %s1052_s21 = scalar_lea.sflag [#allocation5], %s1767_s28 }
  0x54   : > { %887 = vmatpush1.bf16.msra.mxu1 %v1439_v26  ;;  %v1026_v21 = vrot.slane %v1021_v15, %v1001_v12  ;;  %v1030_v25 = vrot.slane %v1021_v15, %v1005_v14  ;;  %s387_s27 = scalar_lea.vmem [#allocation6], %s2071_s17 }
  0x55   : > { %938 = vmatpush1.bf16.msra.mxu0 %v1440_v27  ;;  %888 = vmatprep.subr.bf16.mxu1 %v1441_v28  ;;  %s1070_s15 = sshll.u32 %s387_s27, 4  ;;  %s2006_s13 = scalar_lea.hbm %s2062_s5, %s1332_s12  ;;  %s2008_s15 = int_to_ptr.vmem [resolvable:$true] %s1070_s15 }
  0x56   : > { %939 = vmatprep.subr.bf16.mxu0 %v1443_v29  ;;  %s1535_s14 = scalar_lea.vmem %s2008_s15, 768 }
  0x57   : > { %p1536_p9 = scmp.ne.s32.totalorder %s2008_s15, %s1535_s14 }
  0x58   : > { %889 = vmatpush1.bf16.msra.mxu1 %v1445_v30 }
  0x59   : > { %940 = vmatpush1.bf16.msra.mxu0 %v1446_v31  ;;  %890 = vmatprep.subr.bf16.mxu1 %v1447_v32  ;;  %v1015_v32 = vld [vmem:[%s1773_s10] sm:$0xff]  ;;  %p1537_p0 = pnand %p1536_p9, %p2072_p11 }
  0x5a   : > { %941 = vmatprep.subr.bf16.mxu0 %v1449_v33 }
  0x5b   : > { %p1538_p5 = pneg %p1537_p0 }
  0x5c   : > { %891 = vmatpush1.bf16.msra.mxu1 %v1451_v34 }
  0x5d   : > { %942 = vmatpush1.bf16.msra.mxu0 %v1452_v35  ;;  %892 = vmatprep.subr.bf16.mxu1 %v1453_v36  ;;  %v1016_v36 = vld [vmem:[%s1773_s10 + $0x8] sm:$0xff] }
  0x5e   : > { %943 = vmatprep.subr.bf16.mxu0 %v1455_v37 }
  0x60   : > { %893 = vmatpush1.bf16.msra.mxu1 %v1457_v38 }
  0x61   : > { %944 = vmatpush1.bf16.msra.mxu0 %v1458_v39  ;;  %894 = vmatprep.subr.bf16.mxu1 %v1459_v40  ;;  %v1017_v39 = vld [vmem:[%s1773_s10 + $0x10] sm:$0xff] }
  0x62   : > { %945 = vmatprep.subr.bf16.mxu0 %v1461_v41 }
  0x64   : > { %895 = vmatpush1.bf16.msra.mxu1 %v1463_v42 }
  0x65   : > { %946 = vmatpush1.bf16.msra.mxu0 %v1464_v43  ;;  %896 = vmatprep.subr.bf16.mxu1 %v1465_v44  ;;  %v1018_v43 = vld [vmem:[%s1773_s10 + $0x18] sm:$0xff] }
  0x66   : > { %947 = vmatprep.subr.bf16.mxu0 %v1467_v45 }
  0x68   : > { %897 = vmatpush1.bf16.msra.mxu1 %v1469_v46 }
  0x69   : > { %948 = vmatpush1.bf16.msra.mxu0 %v1470_v48  ;;  %898 = vmatprep.subr.bf16.mxu1 %v1471_v49 }
  0x6a   : > { %949 = vmatprep.subr.bf16.mxu0 %v1473_v50 }
  0x6c   : > { %899 = vmatpush1.bf16.msra.mxu1 %v1475_v52 }
  0x6d   : > { %950 = vmatpush1.bf16.msra.mxu0 %v1476_v53  ;;  %900 = vmatprep.subr.bf16.mxu1 %v1477_v54 }
  0x6e   : > { %951 = vmatprep.subr.bf16.mxu0 %v1479_v55 }
  0x70   : > { %901 = vmatpush1.bf16.msra.mxu1 %v1481_v56 }
  0x71   : > { %952 = vmatpush1.bf16.msra.mxu0 %v1482_v57  ;;  %902 = vmatprep.subr.bf16.mxu1 %v1483_v58 }
  0x72   : > { %953 = vmatprep.subr.bf16.mxu0 %v1485_v59  ;;  %v1019_v59 = vld [vmem:[%s1773_s10 + $0x20] sm:$0xff] }
  0x74   : > { %903 = vmatpush1.bf16.msra.mxu1 %v1487_v60 }
  0x75   : > { %954 = vmatpush1.bf16.msra.mxu0 %v1488_v61  ;;  %904 = vmatprep.subr.bf16.mxu1 %v1489_v62  ;;  %v1020_v62 = vld [vmem:[%s1773_s10 + $0x28] sm:$0xff]  ;;  %s1622_s10 = smov [#allocation6]  }
  0x76   : > { %955 = vmatprep.subr.bf16.mxu0 %v1491_v63  ;;  %s1539_s11 = sshll.u32 %s1622_s10, 4  ;;  %s1540_s11 = int_to_ptr.vmem [resolvable:$false] %s1539_s11 }
  0x77   : > { %s1541_s16 = scalar_lea.vmem %s1540_s11, 1536  ;;  %p1542_p13 = scmp.lt.s32.totalorder %s2008_s15, %s1540_s11 }
  0x78   : > { %905 = vmatpush1.bf16.msra.mxu1 %v1493_v0  ;;  %p1543_p2 = scmp.lt.s32.totalorder %s1541_s16, %s1535_s14 }
  0x79   : > { %956 = vmatpush1.bf16.msra.mxu0 %v1494_v1 }
  0x7a   : > { %p1544_p4 = por %p1543_p2, %p1542_p13 }
  0x7b   : > { %907 = vmatmul.mubr.bf16.vlgmr.msra.gmra.mrb[0].mxu1 %v1495_v4 }
  0x7c   : > { %958 = vmatmul.mubr.bf16.vlgmr.msra.gmra.mrb[0].mxu0 %v1498_v5  ;;  %916 = vmatprep.mubr.bf16.mxu1 %v1254_v6  ;;  %p1545_p6 = pnand %p1544_p4, %p1538_p5 }
  0x7d   : > { %967 = vmatprep.mubr.bf16.mxu0 %v1256_v7 }
  0x83   : > { %917 = vmatmul.mubr.bf16.gmra.mrb[4].mxu1 %v1253_v8 }
  0x84   : > { %968 = vmatmul.mubr.bf16.gmra.mrb[4].mxu0 %v1255_v9 }
 0x14e   : > { %v908_v17 = vpop.f32.mrb[0].mxu1 }
 0x14f   : > { %v959_v18 = vpop.f32.mrb[0].mxu0  ;;  %v910_v22 = vpop.f32.mrb[1].mxu1 }
 0x150   : > { %v960_v20 = vadd.f32 %v959_v18, %v908_v17  ;;  %v961_v23 = vpop.f32.mrb[1].mxu0  ;;  %v912_v26 = vpop.f32.mrb[2].mxu1 }
 0x151   : > { %v962_v24 = vadd.f32 %v961_v23, %v910_v22  ;;  %v963_v27 = vpop.f32.mrb[2].mxu0  ;;  %v914_v30 = vpop.f32.mrb[3].mxu1 }
 0x152   : > { %v1009_v28 = vadd.f32 %v1002_v16, %v960_v20  ;;  %v964_v29 = vadd.f32 %v963_v27, %v912_v26  ;;  %v965_v31 = vpop.f32.mrb[3].mxu0 }
 0x153   : > { %v1010_v33 = vadd.f32 %v1006_v19, %v962_v24  ;;  %v966_v34 = vadd.f32 %v965_v31, %v914_v30 }
 0x154   : > { %v1033_v35 = vmul.f32 %v1026_v21, %v1009_v28  ;;  %v1011_v37 = vadd.f32 %v1002_v16, %v964_v29 }
 0x155   : > { %v1034_v38 = vmul.f32 %v1030_v25, %v1010_v33  ;;  %v1012_v40 = vadd.f32 %v1006_v19, %v966_v34 }
 0x156   : > { %v1039_v41 = vadd.f32 %v1033_v35, %v1015_v32  ;;  %v1035_v42 = vmul.f32 %v1026_v21, %v1011_v37  ;;  %v918_v46 = vpop.f32.mrb[4].mxu1 }
 0x157   : > { %v1040_v44 = vadd.f32 %v1034_v38, %v1016_v36  ;;  %v1036_v45 = vmul.f32 %v1030_v25, %v1012_v40  ;;  %v969_v47 = vpop.f32.mrb[4].mxu0  ;;  %v920_v50 = vpop.f32.mrb[5].mxu1 }
 0x158   : > { %1045 = vst [vmem:[%s387_s27] sm:$0xff] %v1039_v41  ;;  %v1041_v48 = vadd.f32 %v1035_v42, %v1017_v39  ;;  %v970_v49 = vadd.f32 %v969_v47, %v918_v46  ;;  %v971_v51 = vpop.f32.mrb[5].mxu0  ;;  %v922_v54 = vpop.f32.mrb[6].mxu1 }
 0x159   : > { %1046 = vst [vmem:[%s387_s27 + $0x8] sm:$0xff] %v1040_v44  ;;  %v1042_v52 = vadd.f32 %v1036_v45, %v1018_v43  ;;  %v972_v53 = vadd.f32 %v971_v51, %v920_v50  ;;  %v973_v55 = vpop.f32.mrb[6].mxu0  ;;  %v923_v57 = vpop.f32.mrb[7].mxu1 }
 0x15a   : > { %1047 = vst [vmem:[%s387_s27 + $0x10] sm:$0xff] %v1041_v48  ;;  %v1013_v56 = vadd.f32 %v1002_v16, %v970_v49  ;;  %v974_v58 = vpop.f32.mrb[7].mxu0 }
 0x15b   : > { %1048 = vst [vmem:[%s387_s27 + $0x18] sm:$0xff] %v1042_v52  ;;  %v1014_v60 = vadd.f32 %v1006_v19, %v972_v53 }
 0x15c   : > { %v1037_v61 = vmul.f32 %v1026_v21, %v1013_v56 }
 0x15d   : > { %v1038_v63 = vmul.f32 %v1030_v25, %v1014_v60 }
 0x15e   : > { %v1043_v0 = vadd.f32 %v1037_v61, %v1019_v59 }
 0x15f   : > { %v1044_v1 = vadd.f32 %v1038_v63, %v1020_v62 }
 0x160   : > { %1049 = vst [vmem:[%s387_s27 + $0x20] sm:$0xff] %v1043_v0 }
 0x161   : > { %1050 = vst [vmem:[%s387_s27 + $0x28] sm:$0xff] %v1044_v1 }
 0x162   : > { %1548 = shalt.err (!%p1545_p6)
}
 0x163   : > { %s1549_s30 = scalar_lea.hbm %s2006_s13, 768  ;;  %s1553_s17 = scalar_lea.hbm %s2062_s5, 1536 }
 0x164   : > { %p1550_p7 = scmp.ne.s32.totalorder %s2006_s13, %s1549_s30  ;;  %p1554_p1 = scmp.lt.u32.totalorder %s2006_s13, %s2062_s5 }
 0x165   : > { %p1555_p3 = scmp.lt.u32.totalorder %s1553_s17, %s1549_s30  ;;  %p1557_p9 = scmp.lt.u32.totalorder %s1549_s30, %s2006_s13 }
 0x166   : > { %p1551_p10 = pnand %p1550_p7, %p2072_p11 }
 0x167   : > { %p1556_p8 = por %p1555_p3, %p1554_p1 }
 0x168   : > { %p1552_p12 = pneg %p1551_p10 }
 0x169   : > { %p1558_p0 = por %p1557_p9, %p1556_p8 }
 0x16b   : > { %p1559_p5 = pnand %p1558_p0, %p1552_p12 }
 0x16d   : > { %1562 = shalt.err (!%p1559_p5)
}
 0x16e   : > { %s1623_s24 = smov 256   ;;  %s1624_s9 = smov 16  }
 0x16f   : > { %1335 = dma.vmem_to_hbm [thread:$0]  (%p2072_p11), %s2008_s15, 768, %s2006_s13, %s1052_s21, %s1623_s24, %s1623_s24, %s1624_s9  }
 0x170 PF: > { %s1085_s14 = sand.u32 1, %s1597_s18   ;;  %p2073_p13 = scmp.ne.s32.totalorder %s2068_s8, 0 }
 0x171   : > { %p2074_p2 = scmp.ge.s32.totalorder %s1617_s23, 2  ;;  %s1086_s10 = scalar_lea.sflag [#allocation5], %s1085_s14 }
 0x173   : > { %p1342_p4 = pnand %p2074_p2, %p2073_p13 }
 0x175   : > { %1592 = dma.done.wait (!%p1342_p4), %s1086_s10, 768  }
 0x176   : > { %1594 = vsyncadd (!%p1342_p4), %s1086_s10, 4294966528  ;;  %s21_s23 = sadd.s32 1, %s1617_s23   ;;  %s2075_s18 = smov %s1601_s19 }
 0x177   : > { %p18_p6 = scmp.ge.s32.totalorder %s21_s23, 4   ;;  %s2076_s19 = smov %s1605_s20 }
 0x178   : > { %s2077_s20 = smov %s1711_s7  ;;  %s2078_s21 = smov %s1613_s22 }
 0x179   : > { %s2079_s22 = smov %s2081_s26  ;;  %20 = sbr.rel (!%p18_p6) target bundleno = 6 (0x6), region = 105 }
 0x180   :  { %1091 = vsyncpa [#allocation4], 1 }
 0x181   :  { %1093 = vsyncpa [#allocation4 + $0x1], 1 }
 0x182   :  { %1094 = vsyncpa [#allocation5], 1 }
 0x183   :  { %1096 = vsyncpa [#allocation5 + $0x1], 1 }

</bundles_post_ra>
